<compile_context>
chip_gen: v6e
topology: v6e:2x2x1
jax: 0.10.0
libtpu: 0.0.40
codegen_flags: <defaults>
</compile_context>

<pallas_src>
import functools

import jax
import jax.numpy as jnp
import numpy as np
from jax import lax
from jax.experimental import pallas as pl
from jax.experimental.pallas import tpu as pltpu


def _round_up(x, m):
    return (x + m - 1) // m * m


# ----------------------------------------------------------------------------
# Fused kernel: all LSTM layers + FC head, one batch tile per grid step.
# All shapes seen here are already padded (hidden -> Hp, gates lane-aligned).
# ----------------------------------------------------------------------------
def _fused_sohlstm_kernel(x_ref, *refs, num_layers, hidden_pad, seq_len,
                          batch_tile, matmul_dtype):
    L, Hp, T, Bt = num_layers, hidden_pad, seq_len, batch_tile

    # refs layout: [wih_t, whh_t, b] * L, w1_t, b1, w2_t, b2,
    #              y_ref, hn_ref, cn_ref, proj_scr, seq_scr
    lstm_refs = refs[:3 * L]
    w1_ref, b1_ref, w2_ref, b2_ref = refs[3 * L:3 * L + 4]
    y_ref, hn_ref, cn_ref = refs[3 * L + 4:3 * L + 7]
    proj_scr, seq_scr = refs[3 * L + 7:3 * L + 9]

    # Layer-0 input: whole tile's sequence, time-major, flattened to
    # (T*Bt, D) by the wrapper (already in matmul_dtype) -> no reshape/cast.
    layer_in = x_ref[0]

    h = None
    for l in range(L):
        wih_ref, whh_ref, b_ref = lstm_refs[3 * l:3 * l + 3]

        # --- hoisted input projection: one big MXU matmul over all T steps --
        proj_scr[...] = (jnp.dot(layer_in, wih_ref[...],
                                 preferred_element_type=jnp.float32)
                         + b_ref[...])                        # (T*Bt, 4Hp) f32

        whh = whh_ref[...]                                    # already matmul_dtype
        last_layer = (l == L - 1)

        def step(t, carry, whh=whh, last_layer=last_layer):
            h, c = carry                                      # f32 state
            row = pl.multiple_of(t * Bt, Bt)                  # sublane-aligned
            gates = (proj_scr[pl.ds(row, Bt), :]
                     + jnp.dot(h.astype(matmul_dtype), whh,
                               preferred_element_type=jnp.float32))  # (Bt, 4Hp)
            # Gate slices start on 128-lane boundaries (Hp % 128 == 0).
            i = jax.nn.sigmoid(gates[:, 0 * Hp:1 * Hp])
            f = jax.nn.sigmoid(gates[:, 1 * Hp:2 * Hp])
            g = jnp.tanh(gates[:, 2 * Hp:3 * Hp])
            o = jax.nn.sigmoid(gates[:, 3 * Hp:4 * Hp])
            c_new = f * c + i * g
            h_new = o * jnp.tanh(c_new)
            if not last_layer:                                # next layer's input
                seq_scr[pl.ds(row, Bt), :] = h_new.astype(seq_scr.dtype)
            return h_new, c_new

        h0 = jnp.zeros((Bt, Hp), jnp.float32)
        c0 = jnp.zeros((Bt, Hp), jnp.float32)
        h, c = lax.fori_loop(0, T, step, (h0, c0), unroll=min(T, 8))

        hn_ref[l] = h                                         # written once
        cn_ref[l] = c

        if not last_layer:
            # One hoisted whole-sequence load/cast (not per-step).
            layer_in = seq_scr[...].astype(matmul_dtype)      # (T*Bt, Hp)

    # --- FC head on the last timestep of the top layer (== h) ---------------
    z = (jnp.dot(h.astype(matmul_dtype), w1_ref[...],
                 preferred_element_type=jnp.float32) + b1_ref[...])
    z = jnp.where(z > 0, z, 0.01 * z)                         # LeakyReLU(0.01)
    y = (jnp.dot(z.astype(matmul_dtype), w2_ref[...],
                 preferred_element_type=jnp.float32) + b2_ref[...])
    y_ref[...] = y                                            # (Bt, 128), col 0 = y_hat


# ----------------------------------------------------------------------------
# Wrapper: pad batch + hidden dims, lane-align gates, cast weights host-side,
# build specs, slice outputs back.
# ----------------------------------------------------------------------------
def sohlstm_forward(x_btd, params, *, matmul_dtype=jnp.float32,
                    batch_tile=None):
    """x_btd: (B, T, input_size), batch_first like PyTorch.

    Returns (y_hat (B,), (h_n (L, B, H), c_n (L, B, H))).
    """
    B, T, D = x_btd.shape
    L = len(params["lstm"])
    H = params["lstm"][0]["whh_t"].shape[0]
    Hh = params["fc"]["w1_t"].shape[1]

    Hp = _round_up(H, 128)                       # lane-aligned hidden
    Hhp = _round_up(Hh, 128)                     # lane-aligned head hidden
    Yp = 128                                     # lane-dense y slab

    Bp = _round_up(max(B, 8), 8)                 # fill all 8 sublanes
    # Production note: pick Bt=128 (v5e) / 256 (v6e, v7x) to fill the MXU M
    # dim, and Bt <= Bp//2 on v7x so the "parallel" grid axis uses both TCs.
    Bt = Bp if batch_tile is None else batch_tile
    assert Bt % 8 == 0 and Bp % Bt == 0
    n_tiles = Bp // Bt

    # (B,T,D) -> time-major, pad batch, group into batch tiles, flatten to
    # (n_tiles, T*Bt, D) so the kernel needs no reshape at all.
    x_tbd = jnp.transpose(x_btd, (1, 0, 2)).astype(matmul_dtype)   # (T, B, D)
    if Bp != B:
        x_tbd = jnp.pad(x_tbd, ((0, 0), (0, Bp - B), (0, 0)))
    x_tiles = (x_tbd.reshape(T, n_tiles, Bt, D)
               .transpose(1, 0, 2, 3)
               .reshape(n_tiles, T * Bt, D))

    def pad_gate_cols(w):
        # (rows, 4H) -> (rows, 4*Hp): each gate block zero-padded to Hp lanes.
        rows = w.shape[0]
        w4 = w.reshape(rows, 4, H)
        w4 = jnp.pad(w4, ((0, 0), (0, 0), (0, Hp - H)))
        return w4.reshape(rows, 4 * Hp)

    flat_inputs = [x_tiles]
    in_specs = [pl.BlockSpec((1, T * Bt, D), lambda b: (b, 0, 0))]
    for li, lp in enumerate(params["lstm"]):
        d_in = lp["wih_t"].shape[0]              # D for layer 0, H otherwise
        d_in_p = D if li == 0 else Hp
        wih = pad_gate_cols(lp["wih_t"].astype(jnp.float32))
        wih = jnp.pad(wih, ((0, d_in_p - d_in), (0, 0)))
        whh = pad_gate_cols(lp["whh_t"].astype(jnp.float32))
        whh = jnp.pad(whh, ((0, Hp - H), (0, 0)))
        bias = pad_gate_cols(lp["b"].astype(jnp.float32))
        # Host-side cast of MXU weight operands; biases stay f32 (added after
        # f32 accumulation).
        flat_inputs += [wih.astype(matmul_dtype), whh.astype(matmul_dtype),
                        bias]
        in_specs += [
            pl.BlockSpec((d_in_p, 4 * Hp), lambda b_: (0, 0)),
            pl.BlockSpec((Hp, 4 * Hp), lambda b_: (0, 0)),
            pl.BlockSpec((1, 4 * Hp), lambda b_: (0, 0)),
        ]

    fc = params["fc"]
    w1 = jnp.pad(fc["w1_t"].astype(jnp.float32), ((0, Hp - H), (0, Hhp - Hh)))
    b1 = jnp.pad(fc["b1"].astype(jnp.float32), ((0, 0), (0, Hhp - Hh)))
    w2 = jnp.pad(fc["w2_t"].astype(jnp.float32), ((0, Hhp - Hh), (0, Yp - 1)))
    b2 = jnp.pad(fc["b2"].astype(jnp.float32), ((0, 0), (0, Yp - 1)))
    flat_inputs += [w1.astype(matmul_dtype), b1, w2.astype(matmul_dtype), b2]
    in_specs += [
        pl.BlockSpec((Hp, Hhp), lambda b: (0, 0)),
        pl.BlockSpec((1, Hhp), lambda b: (0, 0)),
        pl.BlockSpec((Hhp, Yp), lambda b: (0, 0)),
        pl.BlockSpec((1, Yp), lambda b: (0, 0)),
    ]

    out_shapes = (
        jax.ShapeDtypeStruct((Bp, Yp), jnp.float32),      # y slab (col 0 real)
        jax.ShapeDtypeStruct((L, Bp, Hp), jnp.float32),   # h_n (padded)
        jax.ShapeDtypeStruct((L, Bp, Hp), jnp.float32),   # c_n (padded)
    )
    out_specs = [
        pl.BlockSpec((Bt, Yp), lambda b: (b, 0)),
        pl.BlockSpec((L, Bt, Hp), lambda b: (0, b, 0)),
        pl.BlockSpec((L, Bt, Hp), lambda b: (0, b, 0)),
    ]

    # Inter-layer sequence scratch dtype: matmul_dtype when the batch tile is
    # packing-aligned (so packed stores stay tile-aligned), else f32.
    packing = 4 // jnp.dtype(matmul_dtype).itemsize
    seq_dtype = matmul_dtype if Bt % (8 * packing) == 0 else jnp.float32

    kernel = functools.partial(
        _fused_sohlstm_kernel, num_layers=L, hidden_pad=Hp, seq_len=T,
        batch_tile=Bt, matmul_dtype=matmul_dtype)

    y_pad, hn_pad, cn_pad = pl.pallas_call(
        kernel,
        out_shape=out_shapes,
        grid_spec=pltpu.PrefetchScalarGridSpec(
            num_scalar_prefetch=0,
            grid=(n_tiles,),
            in_specs=in_specs,
            out_specs=out_specs,
            scratch_shapes=[
                pltpu.VMEM((T * Bt, 4 * Hp), jnp.float32),  # hoisted projections
                pltpu.VMEM((T * Bt, Hp), seq_dtype),        # inter-layer sequence
            ],
        ),
        compiler_params=pltpu.CompilerParams(
            # batch tiles are independent -> shardable across v7x's 2 TCs
            dimension_semantics=("parallel",)),
    )(*flat_inputs)

    y_hat = y_pad[:B, 0]
    return y_hat, (hn_pad[:, :B, :H], cn_pad[:, :B, :H])


# ----------------------------------------------------------------------------
# Deterministic parameter init (PyTorch shapes, uniform(-1/sqrt(H), 1/sqrt(H)))
# ----------------------------------------------------------------------------
def init_params(key, input_size, hidden_size, num_layers):
    H = hidden_size
    params = {"lstm": [], "fc": {}}
    bound = 1.0 / np.sqrt(H)
    for layer in range(num_layers):
        d_in = input_size if layer == 0 else H
        key, k1, k2, k3, k4 = jax.random.split(key, 5)
        w_ih = jax.random.uniform(k1, (4 * H, d_in), jnp.float32, -bound, bound)
        w_hh = jax.random.uniform(k2, (4 * H, H), jnp.float32, -bound, bound)
        b_ih = jax.random.uniform(k3, (4 * H,), jnp.float32, -bound, bound)
        b_hh = jax.random.uniform(k4, (4 * H,), jnp.float32, -bound, bound)
        params["lstm"].append({
            "wih_t": w_ih.T,                                 # (d_in, 4H)
            "whh_t": w_hh.T,                                 # (H, 4H)
            "b": (b_ih + b_hh).reshape(1, 4 * H),
        })
    Hh = H // 2
    key, k1, k2, k3, k4 = jax.random.split(key, 5)
    b1_bound = 1.0 / np.sqrt(H)
    b2_bound = 1.0 / np.sqrt(Hh)
    w1 = jax.random.uniform(k1, (Hh, H), jnp.float32, -b1_bound, b1_bound)
    b1 = jax.random.uniform(k2, (Hh,), jnp.float32, -b1_bound, b1_bound)
    w2 = jax.random.uniform(k3, (1, Hh), jnp.float32, -b2_bound, b2_bound)
    b2 = jax.random.uniform(k4, (1,), jnp.float32, -b2_bound, b2_bound)
    params["fc"] = {"w1_t": w1.T, "b1": b1.reshape(1, Hh),
                    "w2_t": w2.T, "b2": b2.reshape(1, 1)}
    return params


# ----------------------------------------------------------------------------
# Pure-JAX reference for verification (unpadded math).
# ----------------------------------------------------------------------------
def reference_forward(x_btd, params):
    B = x_btd.shape[0]
    x_tbd = jnp.transpose(x_btd, (1, 0, 2))
    layer_in = x_tbd
    hs, cs = [], []
    for lp in params["lstm"]:
        H = lp["whh_t"].shape[0]
        h0 = jnp.zeros((B, H), jnp.float32)
        c0 = jnp.zeros((B, H), jnp.float32)

        def step(carry, x_t, lp=lp, H=H):
            h, c = carry
            gates = x_t @ lp["wih_t"] + h @ lp["whh_t"] + lp["b"]
            i = jax.nn.sigmoid(gates[:, 0 * H:1 * H])
            f = jax.nn.sigmoid(gates[:, 1 * H:2 * H])
            g = jnp.tanh(gates[:, 2 * H:3 * H])
            o = jax.nn.sigmoid(gates[:, 3 * H:4 * H])
            c = f * c + i * g
            h = o * jnp.tanh(c)
            return (h, c), h

        (h_n, c_n), out = jax.lax.scan(step, (h0, c0), layer_in)
        hs.append(h_n)
        cs.append(c_n)
        layer_in = out
    h_last = hs[-1]
    z = h_last @ params["fc"]["w1_t"] + params["fc"]["b1"]
    z = jnp.where(z > 0, z, 0.01 * z)
    y = z @ params["fc"]["w2_t"] + params["fc"]["b2"]
    return jnp.squeeze(y, -1), (jnp.stack(hs, 0), jnp.stack(cs, 0))


if __name__ == "__main__":
    # Small shapes consistent with SOHLSTM's forward.
    batch, seq, input_size, hidden_size, num_layers = 2, 8, 4, 32, 2

    key = jax.random.PRNGKey(0)
    kx, kp = jax.random.split(key)
    x = jax.random.normal(kx, (batch, seq, input_size), jnp.float32)
    params = init_params(kp, input_size, hidden_size, num_layers)

    # f32 path (matches the PyTorch/f32 reference tightly).
    y_hat, (h_n, c_n) = sohlstm_forward(x, params)
    jax.block_until_ready((y_hat, h_n, c_n))

    y_ref, (h_ref, c_ref) = reference_forward(x, params)
    np.testing.assert_allclose(np.asarray(y_hat), np.asarray(y_ref),
                               rtol=1e-4, atol=1e-4)
    np.testing.assert_allclose(np.asarray(h_n), np.asarray(h_ref),
                               rtol=1e-4, atol=1e-4)
    np.testing.assert_allclose(np.asarray(c_n), np.asarray(c_ref),
                               rtol=1e-4, atol=1e-4)

    assert y_hat.shape == (batch,)
    assert h_n.shape == (num_layers, batch, hidden_size)
    assert c_n.shape == (num_layers, batch, hidden_size)

    # bf16-MXU path (bf16 matmul operands cast host-side, f32 accumulation and
    # f32 elementwise state) -- loose tolerance vs. the f32 reference since h
    # is re-cast to bf16 each step and the error compounds over T.
    y_b16, (h_b16, c_b16) = sohlstm_forward(x, params,
                                            matmul_dtype=jnp.bfloat16)
    jax.block_until_ready((y_b16, h_b16, c_b16))
    np.testing.assert_allclose(np.asarray(y_b16), np.asarray(y_ref),
                               rtol=1e-1, atol=1e-1)
    np.testing.assert_allclose(np.asarray(h_b16), np.asarray(h_ref),
                               rtol=1e-1, atol=1e-1)

    print("KERNEL_OK")
</pallas_src>

<mosaic_0001>
module attributes {stable_mosaic.version = 11 : i64} {
  func.func @_fused_sohlstm_kernel(%arg0: i32, %arg1: memref<1x64x4xf32, #tpu.memory_space<vmem>>, %arg2: memref<4x512xf32, #tpu.memory_space<vmem>>, %arg3: memref<128x512xf32, #tpu.memory_space<vmem>>, %arg4: memref<1x512xf32, #tpu.memory_space<vmem>>, %arg5: memref<128x512xf32, #tpu.memory_space<vmem>>, %arg6: memref<128x512xf32, #tpu.memory_space<vmem>>, %arg7: memref<1x512xf32, #tpu.memory_space<vmem>>, %arg8: memref<128x128xf32, #tpu.memory_space<vmem>>, %arg9: memref<1x128xf32, #tpu.memory_space<vmem>>, %arg10: memref<128x128xf32, #tpu.memory_space<vmem>>, %arg11: memref<1x128xf32, #tpu.memory_space<vmem>>, %arg12: memref<8x128xf32, #tpu.memory_space<vmem>>, %arg13: memref<2x8x128xf32, #tpu.memory_space<vmem>>, %arg14: memref<2x8x128xf32, #tpu.memory_space<vmem>>, %arg15: memref<64x512xf32, #tpu.memory_space<vmem>>, %arg16: memref<64x128xf32, #tpu.memory_space<vmem>>) attributes {dimension_semantics = [#tpu.dimension_semantics<parallel>], iteration_bounds = array<i64: 1>, scalar_prefetch = 0 : i64, scratch_operands = 2 : i64, tpu.core_type = #tpu.core_type<tc>, window_params = [{transform_indices = @transform_0, window_bounds = array<i64: 1, 64, 4>}, {pipeline_mode = #tpu.pipeline_mode<synchronous>, transform_indices = @transform_1, window_bounds = array<i64: 4, 512>}, {pipeline_mode = #tpu.pipeline_mode<synchronous>, transform_indices = @transform_2, window_bounds = array<i64: 128, 512>}, {pipeline_mode = #tpu.pipeline_mode<synchronous>, transform_indices = @transform_3, window_bounds = array<i64: 1, 512>}, {pipeline_mode = #tpu.pipeline_mode<synchronous>, transform_indices = @transform_4, window_bounds = array<i64: 128, 512>}, {pipeline_mode = #tpu.pipeline_mode<synchronous>, transform_indices = @transform_5, window_bounds = array<i64: 128, 512>}, {pipeline_mode = #tpu.pipeline_mode<synchronous>, transform_indices = @transform_6, window_bounds = array<i64: 1, 512>}, {pipeline_mode = #tpu.pipeline_mode<synchronous>, transform_indices = @transform_7, window_bounds = array<i64: 128, 128>}, {pipeline_mode = #tpu.pipeline_mode<synchronous>, transform_indices = @transform_8, window_bounds = array<i64: 1, 128>}, {pipeline_mode = #tpu.pipeline_mode<synchronous>, transform_indices = @transform_9, window_bounds = array<i64: 128, 128>}, {pipeline_mode = #tpu.pipeline_mode<synchronous>, transform_indices = @transform_10, window_bounds = array<i64: 1, 128>}, {transform_indices = @transform_11, window_bounds = array<i64: 8, 128>}, {transform_indices = @transform_12, window_bounds = array<i64: 2, 8, 128>}, {transform_indices = @transform_13, window_bounds = array<i64: 2, 8, 128>}]} {
    %c0 = arith.constant 0 : index
    %c0_0 = arith.constant 0 : index
    %c0_1 = arith.constant 0 : index
    %0 = vector.load %arg1[%c0, %c0_0, %c0_1] : memref<1x64x4xf32, #tpu.memory_space<vmem>>, vector<1x64x4xf32>
    %1 = vector.shape_cast %0 : vector<1x64x4xf32> to vector<64x4xf32>
    %c0_2 = arith.constant 0 : index
    %c0_3 = arith.constant 0 : index
    %2 = vector.load %arg2[%c0_2, %c0_3] : memref<4x512xf32, #tpu.memory_space<vmem>>, vector<4x512xf32>
    %cst = arith.constant dense<0.000000e+00> : vector<64x512xf32>
    %3 = tpu.matmul %1, %2, %cst {dimension_numbers = #tpu.dot_dimension_numbers<[1], [0], [0], [1], [0, 0, 1, 1], [], []>} : vector<64x4xf32>, vector<4x512xf32>, vector<64x512xf32> -> vector<64x512xf32>
    %c0_4 = arith.constant 0 : index
    %c0_5 = arith.constant 0 : index
    %4 = vector.load %arg4[%c0_4, %c0_5] : memref<1x512xf32, #tpu.memory_space<vmem>>, vector<1x512xf32>
    %5 = vector.broadcast %4 : vector<1x512xf32> to vector<64x512xf32>
    %6 = arith.addf %3, %5 : vector<64x512xf32>
    %c0_6 = arith.constant 0 : index
    %c0_7 = arith.constant 0 : index
    %7 = vector.load %arg15[%c0_6, %c0_7] : memref<64x512xf32, #tpu.memory_space<vmem>>, vector<64x512xf32>
    tpu.vector_store %arg15[%c0_6, %c0_7], %6 {strides = array<i32>} : memref<64x512xf32, #tpu.memory_space<vmem>>, vector<64x512xf32>,
    %c0_8 = arith.constant 0 : index
    %c0_9 = arith.constant 0 : index
    %8 = vector.load %arg3[%c0_8, %c0_9] : memref<128x512xf32, #tpu.memory_space<vmem>>, vector<128x512xf32>
    %cst_10 = arith.constant 0.000000e+00 : f32
    %9 = vector.broadcast %cst_10 : f32 to vector<8x128xf32>
    %cst_11 = arith.constant 0.000000e+00 : f32
    %10 = vector.broadcast %cst_11 : f32 to vector<8x128xf32>
    %c0_i32 = arith.constant 0 : i32
    %c8_i32 = arith.constant 8 : i32
    %11 = arith.muli %c0_i32, %c8_i32 : i32
    %12 = tpu.assume_multiple %11, 8 : i32
    %13 = arith.index_cast %12 : i32 to index
    %c0_12 = arith.constant 0 : index
    %14 = vector.load %arg15[%13, %c0_12] : memref<64x512xf32, #tpu.memory_space<vmem>>, vector<8x512xf32>
    %cst_13 = arith.constant dense<0.000000e+00> : vector<8x512xf32>
    %15 = tpu.matmul %9, %8, %cst_13 {dimension_numbers = #tpu.dot_dimension_numbers<[1], [0], [0], [1], [0, 0, 1, 1], [], []>} : vector<8x128xf32>, vector<128x512xf32>, vector<8x512xf32> -> vector<8x512xf32>
    %16 = arith.addf %14, %15 : vector<8x512xf32>
    %17 = vector.extract_strided_slice %16 {offsets = [0, 0], sizes = [8, 128], strides = [1, 1]} : vector<8x512xf32> to vector<8x128xf32>
    %18 = arith.negf %17 : vector<8x128xf32>
    %19 = math.exp %18 : vector<8x128xf32>
    %cst_14 = arith.constant 1.000000e+00 : f32
    %20 = vector.broadcast %cst_14 : f32 to vector<8x128xf32>
    %21 = arith.addf %20, %19 : vector<8x128xf32>
    %22 = arith.divf %20, %21 : vector<8x128xf32>
    %23 = vector.extract_strided_slice %16 {offsets = [0, 128], sizes = [8, 128], strides = [1, 1]} : vector<8x512xf32> to vector<8x128xf32>
    %24 = arith.negf %23 : vector<8x128xf32>
    %25 = math.exp %24 : vector<8x128xf32>
    %cst_15 = arith.constant 1.000000e+00 : f32
    %26 = vector.broadcast %cst_15 : f32 to vector<8x128xf32>
    %27 = arith.addf %26, %25 : vector<8x128xf32>
    %28 = arith.divf %26, %27 : vector<8x128xf32>
    %29 = vector.extract_strided_slice %16 {offsets = [0, 256], sizes = [8, 128], strides = [1, 1]} : vector<8x512xf32> to vector<8x128xf32>
    %30 = math.tanh %29 : vector<8x128xf32>
    %31 = vector.extract_strided_slice %16 {offsets = [0, 384], sizes = [8, 128], strides = [1, 1]} : vector<8x512xf32> to vector<8x128xf32>
    %32 = arith.negf %31 : vector<8x128xf32>
    %33 = math.exp %32 : vector<8x128xf32>
    %cst_16 = arith.constant 1.000000e+00 : f32
    %34 = vector.broadcast %cst_16 : f32 to vector<8x128xf32>
    %35 = arith.addf %34, %33 : vector<8x128xf32>
    %36 = arith.divf %34, %35 : vector<8x128xf32>
    %37 = arith.mulf %28, %10 : vector<8x128xf32>
    %38 = arith.mulf %22, %30 : vector<8x128xf32>
    %39 = arith.addf %37, %38 : vector<8x128xf32>
    %40 = math.tanh %39 : vector<8x128xf32>
    %41 = arith.mulf %36, %40 : vector<8x128xf32>
    %42 = arith.index_cast %12 : i32 to index
    %c0_17 = arith.constant 0 : index
    %43 = vector.load %arg16[%42, %c0_17] : memref<64x128xf32, #tpu.memory_space<vmem>>, vector<8x128xf32>
    tpu.vector_store %arg16[%42, %c0_17], %41 {strides = array<i32>} : memref<64x128xf32, #tpu.memory_space<vmem>>, vector<8x128xf32>,
    %c1_i32 = arith.constant 1 : i32
    %c8_i32_18 = arith.constant 8 : i32
    %44 = arith.muli %c1_i32, %c8_i32_18 : i32
    %45 = tpu.assume_multiple %44, 8 : i32
    %46 = arith.index_cast %45 : i32 to index
    %c0_19 = arith.constant 0 : index
    %47 = vector.load %arg15[%46, %c0_19] : memref<64x512xf32, #tpu.memory_space<vmem>>, vector<8x512xf32>
    %cst_20 = arith.constant dense<0.000000e+00> : vector<8x512xf32>
    %48 = tpu.matmul %41, %8, %cst_20 {dimension_numbers = #tpu.dot_dimension_numbers<[1], [0], [0], [1], [0, 0, 1, 1], [], []>} : vector<8x128xf32>, vector<128x512xf32>, vector<8x512xf32> -> vector<8x512xf32>
    %49 = arith.addf %47, %48 : vector<8x512xf32>
    %50 = vector.extract_strided_slice %49 {offsets = [0, 0], sizes = [8, 128], strides = [1, 1]} : vector<8x512xf32> to vector<8x128xf32>
    %51 = arith.negf %50 : vector<8x128xf32>
    %52 = math.exp %51 : vector<8x128xf32>
    %cst_21 = arith.constant 1.000000e+00 : f32
    %53 = vector.broadcast %cst_21 : f32 to vector<8x128xf32>
    %54 = arith.addf %53, %52 : vector<8x128xf32>
    %55 = arith.divf %53, %54 : vector<8x128xf32>
    %56 = vector.extract_strided_slice %49 {offsets = [0, 128], sizes = [8, 128], strides = [1, 1]} : vector<8x512xf32> to vector<8x128xf32>
    %57 = arith.negf %56 : vector<8x128xf32>
    %58 = math.exp %57 : vector<8x128xf32>
    %cst_22 = arith.constant 1.000000e+00 : f32
    %59 = vector.broadcast %cst_22 : f32 to vector<8x128xf32>
    %60 = arith.addf %59, %58 : vector<8x128xf32>
    %61 = arith.divf %59, %60 : vector<8x128xf32>
    %62 = vector.extract_strided_slice %49 {offsets = [0, 256], sizes = [8, 128], strides = [1, 1]} : vector<8x512xf32> to vector<8x128xf32>
    %63 = math.tanh %62 : vector<8x128xf32>
    %64 = vector.extract_strided_slice %49 {offsets = [0, 384], sizes = [8, 128], strides = [1, 1]} : vector<8x512xf32> to vector<8x128xf32>
    %65 = arith.negf %64 : vector<8x128xf32>
    %66 = math.exp %65 : vector<8x128xf32>
    %cst_23 = arith.constant 1.000000e+00 : f32
    %67 = vector.broadcast %cst_23 : f32 to vector<8x128xf32>
    %68 = arith.addf %67, %66 : vector<8x128xf32>
    %69 = arith.divf %67, %68 : vector<8x128xf32>
    %70 = arith.mulf %61, %39 : vector<8x128xf32>
    %71 = arith.mulf %55, %63 : vector<8x128xf32>
    %72 = arith.addf %70, %71 : vector<8x128xf32>
    %73 = math.tanh %72 : vector<8x128xf32>
    %74 = arith.mulf %69, %73 : vector<8x128xf32>
    %75 = arith.index_cast %45 : i32 to index
    %c0_24 = arith.constant 0 : index
    %76 = vector.load %arg16[%75, %c0_24] : memref<64x128xf32, #tpu.memory_space<vmem>>, vector<8x128xf32>
    tpu.vector_store %arg16[%75, %c0_24], %74 {strides = array<i32>} : memref<64x128xf32, #tpu.memory_space<vmem>>, vector<8x128xf32>,
    %c2_i32 = arith.constant 2 : i32
    %c8_i32_25 = arith.constant 8 : i32
    %77 = arith.muli %c2_i32, %c8_i32_25 : i32
    %78 = tpu.assume_multiple %77, 8 : i32
    %79 = arith.index_cast %78 : i32 to index
    %c0_26 = arith.constant 0 : index
    %80 = vector.load %arg15[%79, %c0_26] : memref<64x512xf32, #tpu.memory_space<vmem>>, vector<8x512xf32>
    %cst_27 = arith.constant dense<0.000000e+00> : vector<8x512xf32>
    %81 = tpu.matmul %74, %8, %cst_27 {dimension_numbers = #tpu.dot_dimension_numbers<[1], [0], [0], [1], [0, 0, 1, 1], [], []>} : vector<8x128xf32>, vector<128x512xf32>, vector<8x512xf32> -> vector<8x512xf32>
    %82 = arith.addf %80, %81 : vector<8x512xf32>
    %83 = vector.extract_strided_slice %82 {offsets = [0, 0], sizes = [8, 128], strides = [1, 1]} : vector<8x512xf32> to vector<8x128xf32>
    %84 = arith.negf %83 : vector<8x128xf32>
    %85 = math.exp %84 : vector<8x128xf32>
    %cst_28 = arith.constant 1.000000e+00 : f32
    %86 = vector.broadcast %cst_28 : f32 to vector<8x128xf32>
    %87 = arith.addf %86, %85 : vector<8x128xf32>
    %88 = arith.divf %86, %87 : vector<8x128xf32>
    %89 = vector.extract_strided_slice %82 {offsets = [0, 128], sizes = [8, 128], strides = [1, 1]} : vector<8x512xf32> to vector<8x128xf32>
    %90 = arith.negf %89 : vector<8x128xf32>
    %91 = math.exp %90 : vector<8x128xf32>
    %cst_29 = arith.constant 1.000000e+00 : f32
    %92 = vector.broadcast %cst_29 : f32 to vector<8x128xf32>
    %93 = arith.addf %92, %91 : vector<8x128xf32>
    %94 = arith.divf %92, %93 : vector<8x128xf32>
    %95 = vector.extract_strided_slice %82 {offsets = [0, 256], sizes = [8, 128], strides = [1, 1]} : vector<8x512xf32> to vector<8x128xf32>
    %96 = math.tanh %95 : vector<8x128xf32>
    %97 = vector.extract_strided_slice %82 {offsets = [0, 384], sizes = [8, 128], strides = [1, 1]} : vector<8x512xf32> to vector<8x128xf32>
    %98 = arith.negf %97 : vector<8x128xf32>
    %99 = math.exp %98 : vector<8x128xf32>
    %cst_30 = arith.constant 1.000000e+00 : f32
    %100 = vector.broadcast %cst_30 : f32 to vector<8x128xf32>
    %101 = arith.addf %100, %99 : vector<8x128xf32>
    %102 = arith.divf %100, %101 : vector<8x128xf32>
    %103 = arith.mulf %94, %72 : vector<8x128xf32>
    %104 = arith.mulf %88, %96 : vector<8x128xf32>
    %105 = arith.addf %103, %104 : vector<8x128xf32>
    %106 = math.tanh %105 : vector<8x128xf32>
    %107 = arith.mulf %102, %106 : vector<8x128xf32>
    %108 = arith.index_cast %78 : i32 to index
    %c0_31 = arith.constant 0 : index
    %109 = vector.load %arg16[%108, %c0_31] : memref<64x128xf32, #tpu.memory_space<vmem>>, vector<8x128xf32>
    tpu.vector_store %arg16[%108, %c0_31], %107 {strides = array<i32>} : memref<64x128xf32, #tpu.memory_space<vmem>>, vector<8x128xf32>,
    %c3_i32 = arith.constant 3 : i32
    %c8_i32_32 = arith.constant 8 : i32
    %110 = arith.muli %c3_i32, %c8_i32_32 : i32
    %111 = tpu.assume_multiple %110, 8 : i32
    %112 = arith.index_cast %111 : i32 to index
    %c0_33 = arith.constant 0 : index
    %113 = vector.load %arg15[%112, %c0_33] : memref<64x512xf32, #tpu.memory_space<vmem>>, vector<8x512xf32>
    %cst_34 = arith.constant dense<0.000000e+00> : vector<8x512xf32>
    %114 = tpu.matmul %107, %8, %cst_34 {dimension_numbers = #tpu.dot_dimension_numbers<[1], [0], [0], [1], [0, 0, 1, 1], [], []>} : vector<8x128xf32>, vector<128x512xf32>, vector<8x512xf32> -> vector<8x512xf32>
    %115 = arith.addf %113, %114 : vector<8x512xf32>
    %116 = vector.extract_strided_slice %115 {offsets = [0, 0], sizes = [8, 128], strides = [1, 1]} : vector<8x512xf32> to vector<8x128xf32>
    %117 = arith.negf %116 : vector<8x128xf32>
    %118 = math.exp %117 : vector<8x128xf32>
    %cst_35 = arith.constant 1.000000e+00 : f32
    %119 = vector.broadcast %cst_35 : f32 to vector<8x128xf32>
    %120 = arith.addf %119, %118 : vector<8x128xf32>
    %121 = arith.divf %119, %120 : vector<8x128xf32>
    %122 = vector.extract_strided_slice %115 {offsets = [0, 128], sizes = [8, 128], strides = [1, 1]} : vector<8x512xf32> to vector<8x128xf32>
    %123 = arith.negf %122 : vector<8x128xf32>
    %124 = math.exp %123 : vector<8x128xf32>
    %cst_36 = arith.constant 1.000000e+00 : f32
    %125 = vector.broadcast %cst_36 : f32 to vector<8x128xf32>
    %126 = arith.addf %125, %124 : vector<8x128xf32>
    %127 = arith.divf %125, %126 : vector<8x128xf32>
    %128 = vector.extract_strided_slice %115 {offsets = [0, 256], sizes = [8, 128], strides = [1, 1]} : vector<8x512xf32> to vector<8x128xf32>
    %129 = math.tanh %128 : vector<8x128xf32>
    %130 = vector.extract_strided_slice %115 {offsets = [0, 384], sizes = [8, 128], strides = [1, 1]} : vector<8x512xf32> to vector<8x128xf32>
    %131 = arith.negf %130 : vector<8x128xf32>
    %132 = math.exp %131 : vector<8x128xf32>
    %cst_37 = arith.constant 1.000000e+00 : f32
    %133 = vector.broadcast %cst_37 : f32 to vector<8x128xf32>
    %134 = arith.addf %133, %132 : vector<8x128xf32>
    %135 = arith.divf %133, %134 : vector<8x128xf32>
    %136 = arith.mulf %127, %105 : vector<8x128xf32>
    %137 = arith.mulf %121, %129 : vector<8x128xf32>
    %138 = arith.addf %136, %137 : vector<8x128xf32>
    %139 = math.tanh %138 : vector<8x128xf32>
    %140 = arith.mulf %135, %139 : vector<8x128xf32>
    %141 = arith.index_cast %111 : i32 to index
    %c0_38 = arith.constant 0 : index
    %142 = vector.load %arg16[%141, %c0_38] : memref<64x128xf32, #tpu.memory_space<vmem>>, vector<8x128xf32>
    tpu.vector_store %arg16[%141, %c0_38], %140 {strides = array<i32>} : memref<64x128xf32, #tpu.memory_space<vmem>>, vector<8x128xf32>,
    %c4_i32 = arith.constant 4 : i32
    %c8_i32_39 = arith.constant 8 : i32
    %143 = arith.muli %c4_i32, %c8_i32_39 : i32
    %144 = tpu.assume_multiple %143, 8 : i32
    %145 = arith.index_cast %144 : i32 to index
    %c0_40 = arith.constant 0 : index
    %146 = vector.load %arg15[%145, %c0_40] : memref<64x512xf32, #tpu.memory_space<vmem>>, vector<8x512xf32>
    %cst_41 = arith.constant dense<0.000000e+00> : vector<8x512xf32>
    %147 = tpu.matmul %140, %8, %cst_41 {dimension_numbers = #tpu.dot_dimension_numbers<[1], [0], [0], [1], [0, 0, 1, 1], [], []>} : vector<8x128xf32>, vector<128x512xf32>, vector<8x512xf32> -> vector<8x512xf32>
    %148 = arith.addf %146, %147 : vector<8x512xf32>
    %149 = vector.extract_strided_slice %148 {offsets = [0, 0], sizes = [8, 128], strides = [1, 1]} : vector<8x512xf32> to vector<8x128xf32>
    %150 = arith.negf %149 : vector<8x128xf32>
    %151 = math.exp %150 : vector<8x128xf32>
    %cst_42 = arith.constant 1.000000e+00 : f32
    %152 = vector.broadcast %cst_42 : f32 to vector<8x128xf32>
    %153 = arith.addf %152, %151 : vector<8x128xf32>
    %154 = arith.divf %152, %153 : vector<8x128xf32>
    %155 = vector.extract_strided_slice %148 {offsets = [0, 128], sizes = [8, 128], strides = [1, 1]} : vector<8x512xf32> to vector<8x128xf32>
    %156 = arith.negf %155 : vector<8x128xf32>
    %157 = math.exp %156 : vector<8x128xf32>
    %cst_43 = arith.constant 1.000000e+00 : f32
    %158 = vector.broadcast %cst_43 : f32 to vector<8x128xf32>
    %159 = arith.addf %158, %157 : vector<8x128xf32>
    %160 = arith.divf %158, %159 : vector<8x128xf32>
    %161 = vector.extract_strided_slice %148 {offsets = [0, 256], sizes = [8, 128], strides = [1, 1]} : vector<8x512xf32> to vector<8x128xf32>
    %162 = math.tanh %161 : vector<8x128xf32>
    %163 = vector.extract_strided_slice %148 {offsets = [0, 384], sizes = [8, 128], strides = [1, 1]} : vector<8x512xf32> to vector<8x128xf32>
    %164 = arith.negf %163 : vector<8x128xf32>
    %165 = math.exp %164 : vector<8x128xf32>
    %cst_44 = arith.constant 1.000000e+00 : f32
    %166 = vector.broadcast %cst_44 : f32 to vector<8x128xf32>
    %167 = arith.addf %166, %165 : vector<8x128xf32>
    %168 = arith.divf %166, %167 : vector<8x128xf32>
    %169 = arith.mulf %160, %138 : vector<8x128xf32>
    %170 = arith.mulf %154, %162 : vector<8x128xf32>
    %171 = arith.addf %169, %170 : vector<8x128xf32>
    %172 = math.tanh %171 : vector<8x128xf32>
    %173 = arith.mulf %168, %172 : vector<8x128xf32>
    %174 = arith.index_cast %144 : i32 to index
    %c0_45 = arith.constant 0 : index
    %175 = vector.load %arg16[%174, %c0_45] : memref<64x128xf32, #tpu.memory_space<vmem>>, vector<8x128xf32>
    tpu.vector_store %arg16[%174, %c0_45], %173 {strides = array<i32>} : memref<64x128xf32, #tpu.memory_space<vmem>>, vector<8x128xf32>,
    %c5_i32 = arith.constant 5 : i32
    %c8_i32_46 = arith.constant 8 : i32
    %176 = arith.muli %c5_i32, %c8_i32_46 : i32
    %177 = tpu.assume_multiple %176, 8 : i32
    %178 = arith.index_cast %177 : i32 to index
    %c0_47 = arith.constant 0 : index
    %179 = vector.load %arg15[%178, %c0_47] : memref<64x512xf32, #tpu.memory_space<vmem>>, vector<8x512xf32>
    %cst_48 = arith.constant dense<0.000000e+00> : vector<8x512xf32>
    %180 = tpu.matmul %173, %8, %cst_48 {dimension_numbers = #tpu.dot_dimension_numbers<[1], [0], [0], [1], [0, 0, 1, 1], [], []>} : vector<8x128xf32>, vector<128x512xf32>, vector<8x512xf32> -> vector<8x512xf32>
    %181 = arith.addf %179, %180 : vector<8x512xf32>
    %182 = vector.extract_strided_slice %181 {offsets = [0, 0], sizes = [8, 128], strides = [1, 1]} : vector<8x512xf32> to vector<8x128xf32>
    %183 = arith.negf %182 : vector<8x128xf32>
    %184 = math.exp %183 : vector<8x128xf32>
    %cst_49 = arith.constant 1.000000e+00 : f32
    %185 = vector.broadcast %cst_49 : f32 to vector<8x128xf32>
    %186 = arith.addf %185, %184 : vector<8x128xf32>
    %187 = arith.divf %185, %186 : vector<8x128xf32>
    %188 = vector.extract_strided_slice %181 {offsets = [0, 128], sizes = [8, 128], strides = [1, 1]} : vector<8x512xf32> to vector<8x128xf32>
    %189 = arith.negf %188 : vector<8x128xf32>
    %190 = math.exp %189 : vector<8x128xf32>
    %cst_50 = arith.constant 1.000000e+00 : f32
    %191 = vector.broadcast %cst_50 : f32 to vector<8x128xf32>
    %192 = arith.addf %191, %190 : vector<8x128xf32>
    %193 = arith.divf %191, %192 : vector<8x128xf32>
    %194 = vector.extract_strided_slice %181 {offsets = [0, 256], sizes = [8, 128], strides = [1, 1]} : vector<8x512xf32> to vector<8x128xf32>
    %195 = math.tanh %194 : vector<8x128xf32>
    %196 = vector.extract_strided_slice %181 {offsets = [0, 384], sizes = [8, 128], strides = [1, 1]} : vector<8x512xf32> to vector<8x128xf32>
    %197 = arith.negf %196 : vector<8x128xf32>
    %198 = math.exp %197 : vector<8x128xf32>
    %cst_51 = arith.constant 1.000000e+00 : f32
    %199 = vector.broadcast %cst_51 : f32 to vector<8x128xf32>
    %200 = arith.addf %199, %198 : vector<8x128xf32>
    %201 = arith.divf %199, %200 : vector<8x128xf32>
    %202 = arith.mulf %193, %171 : vector<8x128xf32>
    %203 = arith.mulf %187, %195 : vector<8x128xf32>
    %204 = arith.addf %202, %203 : vector<8x128xf32>
    %205 = math.tanh %204 : vector<8x128xf32>
    %206 = arith.mulf %201, %205 : vector<8x128xf32>
    %207 = arith.index_cast %177 : i32 to index
    %c0_52 = arith.constant 0 : index
    %208 = vector.load %arg16[%207, %c0_52] : memref<64x128xf32, #tpu.memory_space<vmem>>, vector<8x128xf32>
    tpu.vector_store %arg16[%207, %c0_52], %206 {strides = array<i32>} : memref<64x128xf32, #tpu.memory_space<vmem>>, vector<8x128xf32>,
    %c6_i32 = arith.constant 6 : i32
    %c8_i32_53 = arith.constant 8 : i32
    %209 = arith.muli %c6_i32, %c8_i32_53 : i32
    %210 = tpu.assume_multiple %209, 8 : i32
    %211 = arith.index_cast %210 : i32 to index
    %c0_54 = arith.constant 0 : index
    %212 = vector.load %arg15[%211, %c0_54] : memref<64x512xf32, #tpu.memory_space<vmem>>, vector<8x512xf32>
    %cst_55 = arith.constant dense<0.000000e+00> : vector<8x512xf32>
    %213 = tpu.matmul %206, %8, %cst_55 {dimension_numbers = #tpu.dot_dimension_numbers<[1], [0], [0], [1], [0, 0, 1, 1], [], []>} : vector<8x128xf32>, vector<128x512xf32>, vector<8x512xf32> -> vector<8x512xf32>
    %214 = arith.addf %212, %213 : vector<8x512xf32>
    %215 = vector.extract_strided_slice %214 {offsets = [0, 0], sizes = [8, 128], strides = [1, 1]} : vector<8x512xf32> to vector<8x128xf32>
    %216 = arith.negf %215 : vector<8x128xf32>
    %217 = math.exp %216 : vector<8x128xf32>
    %cst_56 = arith.constant 1.000000e+00 : f32
    %218 = vector.broadcast %cst_56 : f32 to vector<8x128xf32>
    %219 = arith.addf %218, %217 : vector<8x128xf32>
    %220 = arith.divf %218, %219 : vector<8x128xf32>
    %221 = vector.extract_strided_slice %214 {offsets = [0, 128], sizes = [8, 128], strides = [1, 1]} : vector<8x512xf32> to vector<8x128xf32>
    %222 = arith.negf %221 : vector<8x128xf32>
    %223 = math.exp %222 : vector<8x128xf32>
    %cst_57 = arith.constant 1.000000e+00 : f32
    %224 = vector.broadcast %cst_57 : f32 to vector<8x128xf32>
    %225 = arith.addf %224, %223 : vector<8x128xf32>
    %226 = arith.divf %224, %225 : vector<8x128xf32>
    %227 = vector.extract_strided_slice %214 {offsets = [0, 256], sizes = [8, 128], strides = [1, 1]} : vector<8x512xf32> to vector<8x128xf32>
    %228 = math.tanh %227 : vector<8x128xf32>
    %229 = vector.extract_strided_slice %214 {offsets = [0, 384], sizes = [8, 128], strides = [1, 1]} : vector<8x512xf32> to vector<8x128xf32>
    %230 = arith.negf %229 : vector<8x128xf32>
    %231 = math.exp %230 : vector<8x128xf32>
    %cst_58 = arith.constant 1.000000e+00 : f32
    %232 = vector.broadcast %cst_58 : f32 to vector<8x128xf32>
    %233 = arith.addf %232, %231 : vector<8x128xf32>
    %234 = arith.divf %232, %233 : vector<8x128xf32>
    %235 = arith.mulf %226, %204 : vector<8x128xf32>
    %236 = arith.mulf %220, %228 : vector<8x128xf32>
    %237 = arith.addf %235, %236 : vector<8x128xf32>
    %238 = math.tanh %237 : vector<8x128xf32>
    %239 = arith.mulf %234, %238 : vector<8x128xf32>
    %240 = arith.index_cast %210 : i32 to index
    %c0_59 = arith.constant 0 : index
    %241 = vector.load %arg16[%240, %c0_59] : memref<64x128xf32, #tpu.memory_space<vmem>>, vector<8x128xf32>
    tpu.vector_store %arg16[%240, %c0_59], %239 {strides = array<i32>} : memref<64x128xf32, #tpu.memory_space<vmem>>, vector<8x128xf32>,
    %c7_i32 = arith.constant 7 : i32
    %c8_i32_60 = arith.constant 8 : i32
    %242 = arith.muli %c7_i32, %c8_i32_60 : i32
    %243 = tpu.assume_multiple %242, 8 : i32
    %244 = arith.index_cast %243 : i32 to index
    %c0_61 = arith.constant 0 : index
    %245 = vector.load %arg15[%244, %c0_61] : memref<64x512xf32, #tpu.memory_space<vmem>>, vector<8x512xf32>
    %cst_62 = arith.constant dense<0.000000e+00> : vector<8x512xf32>
    %246 = tpu.matmul %239, %8, %cst_62 {dimension_numbers = #tpu.dot_dimension_numbers<[1], [0], [0], [1], [0, 0, 1, 1], [], []>} : vector<8x128xf32>, vector<128x512xf32>, vector<8x512xf32> -> vector<8x512xf32>
    %247 = arith.addf %245, %246 : vector<8x512xf32>
    %248 = vector.extract_strided_slice %247 {offsets = [0, 0], sizes = [8, 128], strides = [1, 1]} : vector<8x512xf32> to vector<8x128xf32>
    %249 = arith.negf %248 : vector<8x128xf32>
    %250 = math.exp %249 : vector<8x128xf32>
    %cst_63 = arith.constant 1.000000e+00 : f32
    %251 = vector.broadcast %cst_63 : f32 to vector<8x128xf32>
    %252 = arith.addf %251, %250 : vector<8x128xf32>
    %253 = arith.divf %251, %252 : vector<8x128xf32>
    %254 = vector.extract_strided_slice %247 {offsets = [0, 128], sizes = [8, 128], strides = [1, 1]} : vector<8x512xf32> to vector<8x128xf32>
    %255 = arith.negf %254 : vector<8x128xf32>
    %256 = math.exp %255 : vector<8x128xf32>
    %cst_64 = arith.constant 1.000000e+00 : f32
    %257 = vector.broadcast %cst_64 : f32 to vector<8x128xf32>
    %258 = arith.addf %257, %256 : vector<8x128xf32>
    %259 = arith.divf %257, %258 : vector<8x128xf32>
    %260 = vector.extract_strided_slice %247 {offsets = [0, 256], sizes = [8, 128], strides = [1, 1]} : vector<8x512xf32> to vector<8x128xf32>
    %261 = math.tanh %260 : vector<8x128xf32>
    %262 = vector.extract_strided_slice %247 {offsets = [0, 384], sizes = [8, 128], strides = [1, 1]} : vector<8x512xf32> to vector<8x128xf32>
    %263 = arith.negf %262 : vector<8x128xf32>
    %264 = math.exp %263 : vector<8x128xf32>
    %cst_65 = arith.constant 1.000000e+00 : f32
    %265 = vector.broadcast %cst_65 : f32 to vector<8x128xf32>
    %266 = arith.addf %265, %264 : vector<8x128xf32>
    %267 = arith.divf %265, %266 : vector<8x128xf32>
    %268 = arith.mulf %259, %237 : vector<8x128xf32>
    %269 = arith.mulf %253, %261 : vector<8x128xf32>
    %270 = arith.addf %268, %269 : vector<8x128xf32>
    %271 = math.tanh %270 : vector<8x128xf32>
    %272 = arith.mulf %267, %271 : vector<8x128xf32>
    %273 = arith.index_cast %243 : i32 to index
    %c0_66 = arith.constant 0 : index
    %274 = vector.load %arg16[%273, %c0_66] : memref<64x128xf32, #tpu.memory_space<vmem>>, vector<8x128xf32>
    tpu.vector_store %arg16[%273, %c0_66], %272 {strides = array<i32>} : memref<64x128xf32, #tpu.memory_space<vmem>>, vector<8x128xf32>,
    %c8_i32_67 = arith.constant 8 : i32
    %c0_68 = arith.constant 0 : index
    %c0_69 = arith.constant 0 : index
    %c0_70 = arith.constant 0 : index
    %275 = vector.load %arg13[%c0_68, %c0_69, %c0_70] : memref<2x8x128xf32, #tpu.memory_space<vmem>>, vector<1x8x128xf32>
    %276 = vector.shape_cast %275 : vector<1x8x128xf32> to vector<8x128xf32>
    %277 = vector.shape_cast %272 : vector<8x128xf32> to vector<1x8x128xf32>
    tpu.vector_store %arg13[%c0_68, %c0_69, %c0_70], %277 {strides = array<i32>} : memref<2x8x128xf32, #tpu.memory_space<vmem>>, vector<1x8x128xf32>,
    %c0_71 = arith.constant 0 : index
    %c0_72 = arith.constant 0 : index
    %c0_73 = arith.constant 0 : index
    %278 = vector.load %arg14[%c0_71, %c0_72, %c0_73] : memref<2x8x128xf32, #tpu.memory_space<vmem>>, vector<1x8x128xf32>
    %279 = vector.shape_cast %278 : vector<1x8x128xf32> to vector<8x128xf32>
    %280 = vector.shape_cast %270 : vector<8x128xf32> to vector<1x8x128xf32>
    tpu.vector_store %arg14[%c0_71, %c0_72, %c0_73], %280 {strides = array<i32>} : memref<2x8x128xf32, #tpu.memory_space<vmem>>, vector<1x8x128xf32>,
    %c0_74 = arith.constant 0 : index
    %c0_75 = arith.constant 0 : index
    %281 = vector.load %arg16[%c0_74, %c0_75] : memref<64x128xf32, #tpu.memory_space<vmem>>, vector<64x128xf32>
    %c0_76 = arith.constant 0 : index
    %c0_77 = arith.constant 0 : index
    %282 = vector.load %arg5[%c0_76, %c0_77] : memref<128x512xf32, #tpu.memory_space<vmem>>, vector<128x512xf32>
    %cst_78 = arith.constant dense<0.000000e+00> : vector<64x512xf32>
    %283 = tpu.matmul %281, %282, %cst_78 {dimension_numbers = #tpu.dot_dimension_numbers<[1], [0], [0], [1], [0, 0, 1, 1], [], []>} : vector<64x128xf32>, vector<128x512xf32>, vector<64x512xf32> -> vector<64x512xf32>
    %c0_79 = arith.constant 0 : index
    %c0_80 = arith.constant 0 : index
    %284 = vector.load %arg7[%c0_79, %c0_80] : memref<1x512xf32, #tpu.memory_space<vmem>>, vector<1x512xf32>
    %285 = vector.broadcast %284 : vector<1x512xf32> to vector<64x512xf32>
    %286 = arith.addf %283, %285 : vector<64x512xf32>
    %c0_81 = arith.constant 0 : index
    %c0_82 = arith.constant 0 : index
    %287 = vector.load %arg15[%c0_81, %c0_82] : memref<64x512xf32, #tpu.memory_space<vmem>>, vector<64x512xf32>
    tpu.vector_store %arg15[%c0_81, %c0_82], %286 {strides = array<i32>} : memref<64x512xf32, #tpu.memory_space<vmem>>, vector<64x512xf32>,
    %c0_83 = arith.constant 0 : index
    %c0_84 = arith.constant 0 : index
    %288 = vector.load %arg6[%c0_83, %c0_84] : memref<128x512xf32, #tpu.memory_space<vmem>>, vector<128x512xf32>
    %cst_85 = arith.constant 0.000000e+00 : f32
    %289 = vector.broadcast %cst_85 : f32 to vector<8x128xf32>
    %cst_86 = arith.constant 0.000000e+00 : f32
    %290 = vector.broadcast %cst_86 : f32 to vector<8x128xf32>
    %c0_i32_87 = arith.constant 0 : i32
    %c8_i32_88 = arith.constant 8 : i32
    %291 = arith.muli %c0_i32_87, %c8_i32_88 : i32
    %292 = tpu.assume_multiple %291, 8 : i32
    %293 = arith.index_cast %292 : i32 to index
    %c0_89 = arith.constant 0 : index
    %294 = vector.load %arg15[%293, %c0_89] : memref<64x512xf32, #tpu.memory_space<vmem>>, vector<8x512xf32>
    %cst_90 = arith.constant dense<0.000000e+00> : vector<8x512xf32>
    %295 = tpu.matmul %289, %288, %cst_90 {dimension_numbers = #tpu.dot_dimension_numbers<[1], [0], [0], [1], [0, 0, 1, 1], [], []>} : vector<8x128xf32>, vector<128x512xf32>, vector<8x512xf32> -> vector<8x512xf32>
    %296 = arith.addf %294, %295 : vector<8x512xf32>
    %297 = vector.extract_strided_slice %296 {offsets = [0, 0], sizes = [8, 128], strides = [1, 1]} : vector<8x512xf32> to vector<8x128xf32>
    %298 = arith.negf %297 : vector<8x128xf32>
    %299 = math.exp %298 : vector<8x128xf32>
    %cst_91 = arith.constant 1.000000e+00 : f32
    %300 = vector.broadcast %cst_91 : f32 to vector<8x128xf32>
    %301 = arith.addf %300, %299 : vector<8x128xf32>
    %302 = arith.divf %300, %301 : vector<8x128xf32>
    %303 = vector.extract_strided_slice %296 {offsets = [0, 128], sizes = [8, 128], strides = [1, 1]} : vector<8x512xf32> to vector<8x128xf32>
    %304 = arith.negf %303 : vector<8x128xf32>
    %305 = math.exp %304 : vector<8x128xf32>
    %cst_92 = arith.constant 1.000000e+00 : f32
    %306 = vector.broadcast %cst_92 : f32 to vector<8x128xf32>
    %307 = arith.addf %306, %305 : vector<8x128xf32>
    %308 = arith.divf %306, %307 : vector<8x128xf32>
    %309 = vector.extract_strided_slice %296 {offsets = [0, 256], sizes = [8, 128], strides = [1, 1]} : vector<8x512xf32> to vector<8x128xf32>
    %310 = math.tanh %309 : vector<8x128xf32>
    %311 = vector.extract_strided_slice %296 {offsets = [0, 384], sizes = [8, 128], strides = [1, 1]} : vector<8x512xf32> to vector<8x128xf32>
    %312 = arith.negf %311 : vector<8x128xf32>
    %313 = math.exp %312 : vector<8x128xf32>
    %cst_93 = arith.constant 1.000000e+00 : f32
    %314 = vector.broadcast %cst_93 : f32 to vector<8x128xf32>
    %315 = arith.addf %314, %313 : vector<8x128xf32>
    %316 = arith.divf %314, %315 : vector<8x128xf32>
    %317 = arith.mulf %308, %290 : vector<8x128xf32>
    %318 = arith.mulf %302, %310 : vector<8x128xf32>
    %319 = arith.addf %317, %318 : vector<8x128xf32>
    %320 = math.tanh %319 : vector<8x128xf32>
    %321 = arith.mulf %316, %320 : vector<8x128xf32>
    %c1_i32_94 = arith.constant 1 : i32
    %c8_i32_95 = arith.constant 8 : i32
    %322 = arith.muli %c1_i32_94, %c8_i32_95 : i32
    %323 = tpu.assume_multiple %322, 8 : i32
    %324 = arith.index_cast %323 : i32 to index
    %c0_96 = arith.constant 0 : index
    %325 = vector.load %arg15[%324, %c0_96] : memref<64x512xf32, #tpu.memory_space<vmem>>, vector<8x512xf32>
    %cst_97 = arith.constant dense<0.000000e+00> : vector<8x512xf32>
    %326 = tpu.matmul %321, %288, %cst_97 {dimension_numbers = #tpu.dot_dimension_numbers<[1], [0], [0], [1], [0, 0, 1, 1], [], []>} : vector<8x128xf32>, vector<128x512xf32>, vector<8x512xf32> -> vector<8x512xf32>
    %327 = arith.addf %325, %326 : vector<8x512xf32>
    %328 = vector.extract_strided_slice %327 {offsets = [0, 0], sizes = [8, 128], strides = [1, 1]} : vector<8x512xf32> to vector<8x128xf32>
    %329 = arith.negf %328 : vector<8x128xf32>
    %330 = math.exp %329 : vector<8x128xf32>
    %cst_98 = arith.constant 1.000000e+00 : f32
    %331 = vector.broadcast %cst_98 : f32 to vector<8x128xf32>
    %332 = arith.addf %331, %330 : vector<8x128xf32>
    %333 = arith.divf %331, %332 : vector<8x128xf32>
    %334 = vector.extract_strided_slice %327 {offsets = [0, 128], sizes = [8, 128], strides = [1, 1]} : vector<8x512xf32> to vector<8x128xf32>
    %335 = arith.negf %334 : vector<8x128xf32>
    %336 = math.exp %335 : vector<8x128xf32>
    %cst_99 = arith.constant 1.000000e+00 : f32
    %337 = vector.broadcast %cst_99 : f32 to vector<8x128xf32>
    %338 = arith.addf %337, %336 : vector<8x128xf32>
    %339 = arith.divf %337, %338 : vector<8x128xf32>
    %340 = vector.extract_strided_slice %327 {offsets = [0, 256], sizes = [8, 128], strides = [1, 1]} : vector<8x512xf32> to vector<8x128xf32>
    %341 = math.tanh %340 : vector<8x128xf32>
    %342 = vector.extract_strided_slice %327 {offsets = [0, 384], sizes = [8, 128], strides = [1, 1]} : vector<8x512xf32> to vector<8x128xf32>
    %343 = arith.negf %342 : vector<8x128xf32>
    %344 = math.exp %343 : vector<8x128xf32>
    %cst_100 = arith.constant 1.000000e+00 : f32
    %345 = vector.broadcast %cst_100 : f32 to vector<8x128xf32>
    %346 = arith.addf %345, %344 : vector<8x128xf32>
    %347 = arith.divf %345, %346 : vector<8x128xf32>
    %348 = arith.mulf %339, %319 : vector<8x128xf32>
    %349 = arith.mulf %333, %341 : vector<8x128xf32>
    %350 = arith.addf %348, %349 : vector<8x128xf32>
    %351 = math.tanh %350 : vector<8x128xf32>
    %352 = arith.mulf %347, %351 : vector<8x128xf32>
    %c2_i32_101 = arith.constant 2 : i32
    %c8_i32_102 = arith.constant 8 : i32
    %353 = arith.muli %c2_i32_101, %c8_i32_102 : i32
    %354 = tpu.assume_multiple %353, 8 : i32
    %355 = arith.index_cast %354 : i32 to index
    %c0_103 = arith.constant 0 : index
    %356 = vector.load %arg15[%355, %c0_103] : memref<64x512xf32, #tpu.memory_space<vmem>>, vector<8x512xf32>
    %cst_104 = arith.constant dense<0.000000e+00> : vector<8x512xf32>
    %357 = tpu.matmul %352, %288, %cst_104 {dimension_numbers = #tpu.dot_dimension_numbers<[1], [0], [0], [1], [0, 0, 1, 1], [], []>} : vector<8x128xf32>, vector<128x512xf32>, vector<8x512xf32> -> vector<8x512xf32>
    %358 = arith.addf %356, %357 : vector<8x512xf32>
    %359 = vector.extract_strided_slice %358 {offsets = [0, 0], sizes = [8, 128], strides = [1, 1]} : vector<8x512xf32> to vector<8x128xf32>
    %360 = arith.negf %359 : vector<8x128xf32>
    %361 = math.exp %360 : vector<8x128xf32>
    %cst_105 = arith.constant 1.000000e+00 : f32
    %362 = vector.broadcast %cst_105 : f32 to vector<8x128xf32>
    %363 = arith.addf %362, %361 : vector<8x128xf32>
    %364 = arith.divf %362, %363 : vector<8x128xf32>
    %365 = vector.extract_strided_slice %358 {offsets = [0, 128], sizes = [8, 128], strides = [1, 1]} : vector<8x512xf32> to vector<8x128xf32>
    %366 = arith.negf %365 : vector<8x128xf32>
    %367 = math.exp %366 : vector<8x128xf32>
    %cst_106 = arith.constant 1.000000e+00 : f32
    %368 = vector.broadcast %cst_106 : f32 to vector<8x128xf32>
    %369 = arith.addf %368, %367 : vector<8x128xf32>
    %370 = arith.divf %368, %369 : vector<8x128xf32>
    %371 = vector.extract_strided_slice %358 {offsets = [0, 256], sizes = [8, 128], strides = [1, 1]} : vector<8x512xf32> to vector<8x128xf32>
    %372 = math.tanh %371 : vector<8x128xf32>
    %373 = vector.extract_strided_slice %358 {offsets = [0, 384], sizes = [8, 128], strides = [1, 1]} : vector<8x512xf32> to vector<8x128xf32>
    %374 = arith.negf %373 : vector<8x128xf32>
    %375 = math.exp %374 : vector<8x128xf32>
    %cst_107 = arith.constant 1.000000e+00 : f32
    %376 = vector.broadcast %cst_107 : f32 to vector<8x128xf32>
    %377 = arith.addf %376, %375 : vector<8x128xf32>
    %378 = arith.divf %376, %377 : vector<8x128xf32>
    %379 = arith.mulf %370, %350 : vector<8x128xf32>
    %380 = arith.mulf %364, %372 : vector<8x128xf32>
    %381 = arith.addf %379, %380 : vector<8x128xf32>
    %382 = math.tanh %381 : vector<8x128xf32>
    %383 = arith.mulf %378, %382 : vector<8x128xf32>
    %c3_i32_108 = arith.constant 3 : i32
    %c8_i32_109 = arith.constant 8 : i32
    %384 = arith.muli %c3_i32_108, %c8_i32_109 : i32
    %385 = tpu.assume_multiple %384, 8 : i32
    %386 = arith.index_cast %385 : i32 to index
    %c0_110 = arith.constant 0 : index
    %387 = vector.load %arg15[%386, %c0_110] : memref<64x512xf32, #tpu.memory_space<vmem>>, vector<8x512xf32>
    %cst_111 = arith.constant dense<0.000000e+00> : vector<8x512xf32>
    %388 = tpu.matmul %383, %288, %cst_111 {dimension_numbers = #tpu.dot_dimension_numbers<[1], [0], [0], [1], [0, 0, 1, 1], [], []>} : vector<8x128xf32>, vector<128x512xf32>, vector<8x512xf32> -> vector<8x512xf32>
    %389 = arith.addf %387, %388 : vector<8x512xf32>
    %390 = vector.extract_strided_slice %389 {offsets = [0, 0], sizes = [8, 128], strides = [1, 1]} : vector<8x512xf32> to vector<8x128xf32>
    %391 = arith.negf %390 : vector<8x128xf32>
    %392 = math.exp %391 : vector<8x128xf32>
    %cst_112 = arith.constant 1.000000e+00 : f32
    %393 = vector.broadcast %cst_112 : f32 to vector<8x128xf32>
    %394 = arith.addf %393, %392 : vector<8x128xf32>
    %395 = arith.divf %393, %394 : vector<8x128xf32>
    %396 = vector.extract_strided_slice %389 {offsets = [0, 128], sizes = [8, 128], strides = [1, 1]} : vector<8x512xf32> to vector<8x128xf32>
    %397 = arith.negf %396 : vector<8x128xf32>
    %398 = math.exp %397 : vector<8x128xf32>
    %cst_113 = arith.constant 1.000000e+00 : f32
    %399 = vector.broadcast %cst_113 : f32 to vector<8x128xf32>
    %400 = arith.addf %399, %398 : vector<8x128xf32>
    %401 = arith.divf %399, %400 : vector<8x128xf32>
    %402 = vector.extract_strided_slice %389 {offsets = [0, 256], sizes = [8, 128], strides = [1, 1]} : vector<8x512xf32> to vector<8x128xf32>
    %403 = math.tanh %402 : vector<8x128xf32>
    %404 = vector.extract_strided_slice %389 {offsets = [0, 384], sizes = [8, 128], strides = [1, 1]} : vector<8x512xf32> to vector<8x128xf32>
    %405 = arith.negf %404 : vector<8x128xf32>
    %406 = math.exp %405 : vector<8x128xf32>
    %cst_114 = arith.constant 1.000000e+00 : f32
    %407 = vector.broadcast %cst_114 : f32 to vector<8x128xf32>
    %408 = arith.addf %407, %406 : vector<8x128xf32>
    %409 = arith.divf %407, %408 : vector<8x128xf32>
    %410 = arith.mulf %401, %381 : vector<8x128xf32>
    %411 = arith.mulf %395, %403 : vector<8x128xf32>
    %412 = arith.addf %410, %411 : vector<8x128xf32>
    %413 = math.tanh %412 : vector<8x128xf32>
    %414 = arith.mulf %409, %413 : vector<8x128xf32>
    %c4_i32_115 = arith.constant 4 : i32
    %c8_i32_116 = arith.constant 8 : i32
    %415 = arith.muli %c4_i32_115, %c8_i32_116 : i32
    %416 = tpu.assume_multiple %415, 8 : i32
    %417 = arith.index_cast %416 : i32 to index
    %c0_117 = arith.constant 0 : index
    %418 = vector.load %arg15[%417, %c0_117] : memref<64x512xf32, #tpu.memory_space<vmem>>, vector<8x512xf32>
    %cst_118 = arith.constant dense<0.000000e+00> : vector<8x512xf32>
    %419 = tpu.matmul %414, %288, %cst_118 {dimension_numbers = #tpu.dot_dimension_numbers<[1], [0], [0], [1], [0, 0, 1, 1], [], []>} : vector<8x128xf32>, vector<128x512xf32>, vector<8x512xf32> -> vector<8x512xf32>
    %420 = arith.addf %418, %419 : vector<8x512xf32>
    %421 = vector.extract_strided_slice %420 {offsets = [0, 0], sizes = [8, 128], strides = [1, 1]} : vector<8x512xf32> to vector<8x128xf32>
    %422 = arith.negf %421 : vector<8x128xf32>
    %423 = math.exp %422 : vector<8x128xf32>
    %cst_119 = arith.constant 1.000000e+00 : f32
    %424 = vector.broadcast %cst_119 : f32 to vector<8x128xf32>
    %425 = arith.addf %424, %423 : vector<8x128xf32>
    %426 = arith.divf %424, %425 : vector<8x128xf32>
    %427 = vector.extract_strided_slice %420 {offsets = [0, 128], sizes = [8, 128], strides = [1, 1]} : vector<8x512xf32> to vector<8x128xf32>
    %428 = arith.negf %427 : vector<8x128xf32>
    %429 = math.exp %428 : vector<8x128xf32>
    %cst_120 = arith.constant 1.000000e+00 : f32
    %430 = vector.broadcast %cst_120 : f32 to vector<8x128xf32>
    %431 = arith.addf %430, %429 : vector<8x128xf32>
    %432 = arith.divf %430, %431 : vector<8x128xf32>
    %433 = vector.extract_strided_slice %420 {offsets = [0, 256], sizes = [8, 128], strides = [1, 1]} : vector<8x512xf32> to vector<8x128xf32>
    %434 = math.tanh %433 : vector<8x128xf32>
    %435 = vector.extract_strided_slice %420 {offsets = [0, 384], sizes = [8, 128], strides = [1, 1]} : vector<8x512xf32> to vector<8x128xf32>
    %436 = arith.negf %435 : vector<8x128xf32>
    %437 = math.exp %436 : vector<8x128xf32>
    %cst_121 = arith.constant 1.000000e+00 : f32
    %438 = vector.broadcast %cst_121 : f32 to vector<8x128xf32>
    %439 = arith.addf %438, %437 : vector<8x128xf32>
    %440 = arith.divf %438, %439 : vector<8x128xf32>
    %441 = arith.mulf %432, %412 : vector<8x128xf32>
    %442 = arith.mulf %426, %434 : vector<8x128xf32>
    %443 = arith.addf %441, %442 : vector<8x128xf32>
    %444 = math.tanh %443 : vector<8x128xf32>
    %445 = arith.mulf %440, %444 : vector<8x128xf32>
    %c5_i32_122 = arith.constant 5 : i32
    %c8_i32_123 = arith.constant 8 : i32
    %446 = arith.muli %c5_i32_122, %c8_i32_123 : i32
    %447 = tpu.assume_multiple %446, 8 : i32
    %448 = arith.index_cast %447 : i32 to index
    %c0_124 = arith.constant 0 : index
    %449 = vector.load %arg15[%448, %c0_124] : memref<64x512xf32, #tpu.memory_space<vmem>>, vector<8x512xf32>
    %cst_125 = arith.constant dense<0.000000e+00> : vector<8x512xf32>
    %450 = tpu.matmul %445, %288, %cst_125 {dimension_numbers = #tpu.dot_dimension_numbers<[1], [0], [0], [1], [0, 0, 1, 1], [], []>} : vector<8x128xf32>, vector<128x512xf32>, vector<8x512xf32> -> vector<8x512xf32>
    %451 = arith.addf %449, %450 : vector<8x512xf32>
    %452 = vector.extract_strided_slice %451 {offsets = [0, 0], sizes = [8, 128], strides = [1, 1]} : vector<8x512xf32> to vector<8x128xf32>
    %453 = arith.negf %452 : vector<8x128xf32>
    %454 = math.exp %453 : vector<8x128xf32>
    %cst_126 = arith.constant 1.000000e+00 : f32
    %455 = vector.broadcast %cst_126 : f32 to vector<8x128xf32>
    %456 = arith.addf %455, %454 : vector<8x128xf32>
    %457 = arith.divf %455, %456 : vector<8x128xf32>
    %458 = vector.extract_strided_slice %451 {offsets = [0, 128], sizes = [8, 128], strides = [1, 1]} : vector<8x512xf32> to vector<8x128xf32>
    %459 = arith.negf %458 : vector<8x128xf32>
    %460 = math.exp %459 : vector<8x128xf32>
    %cst_127 = arith.constant 1.000000e+00 : f32
    %461 = vector.broadcast %cst_127 : f32 to vector<8x128xf32>
    %462 = arith.addf %461, %460 : vector<8x128xf32>
    %463 = arith.divf %461, %462 : vector<8x128xf32>
    %464 = vector.extract_strided_slice %451 {offsets = [0, 256], sizes = [8, 128], strides = [1, 1]} : vector<8x512xf32> to vector<8x128xf32>
    %465 = math.tanh %464 : vector<8x128xf32>
    %466 = vector.extract_strided_slice %451 {offsets = [0, 384], sizes = [8, 128], strides = [1, 1]} : vector<8x512xf32> to vector<8x128xf32>
    %467 = arith.negf %466 : vector<8x128xf32>
    %468 = math.exp %467 : vector<8x128xf32>
    %cst_128 = arith.constant 1.000000e+00 : f32
    %469 = vector.broadcast %cst_128 : f32 to vector<8x128xf32>
    %470 = arith.addf %469, %468 : vector<8x128xf32>
    %471 = arith.divf %469, %470 : vector<8x128xf32>
    %472 = arith.mulf %463, %443 : vector<8x128xf32>
    %473 = arith.mulf %457, %465 : vector<8x128xf32>
    %474 = arith.addf %472, %473 : vector<8x128xf32>
    %475 = math.tanh %474 : vector<8x128xf32>
    %476 = arith.mulf %471, %475 : vector<8x128xf32>
    %c6_i32_129 = arith.constant 6 : i32
    %c8_i32_130 = arith.constant 8 : i32
    %477 = arith.muli %c6_i32_129, %c8_i32_130 : i32
    %478 = tpu.assume_multiple %477, 8 : i32
    %479 = arith.index_cast %478 : i32 to index
    %c0_131 = arith.constant 0 : index
    %480 = vector.load %arg15[%479, %c0_131] : memref<64x512xf32, #tpu.memory_space<vmem>>, vector<8x512xf32>
    %cst_132 = arith.constant dense<0.000000e+00> : vector<8x512xf32>
    %481 = tpu.matmul %476, %288, %cst_132 {dimension_numbers = #tpu.dot_dimension_numbers<[1], [0], [0], [1], [0, 0, 1, 1], [], []>} : vector<8x128xf32>, vector<128x512xf32>, vector<8x512xf32> -> vector<8x512xf32>
    %482 = arith.addf %480, %481 : vector<8x512xf32>
    %483 = vector.extract_strided_slice %482 {offsets = [0, 0], sizes = [8, 128], strides = [1, 1]} : vector<8x512xf32> to vector<8x128xf32>
    %484 = arith.negf %483 : vector<8x128xf32>
    %485 = math.exp %484 : vector<8x128xf32>
    %cst_133 = arith.constant 1.000000e+00 : f32
    %486 = vector.broadcast %cst_133 : f32 to vector<8x128xf32>
    %487 = arith.addf %486, %485 : vector<8x128xf32>
    %488 = arith.divf %486, %487 : vector<8x128xf32>
    %489 = vector.extract_strided_slice %482 {offsets = [0, 128], sizes = [8, 128], strides = [1, 1]} : vector<8x512xf32> to vector<8x128xf32>
    %490 = arith.negf %489 : vector<8x128xf32>
    %491 = math.exp %490 : vector<8x128xf32>
    %cst_134 = arith.constant 1.000000e+00 : f32
    %492 = vector.broadcast %cst_134 : f32 to vector<8x128xf32>
    %493 = arith.addf %492, %491 : vector<8x128xf32>
    %494 = arith.divf %492, %493 : vector<8x128xf32>
    %495 = vector.extract_strided_slice %482 {offsets = [0, 256], sizes = [8, 128], strides = [1, 1]} : vector<8x512xf32> to vector<8x128xf32>
    %496 = math.tanh %495 : vector<8x128xf32>
    %497 = vector.extract_strided_slice %482 {offsets = [0, 384], sizes = [8, 128], strides = [1, 1]} : vector<8x512xf32> to vector<8x128xf32>
    %498 = arith.negf %497 : vector<8x128xf32>
    %499 = math.exp %498 : vector<8x128xf32>
    %cst_135 = arith.constant 1.000000e+00 : f32
    %500 = vector.broadcast %cst_135 : f32 to vector<8x128xf32>
    %501 = arith.addf %500, %499 : vector<8x128xf32>
    %502 = arith.divf %500, %501 : vector<8x128xf32>
    %503 = arith.mulf %494, %474 : vector<8x128xf32>
    %504 = arith.mulf %488, %496 : vector<8x128xf32>
    %505 = arith.addf %503, %504 : vector<8x128xf32>
    %506 = math.tanh %505 : vector<8x128xf32>
    %507 = arith.mulf %502, %506 : vector<8x128xf32>
    %c7_i32_136 = arith.constant 7 : i32
    %c8_i32_137 = arith.constant 8 : i32
    %508 = arith.muli %c7_i32_136, %c8_i32_137 : i32
    %509 = tpu.assume_multiple %508, 8 : i32
    %510 = arith.index_cast %509 : i32 to index
    %c0_138 = arith.constant 0 : index
    %511 = vector.load %arg15[%510, %c0_138] : memref<64x512xf32, #tpu.memory_space<vmem>>, vector<8x512xf32>
    %cst_139 = arith.constant dense<0.000000e+00> : vector<8x512xf32>
    %512 = tpu.matmul %507, %288, %cst_139 {dimension_numbers = #tpu.dot_dimension_numbers<[1], [0], [0], [1], [0, 0, 1, 1], [], []>} : vector<8x128xf32>, vector<128x512xf32>, vector<8x512xf32> -> vector<8x512xf32>
    %513 = arith.addf %511, %512 : vector<8x512xf32>
    %514 = vector.extract_strided_slice %513 {offsets = [0, 0], sizes = [8, 128], strides = [1, 1]} : vector<8x512xf32> to vector<8x128xf32>
    %515 = arith.negf %514 : vector<8x128xf32>
    %516 = math.exp %515 : vector<8x128xf32>
    %cst_140 = arith.constant 1.000000e+00 : f32
    %517 = vector.broadcast %cst_140 : f32 to vector<8x128xf32>
    %518 = arith.addf %517, %516 : vector<8x128xf32>
    %519 = arith.divf %517, %518 : vector<8x128xf32>
    %520 = vector.extract_strided_slice %513 {offsets = [0, 128], sizes = [8, 128], strides = [1, 1]} : vector<8x512xf32> to vector<8x128xf32>
    %521 = arith.negf %520 : vector<8x128xf32>
    %522 = math.exp %521 : vector<8x128xf32>
    %cst_141 = arith.constant 1.000000e+00 : f32
    %523 = vector.broadcast %cst_141 : f32 to vector<8x128xf32>
    %524 = arith.addf %523, %522 : vector<8x128xf32>
    %525 = arith.divf %523, %524 : vector<8x128xf32>
    %526 = vector.extract_strided_slice %513 {offsets = [0, 256], sizes = [8, 128], strides = [1, 1]} : vector<8x512xf32> to vector<8x128xf32>
    %527 = math.tanh %526 : vector<8x128xf32>
    %528 = vector.extract_strided_slice %513 {offsets = [0, 384], sizes = [8, 128], strides = [1, 1]} : vector<8x512xf32> to vector<8x128xf32>
    %529 = arith.negf %528 : vector<8x128xf32>
    %530 = math.exp %529 : vector<8x128xf32>
    %cst_142 = arith.constant 1.000000e+00 : f32
    %531 = vector.broadcast %cst_142 : f32 to vector<8x128xf32>
    %532 = arith.addf %531, %530 : vector<8x128xf32>
    %533 = arith.divf %531, %532 : vector<8x128xf32>
    %534 = arith.mulf %525, %505 : vector<8x128xf32>
    %535 = arith.mulf %519, %527 : vector<8x128xf32>
    %536 = arith.addf %534, %535 : vector<8x128xf32>
    %537 = math.tanh %536 : vector<8x128xf32>
    %538 = arith.mulf %533, %537 : vector<8x128xf32>
    %c8_i32_143 = arith.constant 8 : i32
    %c1 = arith.constant 1 : index
    %c0_144 = arith.constant 0 : index
    %c0_145 = arith.constant 0 : index
    %539 = vector.load %arg13[%c1, %c0_144, %c0_145] : memref<2x8x128xf32, #tpu.memory_space<vmem>>, vector<1x8x128xf32>
    %540 = vector.shape_cast %539 : vector<1x8x128xf32> to vector<8x128xf32>
    %541 = vector.shape_cast %538 : vector<8x128xf32> to vector<1x8x128xf32>
    tpu.vector_store %arg13[%c1, %c0_144, %c0_145], %541 {strides = array<i32>} : memref<2x8x128xf32, #tpu.memory_space<vmem>>, vector<1x8x128xf32>,
    %c1_146 = arith.constant 1 : index
    %c0_147 = arith.constant 0 : index
    %c0_148 = arith.constant 0 : index
    %542 = vector.load %arg14[%c1_146, %c0_147, %c0_148] : memref<2x8x128xf32, #tpu.memory_space<vmem>>, vector<1x8x128xf32>
    %543 = vector.shape_cast %542 : vector<1x8x128xf32> to vector<8x128xf32>
    %544 = vector.shape_cast %536 : vector<8x128xf32> to vector<1x8x128xf32>
    tpu.vector_store %arg14[%c1_146, %c0_147, %c0_148], %544 {strides = array<i32>} : memref<2x8x128xf32, #tpu.memory_space<vmem>>, vector<1x8x128xf32>,
    %c0_149 = arith.constant 0 : index
    %c0_150 = arith.constant 0 : index
    %545 = vector.load %arg8[%c0_149, %c0_150] : memref<128x128xf32, #tpu.memory_space<vmem>>, vector<128x128xf32>
    %cst_151 = arith.constant dense<0.000000e+00> : vector<8x128xf32>
    %546 = tpu.matmul %538, %545, %cst_151 {dimension_numbers = #tpu.dot_dimension_numbers<[1], [0], [0], [1], [0, 0, 1, 1], [], []>} : vector<8x128xf32>, vector<128x128xf32>, vector<8x128xf32> -> vector<8x128xf32>
    %c0_152 = arith.constant 0 : index
    %c0_153 = arith.constant 0 : index
    %547 = vector.load %arg9[%c0_152, %c0_153] : memref<1x128xf32, #tpu.memory_space<vmem>>, vector<1x128xf32>
    %548 = vector.broadcast %547 : vector<1x128xf32> to vector<8x128xf32>
    %549 = arith.addf %546, %548 : vector<8x128xf32>
    %cst_154 = arith.constant 0.000000e+00 : f32
    %550 = vector.broadcast %cst_154 : f32 to vector<8x128xf32>
    %551 = arith.cmpf ogt, %549, %550 : vector<8x128xf32>
    %cst_155 = arith.constant 0.00999999977 : f32
    %552 = vector.broadcast %cst_155 : f32 to vector<8x128xf32>
    %553 = arith.mulf %552, %549 : vector<8x128xf32>
    %554 = arith.select %551, %549, %553 : vector<8x128xi1>, vector<8x128xf32>
    %c0_156 = arith.constant 0 : index
    %c0_157 = arith.constant 0 : index
    %555 = vector.load %arg10[%c0_156, %c0_157] : memref<128x128xf32, #tpu.memory_space<vmem>>, vector<128x128xf32>
    %cst_158 = arith.constant dense<0.000000e+00> : vector<8x128xf32>
    %556 = tpu.matmul %554, %555, %cst_158 {dimension_numbers = #tpu.dot_dimension_numbers<[1], [0], [0], [1], [0, 0, 1, 1], [], []>} : vector<8x128xf32>, vector<128x128xf32>, vector<8x128xf32> -> vector<8x128xf32>
    %c0_159 = arith.constant 0 : index
    %c0_160 = arith.constant 0 : index
    %557 = vector.load %arg11[%c0_159, %c0_160] : memref<1x128xf32, #tpu.memory_space<vmem>>, vector<1x128xf32>
    %558 = vector.broadcast %557 : vector<1x128xf32> to vector<8x128xf32>
    %559 = arith.addf %556, %558 : vector<8x128xf32>
    %c0_161 = arith.constant 0 : index
    %c0_162 = arith.constant 0 : index
    %560 = vector.load %arg12[%c0_161, %c0_162] : memref<8x128xf32, #tpu.memory_space<vmem>>, vector<8x128xf32>
    tpu.vector_store %arg12[%c0_161, %c0_162], %559 {strides = array<i32>} : memref<8x128xf32, #tpu.memory_space<vmem>>, vector<8x128xf32>,
    return
  }
  func.func @transform_0(%arg0: i32) -> (i32, i32, i32) {
    %c0_i32 = arith.constant 0 : i32
    %c0_i32_0 = arith.constant 0 : i32
    %c0_i32_1 = arith.constant 0 : i32
    return %arg0, %c0_i32, %c0_i32_0 : i32, i32, i32
  }
  func.func @transform_1(%arg0: i32) -> (i32, i32) {
    %c0_i32 = arith.constant 0 : i32
    %c0_i32_0 = arith.constant 0 : i32
    %c0_i32_1 = arith.constant 0 : i32
    return %c0_i32, %c0_i32_0 : i32, i32
  }
  func.func @transform_2(%arg0: i32) -> (i32, i32) {
    %c0_i32 = arith.constant 0 : i32
    %c0_i32_0 = arith.constant 0 : i32
    %c0_i32_1 = arith.constant 0 : i32
    return %c0_i32, %c0_i32_0 : i32, i32
  }
  func.func @transform_3(%arg0: i32) -> (i32, i32) {
    %c0_i32 = arith.constant 0 : i32
    %c0_i32_0 = arith.constant 0 : i32
    %c0_i32_1 = arith.constant 0 : i32
    return %c0_i32, %c0_i32_0 : i32, i32
  }
  func.func @transform_4(%arg0: i32) -> (i32, i32) {
    %c0_i32 = arith.constant 0 : i32
    %c0_i32_0 = arith.constant 0 : i32
    %c0_i32_1 = arith.constant 0 : i32
    return %c0_i32, %c0_i32_0 : i32, i32
  }
  func.func @transform_5(%arg0: i32) -> (i32, i32) {
    %c0_i32 = arith.constant 0 : i32
    %c0_i32_0 = arith.constant 0 : i32
    %c0_i32_1 = arith.constant 0 : i32
    return %c0_i32, %c0_i32_0 : i32, i32
  }
  func.func @transform_6(%arg0: i32) -> (i32, i32) {
    %c0_i32 = arith.constant 0 : i32
    %c0_i32_0 = arith.constant 0 : i32
    %c0_i32_1 = arith.constant 0 : i32
    return %c0_i32, %c0_i32_0 : i32, i32
  }
  func.func @transform_7(%arg0: i32) -> (i32, i32) {
    %c0_i32 = arith.constant 0 : i32
    %c0_i32_0 = arith.constant 0 : i32
    %c0_i32_1 = arith.constant 0 : i32
    return %c0_i32, %c0_i32_0 : i32, i32
  }
  func.func @transform_8(%arg0: i32) -> (i32, i32) {
    %c0_i32 = arith.constant 0 : i32
    %c0_i32_0 = arith.constant 0 : i32
    %c0_i32_1 = arith.constant 0 : i32
    return %c0_i32, %c0_i32_0 : i32, i32
  }
  func.func @transform_9(%arg0: i32) -> (i32, i32) {
    %c0_i32 = arith.constant 0 : i32
    %c0_i32_0 = arith.constant 0 : i32
    %c0_i32_1 = arith.constant 0 : i32
    return %c0_i32, %c0_i32_0 : i32, i32
  }
  func.func @transform_10(%arg0: i32) -> (i32, i32) {
    %c0_i32 = arith.constant 0 : i32
    %c0_i32_0 = arith.constant 0 : i32
    %c0_i32_1 = arith.constant 0 : i32
    return %c0_i32, %c0_i32_0 : i32, i32
  }
  func.func @transform_11(%arg0: i32) -> (i32, i32) {
    %c0_i32 = arith.constant 0 : i32
    %c0_i32_0 = arith.constant 0 : i32
    return %arg0, %c0_i32 : i32, i32
  }
  func.func @transform_12(%arg0: i32) -> (i32, i32, i32) {
    %c0_i32 = arith.constant 0 : i32
    %c0_i32_0 = arith.constant 0 : i32
    %c0_i32_1 = arith.constant 0 : i32
    return %c0_i32, %arg0, %c0_i32_0 : i32, i32, i32
  }
  func.func @transform_13(%arg0: i32) -> (i32, i32, i32) {
    %c0_i32 = arith.constant 0 : i32
    %c0_i32_0 = arith.constant 0 : i32
    %c0_i32_1 = arith.constant 0 : i32
    return %c0_i32, %arg0, %c0_i32_0 : i32, i32, i32
  }
}

</mosaic_0001>

<bundles_post_ra>
// kernel: tpu_custom_call.1
= control target key start
LH: loop header
LB: loop body
LE: loop exit
PB: predicated region body
PF: predicated region fallthrough
CT: control target
= control target key end

     0   :  { %19 = vsyncpa [#allocation5], 0  ;;  %s6922_s0 = inlined_call_operand.vmem [shape: f32[1,64,4], index: 0, kind: input, shape index: {}]   ;;  %s6923_s1 = inlined_call_operand.vmem [shape: f32[4,512], index: 1, kind: input, shape index: {}]   ;;  %s6924_s2 = inlined_call_operand.hbm [shape: f32[128,512], index: 2, kind: input, shape index: {}]   ;;  %s6925_s3 = inlined_call_operand.vmem [shape: f32[1,512], index: 3, kind: input, shape index: {}]   ;;  %s6926_s4 = inlined_call_operand.hbm [shape: f32[128,512], index: 4, kind: input, shape index: {}]   ;;  %s6927_s5 = inlined_call_operand.hbm [shape: f32[128,512], index: 5, kind: input, shape index: {}]   ;;  %s6928_s6 = inlined_call_operand.vmem [shape: f32[1,512], index: 6, kind: input, shape index: {}]   ;;  %s6929_s7 = inlined_call_operand.hbm [shape: f32[128,128], index: 7, kind: input, shape index: {}]   ;;  %s6930_s8 = inlined_call_operand.vmem [shape: f32[1,128], index: 8, kind: input, shape index: {}]   ;;  %s6931_s9 = inlined_call_operand.hbm [shape: f32[128,128], index: 9, kind: input, shape index: {}]   ;;  %s6932_s10 = inlined_call_operand.vmem [shape: f32[1,128], index: 10, kind: input, shape index: {}]   ;;  %s6933_s11 = inlined_call_operand.hbm [shape: f32[8,128], index: 11, kind: output, shape index: {0}]   ;;  %s6934_s12 = inlined_call_operand.hbm [shape: f32[2,8,128], index: 12, kind: output, shape index: {1}]   ;;  %s6935_s13 = inlined_call_operand.hbm [shape: f32[2,8,128], index: 13, kind: output, shape index: {2}]  }
   0x1   :  { %20 = vsyncpa [#allocation8], 0 }
   0x2   :  { %21 = vsyncpa [#allocation11], 0 }
   0x3   :  { %22 = vsyncpa [#allocation6], 0 }
   0x4   :  { %23 = vsyncpa [#allocation15], 0  ;;  %s4737_s25 = smov [#allocation7]   ;;  %s4738_s27 = smov [#allocation10]  }
   0x5   :  { %s47_s26 = sshll.u32 %s4737_s25, 4  ;;  %s73_s28 = sshll.u32 %s4738_s27, 4  ;;  %s48_s26 = int_to_ptr.vmem [resolvable:$true] %s47_s26  ;;  %s74_s28 = int_to_ptr.vmem [resolvable:$true] %s73_s28 }
   0x6   :  { %s4575_s29 = scalar_lea.vmem %s48_s26, 8192  ;;  %p4580_p1 = scmp.lt.s32.totalorder %s48_s26, %s48_s26 }
   0x7   :  { %p4576_p0 = scmp.ne.s32.totalorder %s48_s26, %s4575_s29  ;;  %p4581_p2 = scmp.lt.s32.totalorder %s4575_s29, %s4575_s29 }
   0x9   :  { %p4582_p3 = por %p4581_p2, %p4580_p1 }
   0xb   :  { %p4583_p4 = pnand %p4582_p3, %p4576_p0 }
   0xd   :  { %4586 = shalt.err (!%p4583_p4)
}
   0xe   :  { %s4739_s30 = smov 512   ;;  %s4740_s14 = smov 32  }
   0xf   :  { %53 = dma.hbm_to_vmem [thread:$0]  %s6926_s4, 8192, %s48_s26, [#allocation8], %s4739_s30, %s4739_s30, %s4740_s14  }
  0x10   :  { %s4595_s17 = scalar_lea.vmem %s74_s28, 2048  ;;  %p4600_p6 = scmp.lt.s32.totalorder %s74_s28, %s74_s28 }
  0x11   :  { %p4596_p5 = scmp.ne.s32.totalorder %s74_s28, %s4595_s17  ;;  %p4601_p7 = scmp.lt.s32.totalorder %s4595_s17, %s4595_s17 }
  0x13   :  { %p4602_p8 = por %p4601_p7, %p4600_p6 }
  0x15   :  { %p4603_p9 = pnand %p4602_p8, %p4596_p5 }
  0x17   :  { %4606 = shalt.err (!%p4603_p9)
}
  0x18   :  { %s4741_s18 = smov 128   ;;  %s4742_s19 = smov 8  }
  0x19   :  { %79 = dma.hbm_to_vmem [thread:$0]  %s6929_s7, 2048, %s74_s28, [#allocation11], %s4741_s18, %s4741_s18, %s4742_s19  }
  0x1a   :  { %s4743_s22 = smov [#allocation4]   ;;  %s4744_s24 = smov [#allocation9]  }
  0x1b   :  { %s33_s23 = sshll.u32 %s4743_s22, 4  ;;  %s59_s4 = sshll.u32 %s4744_s24, 4  ;;  %s34_s23 = int_to_ptr.vmem [resolvable:$true] %s33_s23  ;;  %s60_s4 = int_to_ptr.vmem [resolvable:$true] %s59_s4 }
  0x1c   :  { %s4615_s25 = scalar_lea.vmem %s34_s23, 8192  ;;  %p4620_p11 = scmp.lt.s32.totalorder %s34_s23, %s34_s23 }
  0x1d   :  { %p4616_p10 = scmp.ne.s32.totalorder %s34_s23, %s4615_s25  ;;  %p4621_p12 = scmp.lt.s32.totalorder %s4615_s25, %s4615_s25 }
  0x1f   :  { %p4622_p13 = por %p4621_p12, %p4620_p11 }
  0x21   :  { %p4623_p0 = pnand %p4622_p13, %p4616_p10 }
  0x23   :  { %4626 = shalt.err (!%p4623_p0)
}
  0x24   :  { %39 = dma.hbm_to_vmem [thread:$0]  %s6924_s2, 8192, %s34_s23, [#allocation5], %s4739_s30, %s4739_s30, %s4740_s14  }
  0x25   :  { %s4635_s7 = scalar_lea.vmem %s60_s4, 8192  ;;  %p4640_p2 = scmp.lt.s32.totalorder %s60_s4, %s60_s4 }
  0x26   :  { %p4636_p1 = scmp.ne.s32.totalorder %s60_s4, %s4635_s7  ;;  %p4641_p3 = scmp.lt.s32.totalorder %s4635_s7, %s4635_s7 }
  0x28   :  { %p4642_p4 = por %p4641_p3, %p4640_p2 }
  0x2a   :  { %p4643_p5 = pnand %p4642_p4, %p4636_p1 }
  0x2c   :  { %4646 = shalt.err (!%p4643_p5)
}
  0x2d   :  { %65 = dma.hbm_to_vmem [thread:$0]  %s6927_s5, 8192, %s60_s4, [#allocation8], %s4739_s30, %s4739_s30, %s4740_s14  }
  0x2e   :  { %s4745_s15 = smov [#allocation12]  }
  0x2f   :  { %s87_s16 = sshll.u32 %s4745_s15, 4  ;;  %s88_s16 = int_to_ptr.vmem [resolvable:$true] %s87_s16 }
  0x30   :  { %s4655_s17 = scalar_lea.vmem %s88_s16, 2048  ;;  %p4660_p7 = scmp.lt.s32.totalorder %s88_s16, %s88_s16 }
  0x31   :  { %p4656_p6 = scmp.ne.s32.totalorder %s88_s16, %s4655_s17  ;;  %p4661_p8 = scmp.lt.s32.totalorder %s4655_s17, %s4655_s17 }
  0x33   :  { %p4662_p9 = por %p4661_p8, %p4660_p7 }
  0x35   :  { %p4663_p10 = pnand %p4662_p9, %p4656_p6 }
  0x37   :  { %4666 = shalt.err (!%p4663_p10)
}
  0x38   :  { %93 = dma.hbm_to_vmem [thread:$0]  %s6931_s9, 2048, %s88_s16, [#allocation11], %s4741_s18, %s4741_s18, %s4742_s19  }
  0x39   :  { %4727 = dma.done.wait [#allocation5], 8192  }
  0x3a   :  { %4728 = vsyncadd [#allocation5], 4294959104 }
  0x3b   :  { %4729 = dma.done.wait [#allocation8], 16384  }
  0x3c   :  { %4730 = vsyncadd [#allocation8], 4294950912 }
  0x3d   :  { %4731 = dma.done.wait [#allocation11], 4096  }
  0x3e   :  { %4732 = vsyncadd [#allocation11], 4294963200  ;;  %v6936_v0 = vmov 0.0   ;;  %v119_v1 = vld [vmem:[%s6923_s1] sm:$0xff]  ;;  %vm172_vm0 = vcmask 1043456   ;;  %v120_v2 = vld [vmem:[%s6923_s1 + $0x8] sm:$0xff] }
  0x3f   :  { %245 = vmatprep.mubr.f32.mxu0 %v6936_v0  ;;  %358 = vmatprep.mubr.f32.mxu1 %v6936_v0  ;;  %v145_v3 = vcombine.high %v119_v1, %v119_v1  ;;  %v146_v4 = vcombine.high %v120_v2, %v120_v2  ;;  %v111_v5 = vld [vmem:[%s6922_s0] sm:$0xff]  ;;  %vm147_vm1 = vcmask 31744   ;;  %v4862_v6 = vld [vmem:[#allocation4 + $0x1e8] sm:$0xff]  ;;  %v4864_v7 = vld [vmem:[#allocation4 + $0x1f8] sm:$0xff]  ;;  %vm4747_vm2 = vmmov 0   ;;  %s4748_s14 = smov [#allocation14]  }
  0x40   :  { %7142 = vst [vmem:[#allocation22_spill] sm:$0xff] %v4862_v6  ;;  %7143 = vst [vmem:[#allocation23_spill] sm:$0xff] %v4864_v7  ;;  %v4866_v8 = vld [vmem:[#allocation4 + $0x1e0] sm:$0xff]  ;;  %v4868_v9 = vld [vmem:[#allocation4 + $0x1f0] sm:$0xff]  ;;  %s3953_s21 = sshll.u32 %s4748_s14, 4  ;;  %s3954_s21 = int_to_ptr.vmem [resolvable:$true] %s3953_s21 }
  0x41   :  { %3993 = vmatprep.subr.msk.mxu0 %vm172_vm0, %v145_v3  ;;  %4003 = vmatprep.subr.msk.mxu1 %vm172_vm0, %v146_v4  ;;  %v4872_v10 = vld [vmem:[#allocation4 + $0x1c8] sm:$0xff]  ;;  %v4874_v11 = vld [vmem:[#allocation4 + $0x1d8] sm:$0xff]  ;;  %v4880_v12 = vld [vmem:[#allocation4 + $0x1c0] sm:$0xff]  ;;  %s4667_s9 = scalar_lea.vmem %s3954_s21, 256  ;;  %p4672_p12 = scmp.lt.s32.totalorder %s3954_s21, %s3954_s21 }
  0x42   :  { %3994 = vmatpush1.msk.msra.mxu0 %vm172_vm0, %v119_v1  ;;  %4004 = vmatpush1.msk.msra.mxu1 %vm172_vm0, %v120_v2  ;;  %v4882_v13 = vld [vmem:[#allocation4 + $0x1d0] sm:$0xff]  ;;  %v112_v14 = vld [vmem:[%s6922_s0 + $0x8] sm:$0xff]  ;;  %v4893_v16 = vld [vmem:[#allocation4 + $0x1b8] sm:$0xff]  ;;  %p4668_p11 = scmp.ne.s32.totalorder %s3954_s21, %s4667_s9  ;;  %p4673_p13 = scmp.lt.s32.totalorder %s4667_s9, %s4667_s9 }
  0x43   :  { %3995 = vmatmul.mubr.msk.f32.vlgmr.msra.gmra.mxu0 %vm147_vm1, %v111_v5  ;;  %4005 = vmatmul.mubr.msk.f32.vlgmr.msra.gmra.mxu1 %vm147_vm1, %v111_v5  ;;  %v4891_v15 = vld [vmem:[#allocation4 + $0x1a8] sm:$0xff]  ;;  %v4897_v17 = vld [vmem:[#allocation4 + $0x1a0] sm:$0xff]  ;;  %v4899_v18 = vld [vmem:[#allocation4 + $0x1b0] sm:$0xff] }
  0x44   :  { %510 = vmatprep.subr.mxu0 %v4862_v6  ;;  %581 = vmatprep.subr.mxu1 %v4864_v7  ;;  %v4903_v19 = vld [vmem:[#allocation4 + $0x188] sm:$0xff]  ;;  %v4905_v20 = vld [vmem:[#allocation4 + $0x198] sm:$0xff]  ;;  %v4911_v21 = vld [vmem:[#allocation4 + $0x180] sm:$0xff]  ;;  %p4674_p0 = por %p4673_p13, %p4672_p12 }
  0x45   :  { %511 = vmatpush1.msra.mxu0 %v4866_v8  ;;  %582 = vmatpush1.msra.mxu1 %v4868_v9  ;;  %v4913_v22 = vld [vmem:[#allocation4 + $0x190] sm:$0xff]  ;;  %v4922_v24 = vld [vmem:[#allocation4 + $0x168] sm:$0xff]  ;;  %v4924_v25 = vld [vmem:[#allocation4 + $0x178] sm:$0xff] }
  0x46   :  { %512 = vmatprep.subr.mxu0 %v4872_v10  ;;  %583 = vmatprep.subr.mxu1 %v4874_v11  ;;  %v113_v23 = vld [vmem:[%s6922_s0 + $0x10] sm:$0xff]  ;;  %v4928_v26 = vld [vmem:[#allocation4 + $0x160] sm:$0xff]  ;;  %v4934_v28 = vld [vmem:[#allocation4 + $0x148] sm:$0xff]  ;;  %p4675_p1 = pnand %p4674_p0, %p4668_p11 }
  0x47   :  { %251 = vmatprep.mubr.f32.mxu0 %v6936_v0  ;;  %364 = vmatprep.mubr.f32.mxu1 %v6936_v0  ;;  %v4930_v27 = vld [vmem:[#allocation4 + $0x170] sm:$0xff]  ;;  %v4936_v29 = vld [vmem:[#allocation4 + $0x158] sm:$0xff]  ;;  %v4942_v30 = vld [vmem:[#allocation4 + $0x140] sm:$0xff] }
  0x48   :  { %513 = vmatpush1.msra.mxu0 %v4880_v12  ;;  %584 = vmatpush1.msra.mxu1 %v4882_v13  ;;  %v4944_v31 = vld [vmem:[#allocation4 + $0x150] sm:$0xff]  ;;  %v114_v32 = vld [vmem:[%s6922_s0 + $0x18] sm:$0xff]  ;;  %v4953_v33 = vld [vmem:[#allocation4 + $0x128] sm:$0xff] }
  0x49   :  { %3996 = vmatmul.mubr.msk.f32.gmra.mxu0 %vm147_vm1, %v112_v14  ;;  %4006 = vmatmul.mubr.msk.f32.gmra.mxu1 %vm147_vm1, %v112_v14  ;;  %v4955_v34 = vld [vmem:[#allocation4 + $0x138] sm:$0xff]  ;;  %v4959_v35 = vld [vmem:[#allocation4 + $0x120] sm:$0xff]  ;;  %v4961_v36 = vld [vmem:[#allocation4 + $0x130] sm:$0xff] }
  0x4a   :  { %514 = vmatprep.subr.mxu0 %v4891_v15  ;;  %585 = vmatprep.subr.mxu1 %v4893_v16  ;;  %v4965_v37 = vld [vmem:[#allocation4 + $0x108] sm:$0xff]  ;;  %v4967_v38 = vld [vmem:[#allocation4 + $0x118] sm:$0xff]  ;;  %v4973_v39 = vld [vmem:[#allocation4 + $0x100] sm:$0xff] }
  0x4b   :  { %515 = vmatpush1.msra.mxu0 %v4897_v17  ;;  %586 = vmatpush1.msra.mxu1 %v4899_v18  ;;  %v4975_v40 = vld [vmem:[#allocation4 + $0x110] sm:$0xff]  ;;  %v115_v41 = vld [vmem:[%s6922_s0 + $0x20] sm:$0xff]  ;;  %v4984_v42 = vld [vmem:[#allocation4 + $0xe8] sm:$0xff] }
  0x4c   :  { %516 = vmatprep.subr.mxu0 %v4903_v19  ;;  %587 = vmatprep.subr.mxu1 %v4905_v20  ;;  %v4986_v43 = vld [vmem:[#allocation4 + $0xf8] sm:$0xff]  ;;  %v4990_v44 = vld [vmem:[#allocation4 + $0xe0] sm:$0xff]  ;;  %v4992_v45 = vld [vmem:[#allocation4 + $0xf0] sm:$0xff] }
  0x4d   :  { %257 = vmatprep.mubr.f32.mxu0 %v6936_v0  ;;  %370 = vmatprep.mubr.f32.mxu1 %v6936_v0  ;;  %v4996_v46 = vld [vmem:[#allocation4 + $0xc8] sm:$0xff]  ;;  %v4998_v47 = vld [vmem:[#allocation4 + $0xd8] sm:$0xff]  ;;  %v5004_v48 = vld [vmem:[#allocation4 + $0xc0] sm:$0xff] }
  0x4e   :  { %517 = vmatpush1.msra.mxu0 %v4911_v21  ;;  %588 = vmatpush1.msra.mxu1 %v4913_v22  ;;  %v5006_v49 = vld [vmem:[#allocation4 + $0xd0] sm:$0xff]  ;;  %v116_v50 = vld [vmem:[%s6922_s0 + $0x28] sm:$0xff]  ;;  %v5017_v52 = vld [vmem:[#allocation4 + $0xb8] sm:$0xff] }
  0x4f   :  { %3997 = vmatmul.mubr.msk.f32.gmra.mxu0 %vm147_vm1, %v113_v23  ;;  %4007 = vmatmul.mubr.msk.f32.gmra.mxu1 %vm147_vm1, %v113_v23  ;;  %v5015_v51 = vld [vmem:[#allocation4 + $0xa8] sm:$0xff]  ;;  %v5021_v53 = vld [vmem:[#allocation4 + $0xa0] sm:$0xff]  ;;  %v5023_v54 = vld [vmem:[#allocation4 + $0xb0] sm:$0xff] }
  0x50   :  { %518 = vmatprep.subr.mxu0 %v4922_v24  ;;  %589 = vmatprep.subr.mxu1 %v4924_v25  ;;  %7144 = vst [vmem:[#allocation24_spill] sm:$0xff] %v5023_v54  ;;  %v5027_v55 = vld [vmem:[#allocation4 + $0x88] sm:$0xff]  ;;  %v5029_v56 = vld [vmem:[#allocation4 + $0x98] sm:$0xff]  ;;  %v5035_v57 = vld [vmem:[#allocation4 + $0x80] sm:$0xff] }
  0x51   :  { %519 = vmatpush1.msra.mxu0 %v4928_v26  ;;  %590 = vmatpush1.msra.mxu1 %v4930_v27  ;;  %7145 = vst [vmem:[#allocation25_spill] sm:$0xff] %v5027_v55  ;;  %7146 = vst [vmem:[#allocation26_spill] sm:$0xff] %v5029_v56  ;;  %v5037_v58 = vld [vmem:[#allocation4 + $0x90] sm:$0xff]  ;;  %v5046_v60 = vld [vmem:[#allocation4 + $0x68] sm:$0xff] }
  0x52   :  { %520 = vmatprep.subr.mxu0 %v4934_v28  ;;  %591 = vmatprep.subr.mxu1 %v4936_v29  ;;  %7147 = vst [vmem:[#allocation27_spill] sm:$0xff] %v5035_v57  ;;  %7148 = vst [vmem:[#allocation28_spill] sm:$0xff] %v5037_v58  ;;  %v117_v59 = vld [vmem:[%s6922_s0 + $0x30] sm:$0xff]  ;;  %v5048_v61 = vld [vmem:[#allocation4 + $0x78] sm:$0xff] }
  0x53   :  { %263 = vmatprep.mubr.f32.mxu0 %v6936_v0  ;;  %376 = vmatprep.mubr.f32.mxu1 %v6936_v0  ;;  %7149 = vst [vmem:[#allocation29_spill] sm:$0xff] %v5046_v60  ;;  %7150 = vst [vmem:[#allocation30_spill] sm:$0xff] %v5048_v61  ;;  %v5052_v62 = vld [vmem:[#allocation4 + $0x60] sm:$0xff]  ;;  %v5054_v63 = vld [vmem:[#allocation4 + $0x70] sm:$0xff] }
  0x54   :  { %521 = vmatpush1.msra.mxu0 %v4942_v30  ;;  %592 = vmatpush1.msra.mxu1 %v4944_v31  ;;  %7151 = vst [vmem:[#allocation31_spill] sm:$0xff] %v5052_v62  ;;  %7152 = vst [vmem:[#allocation32_spill] sm:$0xff] %v5054_v63  ;;  %v5058_v1 = vld [vmem:[#allocation4 + $0x48] sm:$0xff]  ;;  %v5060_v2 = vld [vmem:[#allocation4 + $0x58] sm:$0xff] }
  0x55   :  { %3998 = vmatmul.mubr.msk.f32.gmra.mxu0 %vm147_vm1, %v114_v32  ;;  %4008 = vmatmul.mubr.msk.f32.gmra.mxu1 %vm147_vm1, %v114_v32  ;;  %7153 = vst [vmem:[#allocation33_spill] sm:$0xff] %v5058_v1  ;;  %7154 = vst [vmem:[#allocation34_spill] sm:$0xff] %v5060_v2  ;;  %v5066_v3 = vld [vmem:[#allocation4 + $0x40] sm:$0xff]  ;;  %v5068_v4 = vld [vmem:[#allocation4 + $0x50] sm:$0xff] }
  0x56   :  { %522 = vmatprep.subr.mxu0 %v4953_v33  ;;  %593 = vmatprep.subr.mxu1 %v4955_v34  ;;  %7155 = vst [vmem:[#allocation35_spill] sm:$0xff] %v5066_v3  ;;  %7156 = vst [vmem:[#allocation36_spill] sm:$0xff] %v5068_v4  ;;  %v118_v5 = vld [vmem:[%s6922_s0 + $0x38] sm:$0xff]  ;;  %v5077_v14 = vld [vmem:[#allocation4 + $0x28] sm:$0xff] }
  0x57   :  { %523 = vmatpush1.msra.mxu0 %v4959_v35  ;;  %594 = vmatpush1.msra.mxu1 %v4961_v36  ;;  %7157 = vst [vmem:[#allocation37_spill] sm:$0xff] %v5077_v14  ;;  %v5079_v23 = vld [vmem:[#allocation4 + $0x38] sm:$0xff]  ;;  %v5083_v32 = vld [vmem:[#allocation4 + $0x20] sm:$0xff] }
  0x58   :  { %524 = vmatprep.subr.mxu0 %v4965_v37  ;;  %595 = vmatprep.subr.mxu1 %v4967_v38  ;;  %7158 = vst [vmem:[#allocation38_spill] sm:$0xff] %v5079_v23  ;;  %7159 = vst [vmem:[#allocation39_spill] sm:$0xff] %v5083_v32 }
  0x59   :  { %269 = vmatprep.mubr.f32.mxu0 %v6936_v0  ;;  %382 = vmatprep.mubr.f32.mxu1 %v6936_v0 }
  0x5a   :  { %525 = vmatpush1.msra.mxu0 %v4973_v39  ;;  %596 = vmatpush1.msra.mxu1 %v4975_v40 }
  0x5b   :  { %3999 = vmatmul.mubr.msk.f32.gmra.mxu0 %vm147_vm1, %v115_v41  ;;  %4009 = vmatmul.mubr.msk.f32.gmra.mxu1 %vm147_vm1, %v115_v41  ;;  %v5085_v41 = vld [vmem:[#allocation4 + $0x30] sm:$0xff] }
  0x5c   :  { %526 = vmatprep.subr.mxu0 %v4984_v42  ;;  %597 = vmatprep.subr.mxu1 %v4986_v43  ;;  %7160 = vst [vmem:[#allocation40_spill] sm:$0xff] %v5085_v41 }
  0x5d   :  { %527 = vmatpush1.msra.mxu0 %v4990_v44  ;;  %598 = vmatpush1.msra.mxu1 %v4992_v45 }
  0x5e   :  { %528 = vmatprep.subr.mxu0 %v4996_v46  ;;  %599 = vmatprep.subr.mxu1 %v4998_v47 }
  0x5f   :  { %275 = vmatprep.mubr.f32.mxu0 %v6936_v0  ;;  %388 = vmatprep.mubr.f32.mxu1 %v6936_v0 }
  0x60   :  { %529 = vmatpush1.msra.mxu0 %v5004_v48  ;;  %600 = vmatpush1.msra.mxu1 %v5006_v49 }
  0x61   :  { %4000 = vmatmul.mubr.msk.f32.gmra.mxu0 %vm147_vm1, %v116_v50  ;;  %4010 = vmatmul.mubr.msk.f32.gmra.mxu1 %vm147_vm1, %v116_v50  ;;  %v5089_v50 = vld [vmem:[#allocation4 + $0x8] sm:$0xff] }
  0x62   :  { %530 = vmatprep.subr.mxu0 %v5015_v51  ;;  %601 = vmatprep.subr.mxu1 %v5017_v52  ;;  %7161 = vst [vmem:[#allocation41_spill] sm:$0xff] %v5089_v50 }
  0x63   :  { %531 = vmatpush1.msra.mxu0 %v5021_v53  ;;  %602 = vmatpush1.msra.mxu1 %v5023_v54 }
  0x64   :  { %532 = vmatprep.subr.mxu0 %v5027_v55  ;;  %603 = vmatprep.subr.mxu1 %v5029_v56 }
  0x65   :  { %281 = vmatprep.mubr.f32.mxu0 %v6936_v0  ;;  %394 = vmatprep.mubr.f32.mxu1 %v6936_v0 }
  0x66   :  { %533 = vmatpush1.msra.mxu0 %v5035_v57  ;;  %604 = vmatpush1.msra.mxu1 %v5037_v58 }
  0x67   :  { %4001 = vmatmul.mubr.msk.f32.gmra.mxu0 %vm147_vm1, %v117_v59  ;;  %4011 = vmatmul.mubr.msk.f32.gmra.mxu1 %vm147_vm1, %v117_v59  ;;  %v5091_v59 = vld [vmem:[#allocation4 + $0x18] sm:$0xff] }
  0x68   :  { %534 = vmatprep.subr.mxu0 %v5046_v60  ;;  %605 = vmatprep.subr.mxu1 %v5048_v61  ;;  %7162 = vst [vmem:[#allocation42_spill] sm:$0xff] %v5091_v59 }
  0x69   :  { %535 = vmatpush1.msra.mxu0 %v5052_v62  ;;  %606 = vmatpush1.msra.mxu1 %v5054_v63 }
  0x6a   :  { %536 = vmatprep.subr.mxu0 %v5058_v1  ;;  %607 = vmatprep.subr.mxu1 %v5060_v2 }
  0x6b   :  { %287 = vmatprep.mubr.f32.mxu0 %v6936_v0  ;;  %400 = vmatprep.mubr.f32.mxu1 %v6936_v0  ;;  %v5095_v0 = vld [vmem:[#allocation4] sm:$0xff] }
  0x6c   :  { %537 = vmatpush1.msra.mxu0 %v5066_v3  ;;  %608 = vmatpush1.msra.mxu1 %v5068_v4  ;;  %7163 = vst [vmem:[#allocation43_spill] sm:$0xff] %v5095_v0  ;;  %v5099_v4 = vld [vmem:[#allocation4 + $0x10] sm:$0xff] }
  0x6d   :  { %4002 = vmatmul.mubr.msk.f32.gmra.mxu0 %vm147_vm1, %v118_v5  ;;  %4012 = vmatmul.mubr.msk.f32.gmra.mxu1 %vm147_vm1, %v118_v5  ;;  %7164 = vst [vmem:[#allocation44_spill] sm:$0xff] %v5099_v4  ;;  %v7165_v5 = vmov 0.0  }
  0x6e   :  { %538 = vmatprep.subr.mxu0 %v5077_v14  ;;  %609 = vmatprep.subr.mxu1 %v5079_v23 }
  0x6f   :  { %539 = vmatpush1.msra.mxu0 %v5083_v32  ;;  %610 = vmatpush1.msra.mxu1 %v5085_v41 }
  0x70   :  { %540 = vmatprep.subr.mxu0 %v5089_v50  ;;  %611 = vmatprep.subr.mxu1 %v5091_v59 }
  0x71   :  { %541 = vmatpush1.msra.mxu0 %v5095_v0  ;;  %574 = vmatprep.mubr.f32.mxu0 %v7165_v5 }
  0x72   :  { %612 = vmatpush1.msra.mxu1 %v5099_v4  ;;  %645 = vmatprep.mubr.f32.mxu1 %v7165_v5 }
  0x73   :  { %575 = vmatmul.mubr.f32.vlgmr.msra.gmra.mxu0 %v7165_v5  ;;  %646 = vmatmul.mubr.f32.vlgmr.msra.gmra.mxu1 %v7165_v5 }
  0x74   :  { %688 = vmatprep.subr.mxu0 %v4862_v6  ;;  %759 = vmatprep.subr.mxu1 %v4864_v7 }
  0x75   :  { %689 = vmatpush1.msra.mxu0 %v4866_v8  ;;  %760 = vmatpush1.msra.mxu1 %v4868_v9 }
  0x76   :  { %690 = vmatprep.subr.mxu0 %v4872_v10  ;;  %761 = vmatprep.subr.mxu1 %v4874_v11 }
  0x77   :  { %691 = vmatpush1.msra.mxu0 %v4880_v12  ;;  %762 = vmatpush1.msra.mxu1 %v4882_v13 }
  0x78   :  { %692 = vmatprep.subr.mxu0 %v4891_v15  ;;  %763 = vmatprep.subr.mxu1 %v4893_v16 }
  0x79   :  { %693 = vmatpush1.msra.mxu0 %v4897_v17  ;;  %764 = vmatpush1.msra.mxu1 %v4899_v18 }
  0x7a   :  { %694 = vmatprep.subr.mxu0 %v4903_v19  ;;  %765 = vmatprep.subr.mxu1 %v4905_v20 }
  0x7b   :  { %695 = vmatpush1.msra.mxu0 %v4911_v21  ;;  %766 = vmatpush1.msra.mxu1 %v4913_v22 }
  0x7c   :  { %696 = vmatprep.subr.mxu0 %v4922_v24  ;;  %767 = vmatprep.subr.mxu1 %v4924_v25 }
  0x7d   :  { %697 = vmatpush1.msra.mxu0 %v4928_v26  ;;  %768 = vmatpush1.msra.mxu1 %v4930_v27 }
  0x7e   :  { %698 = vmatprep.subr.mxu0 %v4934_v28  ;;  %769 = vmatprep.subr.mxu1 %v4936_v29 }
  0x7f   :  { %699 = vmatpush1.msra.mxu0 %v4942_v30  ;;  %770 = vmatpush1.msra.mxu1 %v4944_v31 }
  0x80   :  { %700 = vmatprep.subr.mxu0 %v4953_v33  ;;  %771 = vmatprep.subr.mxu1 %v4955_v34 }
  0x81   :  { %701 = vmatpush1.msra.mxu0 %v4959_v35  ;;  %772 = vmatpush1.msra.mxu1 %v4961_v36 }
  0x82   :  { %702 = vmatprep.subr.mxu0 %v4965_v37  ;;  %773 = vmatprep.subr.mxu1 %v4967_v38 }
  0x83   :  { %703 = vmatpush1.msra.mxu0 %v4973_v39  ;;  %774 = vmatpush1.msra.mxu1 %v4975_v40 }
  0x84   :  { %704 = vmatprep.subr.mxu0 %v4984_v42  ;;  %775 = vmatprep.subr.mxu1 %v4986_v43 }
  0x85   :  { %705 = vmatpush1.msra.mxu0 %v4990_v44  ;;  %776 = vmatpush1.msra.mxu1 %v4992_v45 }
  0x86   :  { %706 = vmatprep.subr.mxu0 %v4996_v46  ;;  %777 = vmatprep.subr.mxu1 %v4998_v47 }
  0x87   :  { %707 = vmatpush1.msra.mxu0 %v5004_v48  ;;  %778 = vmatpush1.msra.mxu1 %v5006_v49 }
  0x88   :  { %708 = vmatprep.subr.mxu0 %v5015_v51  ;;  %779 = vmatprep.subr.mxu1 %v5017_v52 }
  0x89   :  { %709 = vmatpush1.msra.mxu0 %v5021_v53  ;;  %780 = vmatpush1.msra.mxu1 %v5023_v54 }
  0x8a   :  { %710 = vmatprep.subr.mxu0 %v5027_v55  ;;  %781 = vmatprep.subr.mxu1 %v5029_v56  ;;  %v7166_v55 = vld [vmem:[#allocation36_spill] sm:$0xff] }
  0x8b   :  { %711 = vmatpush1.msra.mxu0 %v5035_v57  ;;  %782 = vmatpush1.msra.mxu1 %v5037_v58 }
  0x8c   :  { %712 = vmatprep.subr.mxu0 %v5046_v60  ;;  %783 = vmatprep.subr.mxu1 %v5048_v61 }
  0x8d   :  { %713 = vmatpush1.msra.mxu0 %v5052_v62  ;;  %784 = vmatpush1.msra.mxu1 %v5054_v63 }
  0x8e   :  { %714 = vmatprep.subr.mxu0 %v5058_v1  ;;  %785 = vmatprep.subr.mxu1 %v5060_v2 }
  0x8f   :  { %715 = vmatpush1.msra.mxu0 %v5066_v3  ;;  %786 = vmatpush1.msra.mxu1 %v7166_v55 }
  0x90   :  { %716 = vmatprep.subr.mxu0 %v5077_v14  ;;  %787 = vmatprep.subr.mxu1 %v5079_v23  ;;  %v123_v23 = vlaneseq }
  0x91   :  { %717 = vmatpush1.msra.mxu0 %v5083_v32  ;;  %788 = vmatpush1.msra.mxu1 %v5085_v41 }
  0x92   :  { %718 = vmatprep.subr.mxu0 %v5089_v50  ;;  %789 = vmatprep.subr.mxu1 %v5091_v59  ;;  %v5177_v32 = vshrl.u32 %v123_v23, 7 }
  0x93   :  { %719 = vmatpush1.msra.mxu0 %v5095_v0  ;;  %752 = vmatprep.mubr.f32.mxu0 %v7165_v5 }
  0x94   :  { %790 = vmatpush1.msra.mxu1 %v5099_v4  ;;  %823 = vmatprep.mubr.f32.mxu1 %v7165_v5  ;;  %7167 = vst [vmem:[#allocation45_spill] sm:$0xff] %v5177_v32  ;;  %v6975_v59 = vsub.s32 0, %v5177_v32  ;;  %v6978_v0 = vsub.s32 2, %v5177_v32  ;;  %v121_v4 = vld [vmem:[%s6925_s3] sm:$0xf]  ;;  %v6986_v23 = vsub.s32 3, %v5177_v32 }
  0x95   :  { %867 = vmatprep.subr.mxu0 %v4862_v6  ;;  %938 = vmatprep.subr.mxu1 %v4864_v7  ;;  %v6985_v7 = vsub.s32 1, %v5177_v32 }
  0x96   :  { %v126_v14 = vrot.slane %v121_v4, %v6975_v59  ;;  %v5198_v55 = vrot.slane %v121_v4, %v6978_v0  ;;  %v5204_v63 = vrot.slane %v121_v4, %v6986_v23 }
  0x97   :  { %v130_v1 = vrot.slane %v121_v4, %v6985_v7 }
 0x103   :  { %v5179_v41 = vpop.f32.mrf.mxu0  ;;  %v5181_v50 = vpop.f32.mrf.mxu1 }
 0x105   :  { %v5188_v5 = vpop.f32.mrf.mxu0  ;;  %v5190_v6 = vpop.f32.mrf.mxu1 }
 0x109   :  { %v253_v3 = vpop.f32.mrf.mxu0  ;;  %v366_v2 = vpop.f32.mrf.mxu1 }
 0x10a   :  { %v5206_v62 = vadd.f32 %v253_v3, %v126_v14  ;;  %v5209_v61 = vadd.f32 %v366_v2, %v5198_v55 }
 0x10b   :  { %v255_v60 = vpop.f32.mrf.mxu0  ;;  %v368_v59 = vpop.f32.mrf.mxu1 }
 0x10c   :  { %7168 = vst [vmem:[#allocation46_spill] sm:$0xff] %v5209_v61  ;;  %v5211_v58 = vadd.f32 %v255_v60, %v130_v1  ;;  %v5214_v0 = vadd.f32 %v368_v59, %v5204_v63 }
 0x10e   :  { %7169 = vst [vmem:[#allocation47_spill] sm:$0xff] %v5211_v58  ;;  %7170 = vst [vmem:[#allocation48_spill] sm:$0xff] %v5214_v0 }
 0x10f   :  { %v259_v57 = vpop.f32.mrf.mxu0  ;;  %v372_v56 = vpop.f32.mrf.mxu1 }
 0x110   :  { %v5216_v54 = vadd.f32 %v259_v57, %v126_v14  ;;  %v5219_v7 = vadd.f32 %v372_v56, %v5198_v55 }
 0x111   :  { %v261_v4 = vpop.f32.mrf.mxu0  ;;  %v374_v3 = vpop.f32.mrf.mxu1 }
 0x112   :  { %7171 = vst [vmem:[#allocation49_spill] sm:$0xff] %v5216_v54  ;;  %7172 = vst [vmem:[#allocation50_spill] sm:$0xff] %v5219_v7  ;;  %v5221_v23 = vadd.f32 %v261_v4, %v130_v1  ;;  %v5224_v2 = vadd.f32 %v374_v3, %v5204_v63 }
 0x114   :  { %7173 = vst [vmem:[#allocation51_spill] sm:$0xff] %v5221_v23  ;;  %7174 = vst [vmem:[#allocation52_spill] sm:$0xff] %v5224_v2 }
 0x115   :  { %v265_v32 = vpop.f32.mrf.mxu0  ;;  %v378_v60 = vpop.f32.mrf.mxu1 }
 0x116   :  { %v5226_v61 = vadd.f32 %v265_v32, %v126_v14  ;;  %v5229_v59 = vadd.f32 %v378_v60, %v5198_v55 }
 0x117   :  { %v267_v0 = vpop.f32.mrf.mxu0  ;;  %v380_v57 = vpop.f32.mrf.mxu1 }
 0x118   :  { %7175 = vst [vmem:[#allocation53_spill] sm:$0xff] %v5226_v61  ;;  %7176 = vst [vmem:[#allocation54_spill] sm:$0xff] %v5229_v59  ;;  %v5231_v54 = vadd.f32 %v267_v0, %v130_v1  ;;  %v5234_v56 = vadd.f32 %v380_v57, %v5204_v63 }
 0x11a   :  { %7177 = vst [vmem:[#allocation55_spill] sm:$0xff] %v5231_v54  ;;  %7178 = vst [vmem:[#allocation56_spill] sm:$0xff] %v5234_v56 }
 0x11b   :  { %v271_v7 = vpop.f32.mrf.mxu0  ;;  %v384_v4 = vpop.f32.mrf.mxu1 }
 0x11c   :  { %v5236_v23 = vadd.f32 %v271_v7, %v126_v14  ;;  %v5239_v3 = vadd.f32 %v384_v4, %v5198_v55 }
 0x11d   :  { %v273_v2 = vpop.f32.mrf.mxu0  ;;  %v386_v32 = vpop.f32.mrf.mxu1 }
 0x11e   :  { %7179 = vst [vmem:[#allocation57_spill] sm:$0xff] %v5236_v23  ;;  %7180 = vst [vmem:[#allocation58_spill] sm:$0xff] %v5239_v3  ;;  %v5241_v61 = vadd.f32 %v273_v2, %v130_v1  ;;  %v5244_v60 = vadd.f32 %v386_v32, %v5204_v63 }
 0x120   :  { %7181 = vst [vmem:[#allocation59_spill] sm:$0xff] %v5241_v61  ;;  %7182 = vst [vmem:[#allocation60_spill] sm:$0xff] %v5244_v60 }
 0x121   :  { %v277_v59 = vpop.f32.mrf.mxu0  ;;  %v390_v0 = vpop.f32.mrf.mxu1 }
 0x122   :  { %v5246_v54 = vadd.f32 %v277_v59, %v126_v14  ;;  %v5249_v57 = vadd.f32 %v390_v0, %v5198_v55 }
 0x123   :  { %v279_v56 = vpop.f32.mrf.mxu0  ;;  %v392_v7 = vpop.f32.mrf.mxu1 }
 0x124   :  { %7183 = vst [vmem:[#allocation61_spill] sm:$0xff] %v5246_v54  ;;  %7184 = vst [vmem:[#allocation62_spill] sm:$0xff] %v5249_v57  ;;  %v5251_v23 = vadd.f32 %v279_v56, %v130_v1  ;;  %v5254_v4 = vadd.f32 %v392_v7, %v5204_v63 }
 0x126   :  { %7185 = vst [vmem:[#allocation63_spill] sm:$0xff] %v5251_v23  ;;  %7186 = vst [vmem:[#allocation64_spill] sm:$0xff] %v5254_v4 }
 0x127   :  { %v283_v3 = vpop.f32.mrf.mxu0  ;;  %v396_v2 = vpop.f32.mrf.mxu1 }
 0x128   :  { %v5256_v61 = vadd.f32 %v283_v3, %v126_v14  ;;  %v5259_v32 = vadd.f32 %v396_v2, %v5198_v55 }
 0x129   :  { %v285_v60 = vpop.f32.mrf.mxu0  ;;  %v398_v59 = vpop.f32.mrf.mxu1 }
 0x12a   :  { %7187 = vst [vmem:[#allocation65_spill] sm:$0xff] %v5256_v61  ;;  %7188 = vst [vmem:[#allocation66_spill] sm:$0xff] %v5259_v32  ;;  %v5261_v54 = vadd.f32 %v285_v60, %v130_v1  ;;  %v5264_v0 = vadd.f32 %v398_v59, %v5204_v63  ;;  %v248_v60 = vadd.f32 %v5179_v41, %v126_v14 }
 0x12b   :  { %v250_v59 = vadd.f32 %v5188_v5, %v130_v1 }
 0x12c   :  { %7189 = vst [vmem:[#allocation67_spill] sm:$0xff] %v5261_v54  ;;  %7190 = vst [vmem:[#allocation68_spill] sm:$0xff] %v5264_v0 }
 0x12d   :  { %v289_v57 = vpop.f32.mrf.mxu0  ;;  %v402_v56 = vpop.f32.mrf.mxu1 }
 0x12e   :  { %v5266_v23 = vadd.f32 %v289_v57, %v126_v14  ;;  %v5269_v7 = vadd.f32 %v402_v56, %v5198_v55 }
 0x12f   :  { %v291_v4 = vpop.f32.mrf.mxu0  ;;  %v404_v3 = vpop.f32.mrf.mxu1 }
 0x130   :  { %7191 = vst [vmem:[#allocation69_spill] sm:$0xff] %v5266_v23  ;;  %7192 = vst [vmem:[#allocation70_spill] sm:$0xff] %v5269_v7  ;;  %v5271_v61 = vadd.f32 %v291_v4, %v130_v1  ;;  %v5274_v2 = vadd.f32 %v404_v3, %v5204_v63  ;;  %v363_v4 = vadd.f32 %v5190_v6, %v5204_v63 }
 0x131   :  { %v361_v3 = vadd.f32 %v5181_v50, %v5198_v55 }
 0x132   :  { %7193 = vst [vmem:[#allocation71_spill] sm:$0xff] %v5271_v61  ;;  %7194 = vst [vmem:[#allocation72_spill] sm:$0xff] %v5274_v2 }
 0x133   :  { %v576_v32 = vpop.f32.mrf.mxu0  ;;  %v647_v23 = vpop.f32.mrf.mxu1 }
 0x134   :  { %v652_v0 = vadd.f32 %v576_v32, %v248_v60  ;;  %v654_v2 = vadd.f32 %v647_v23, %v361_v3  ;;  %v7196_v23 = vld [vmem:[#allocation24_spill] sm:$0xff]  ;;  %v7201_v3 = vld [vmem:[#allocation29_spill] sm:$0xff] }
 0x135   :  { %v578_v54 = vpop.f32.mrf.mxu0  ;;  %v649_v7 = vpop.f32.mrf.mxu1 }
 0x136   :  { %v4013_v58 = vmul.f32 -1.442695, %v652_v0  ;;  %v653_v57 = vadd.f32 %v578_v54, %v250_v59  ;;  %v655_v61 = vadd.f32 %v649_v7, %v363_v4  ;;  %v7200_v4 = vld [vmem:[#allocation28_spill] sm:$0xff] }
 0x138   :  { %4183 = vpow2.f32 %v4013_v58  ;;  %v4014_v56 = vmul.f32 -1.442695, %v653_v57  ;;  %v4015_v14 = vmul.f32 -1.442695, %v655_v61  ;;  %v7198_v57 = vld [vmem:[#allocation26_spill] sm:$0xff] }
 0x13a   :  { %4185 = vpow2.f32 %v4014_v56  ;;  %v7199_v56 = vld [vmem:[#allocation27_spill] sm:$0xff] }
 0x13b   :  { %4187 = vpow2.f32 %v4015_v14  ;;  %v7202_v14 = vld [vmem:[#allocation30_spill] sm:$0xff] }
 0x145   :  { %v4184_v41 = vpop.eup %4183 }
 0x146   :  { %v659_v1 = vadd.f32 1.0, %v4184_v41  ;;  %v7203_v41 = vld [vmem:[#allocation31_spill] sm:$0xff] }
 0x147   :  { %v4186_v5 = vpop.eup %4185 }
 0x148   :  { %4189 = vrcp.f32 %v659_v1  ;;  %v665_v54 = vadd.f32 1.0, %v4186_v5  ;;  %v4188_v58 = vpop.eup %4187  ;;  %v7204_v1 = vld [vmem:[#allocation32_spill] sm:$0xff]  ;;  %v7205_v5 = vld [vmem:[#allocation33_spill] sm:$0xff] }
 0x149   :  { %4191 = vtanh.f32 %v654_v2  ;;  %v672_v59 = vadd.f32 1.0, %v4188_v58  ;;  %v7197_v2 = vld [vmem:[#allocation25_spill] sm:$0xff]  ;;  %v7207_v58 = vld [vmem:[#allocation35_spill] sm:$0xff] }
 0x14a   :  { %4193 = vrcp.f32 %v665_v54  ;;  %v7206_v54 = vld [vmem:[#allocation34_spill] sm:$0xff] }
 0x14b   :  { %4195 = vrcp.f32 %v672_v59  ;;  %v7211_v59 = vld [vmem:[#allocation39_spill] sm:$0xff] }
 0x155   :  { %v4190_v32 = vpop.eup %4189 }
 0x156   :  { %v4192_v0 = vpop.eup %4191 }
 0x157   :  { %v4194_v60 = vpop.eup %4193  ;;  %v676_v63 = vmul.f32 %v4192_v0, %v4190_v32  ;;  %v7208_v32 = vld [vmem:[#allocation36_spill] sm:$0xff]  ;;  %v7209_v0 = vld [vmem:[#allocation37_spill] sm:$0xff] }
 0x158   :  { %v675_v6 = vmul.f32 0.0, %v4194_v60  ;;  %v4196_v55 = vpop.eup %4195  ;;  %v7210_v60 = vld [vmem:[#allocation38_spill] sm:$0xff] }
 0x15a   :  { %v5282_v7 = vadd.f32 %v676_v63, %v675_v6  ;;  %v7212_v6 = vld [vmem:[#allocation40_spill] sm:$0xff]  ;;  %v7213_v63 = vld [vmem:[#allocation41_spill] sm:$0xff] }
 0x15c   :  { %4197 = vtanh.f32 %v5282_v7 }
 0x169   :  { %v4198_v61 = vpop.eup %4197 }
 0x16a   :  { %v5285_v50 = vmul.f32 %v4198_v61, %v4196_v55  ;;  %v7214_v55 = vld [vmem:[#allocation42_spill] sm:$0xff]  ;;  %v7215_v61 = vld [vmem:[#allocation43_spill] sm:$0xff] }
 0x16c   :  { %7195 = vst [vmem:[#allocation73_spill] sm:$0xff] %v5285_v50  ;;  %753 = vmatmul.mubr.f32.vlgmr.msra.gmra.mxu0 %v5285_v50  ;;  %824 = vmatmul.mubr.f32.vlgmr.msra.gmra.mxu1 %v5285_v50  ;;  %v7216_v50 = vmov 0.0  }
 0x16d   :  { %868 = vmatpush1.msra.mxu0 %v4866_v8  ;;  %939 = vmatpush1.msra.mxu1 %v4868_v9 }
 0x16e   :  { %869 = vmatprep.subr.mxu0 %v4872_v10  ;;  %940 = vmatprep.subr.mxu1 %v4874_v11 }
 0x16f   :  { %870 = vmatpush1.msra.mxu0 %v4880_v12  ;;  %941 = vmatpush1.msra.mxu1 %v4882_v13 }
 0x170   :  { %871 = vmatprep.subr.mxu0 %v4891_v15  ;;  %942 = vmatprep.subr.mxu1 %v4893_v16 }
 0x171   :  { %872 = vmatpush1.msra.mxu0 %v4897_v17  ;;  %943 = vmatpush1.msra.mxu1 %v4899_v18 }
 0x172   :  { %873 = vmatprep.subr.mxu0 %v4903_v19  ;;  %944 = vmatprep.subr.mxu1 %v4905_v20 }
 0x173   :  { %874 = vmatpush1.msra.mxu0 %v4911_v21  ;;  %945 = vmatpush1.msra.mxu1 %v4913_v22 }
 0x174   :  { %875 = vmatprep.subr.mxu0 %v4922_v24  ;;  %946 = vmatprep.subr.mxu1 %v4924_v25 }
 0x175   :  { %876 = vmatpush1.msra.mxu0 %v4928_v26  ;;  %947 = vmatpush1.msra.mxu1 %v4930_v27 }
 0x176   :  { %877 = vmatprep.subr.mxu0 %v4934_v28  ;;  %948 = vmatprep.subr.mxu1 %v4936_v29 }
 0x177   :  { %878 = vmatpush1.msra.mxu0 %v4942_v30  ;;  %949 = vmatpush1.msra.mxu1 %v4944_v31 }
 0x178   :  { %879 = vmatprep.subr.mxu0 %v4953_v33  ;;  %950 = vmatprep.subr.mxu1 %v4955_v34 }
 0x179   :  { %880 = vmatpush1.msra.mxu0 %v4959_v35  ;;  %951 = vmatpush1.msra.mxu1 %v4961_v36 }
 0x17a   :  { %881 = vmatprep.subr.mxu0 %v4965_v37  ;;  %952 = vmatprep.subr.mxu1 %v4967_v38 }
 0x17b   :  { %882 = vmatpush1.msra.mxu0 %v4973_v39  ;;  %953 = vmatpush1.msra.mxu1 %v4975_v40 }
 0x17c   :  { %883 = vmatprep.subr.mxu0 %v4984_v42  ;;  %954 = vmatprep.subr.mxu1 %v4986_v43 }
 0x17d   :  { %884 = vmatpush1.msra.mxu0 %v4990_v44  ;;  %955 = vmatpush1.msra.mxu1 %v4992_v45 }
 0x17e   :  { %885 = vmatprep.subr.mxu0 %v4996_v46  ;;  %956 = vmatprep.subr.mxu1 %v4998_v47 }
 0x17f   :  { %886 = vmatpush1.msra.mxu0 %v5004_v48  ;;  %957 = vmatpush1.msra.mxu1 %v5006_v49 }
 0x180   :  { %887 = vmatprep.subr.mxu0 %v5015_v51  ;;  %958 = vmatprep.subr.mxu1 %v5017_v52 }
 0x181   :  { %888 = vmatpush1.msra.mxu0 %v5021_v53  ;;  %959 = vmatpush1.msra.mxu1 %v7196_v23 }
 0x182   :  { %889 = vmatprep.subr.mxu0 %v7197_v2  ;;  %960 = vmatprep.subr.mxu1 %v7198_v57 }
 0x183   :  { %890 = vmatpush1.msra.mxu0 %v7199_v56  ;;  %961 = vmatpush1.msra.mxu1 %v7200_v4 }
 0x184   :  { %891 = vmatprep.subr.mxu0 %v7201_v3  ;;  %962 = vmatprep.subr.mxu1 %v7202_v14  ;;  %v7222_v14 = vld [vmem:[#allocation46_spill] sm:$0xff] }
 0x185   :  { %892 = vmatpush1.msra.mxu0 %v7203_v41  ;;  %963 = vmatpush1.msra.mxu1 %v7204_v1  ;;  %v7221_v41 = vld [vmem:[#allocation48_spill] sm:$0xff] }
 0x186   :  { %893 = vmatprep.subr.mxu0 %v7205_v5  ;;  %964 = vmatprep.subr.mxu1 %v7206_v54  ;;  %v7217_v54 = vld [vmem:[#allocation44_spill] sm:$0xff] }
 0x187   :  { %894 = vmatpush1.msra.mxu0 %v7207_v58  ;;  %965 = vmatpush1.msra.mxu1 %v7208_v32  ;;  %v7218_v32 = vld [vmem:[#allocation22_spill] sm:$0xff] }
 0x188   :  { %895 = vmatprep.subr.mxu0 %v7209_v0  ;;  %966 = vmatprep.subr.mxu1 %v7210_v60  ;;  %v7219_v0 = vld [vmem:[#allocation23_spill] sm:$0xff] }
 0x189   :  { %896 = vmatpush1.msra.mxu0 %v7211_v59  ;;  %967 = vmatpush1.msra.mxu1 %v7212_v6 }
 0x18a   :  { %897 = vmatprep.subr.mxu0 %v7213_v63  ;;  %968 = vmatprep.subr.mxu1 %v7214_v55  ;;  %v7220_v63 = vld [vmem:[#allocation47_spill] sm:$0xff] }
 0x18b   :  { %898 = vmatpush1.msra.mxu0 %v7215_v61  ;;  %931 = vmatprep.mubr.f32.mxu0 %v7216_v50 }
 0x18c   :  { %969 = vmatpush1.msra.mxu1 %v7217_v54  ;;  %1002 = vmatprep.mubr.f32.mxu1 %v7216_v50 }
 0x18d   :  { %1046 = vmatprep.subr.mxu0 %v7218_v32  ;;  %1117 = vmatprep.subr.mxu1 %v7219_v0 }
 0x22c   :  { %v754_v60 = vpop.f32.mrf.mxu0  ;;  %v825_v55 = vpop.f32.mrf.mxu1 }
 0x22d   :  { %v830_v59 = vadd.f32 %v754_v60, %v5206_v62  ;;  %v832_v50 = vadd.f32 %v825_v55, %v7222_v14 }
 0x22e   :  { %v756_v6 = vpop.f32.mrf.mxu0  ;;  %v827_v1 = vpop.f32.mrf.mxu1 }
 0x22f   :  { %v4016_v58 = vmul.f32 -1.442695, %v830_v59  ;;  %v831_v5 = vadd.f32 %v756_v6, %v7220_v63  ;;  %v833_v54 = vadd.f32 %v827_v1, %v7221_v41 }
 0x231   :  { %4199 = vpow2.f32 %v4016_v58  ;;  %v4017_v61 = vmul.f32 -1.442695, %v831_v5  ;;  %v4018_v3 = vmul.f32 -1.442695, %v833_v54 }
 0x233   :  { %4201 = vpow2.f32 %v4017_v61 }
 0x234   :  { %4203 = vtanh.f32 %v832_v50 }
 0x235   :  { %4205 = vpow2.f32 %v4018_v3 }
 0x23e   :  { %v4200_v32 = vpop.eup %4199 }
 0x23f   :  { %v837_v4 = vadd.f32 1.0, %v4200_v32 }
 0x240   :  { %v4202_v0 = vpop.eup %4201 }
 0x241   :  { %4207 = vrcp.f32 %v837_v4  ;;  %v843_v62 = vadd.f32 1.0, %v4202_v0  ;;  %v4204_v60 = vpop.eup %4203  ;;  %v7245_v4 = vld [vmem:[#allocation51_spill] sm:$0xff]  ;;  %v7246_v0 = vld [vmem:[#allocation52_spill] sm:$0xff] }
 0x242   :  { %v4206_v59 = vpop.eup %4205 }
 0x243   :  { %4209 = vrcp.f32 %v843_v62  ;;  %v850_v63 = vadd.f32 1.0, %v4206_v59 }
 0x245   :  { %4211 = vrcp.f32 %v850_v63 }
 0x24e   :  { %v4208_v58 = vpop.eup %4207 }
 0x24f   :  { %v854_v6 = vmul.f32 %v4208_v58, %v4204_v60  ;;  %v7247_v60 = vld [vmem:[#allocation50_spill] sm:$0xff] }
 0x250   :  { %v4210_v5 = vpop.eup %4209 }
 0x251   :  { %v853_v61 = vmul.f32 %v4210_v5, %v5282_v7 }
 0x252   :  { %v4212_v14 = vpop.eup %4211 }
 0x253   :  { %v5360_v41 = vadd.f32 %v854_v6, %v853_v61 }
 0x255   :  { %4213 = vtanh.f32 %v5360_v41 }
 0x262   :  { %v4214_v50 = vpop.eup %4213 }
 0x263   :  { %v5363_v1 = vmul.f32 %v4214_v50, %v4212_v14 }
 0x265   :  { %7223 = vst [vmem:[#allocation24_spill] sm:$0xff] %v5363_v1  ;;  %932 = vmatmul.mubr.f32.vlgmr.msra.gmra.mxu0 %v5363_v1  ;;  %1003 = vmatmul.mubr.f32.vlgmr.msra.gmra.mxu1 %v5363_v1  ;;  %v5512_v1 = vld [vmem:[#allocation4 + $0x150] sm:$0xff] }
 0x266   :  { %1047 = vmatpush1.msra.mxu0 %v4866_v8  ;;  %1118 = vmatpush1.msra.mxu1 %v4868_v9  ;;  %v7224_v8 = vld [vmem:[#allocation28_spill] sm:$0xff]  ;;  %v7225_v9 = vld [vmem:[#allocation29_spill] sm:$0xff] }
 0x267   :  { %1048 = vmatprep.subr.mxu0 %v4872_v10  ;;  %1119 = vmatprep.subr.mxu1 %v4874_v11  ;;  %v7226_v10 = vld [vmem:[#allocation30_spill] sm:$0xff]  ;;  %v7227_v11 = vld [vmem:[#allocation31_spill] sm:$0xff] }
 0x268   :  { %1049 = vmatpush1.msra.mxu0 %v4880_v12  ;;  %1120 = vmatpush1.msra.mxu1 %v4882_v13  ;;  %v7228_v12 = vld [vmem:[#allocation32_spill] sm:$0xff]  ;;  %v7229_v13 = vld [vmem:[#allocation33_spill] sm:$0xff] }
 0x269   :  { %1050 = vmatprep.subr.mxu0 %v4891_v15  ;;  %1121 = vmatprep.subr.mxu1 %v4893_v16  ;;  %v7230_v15 = vld [vmem:[#allocation34_spill] sm:$0xff]  ;;  %v7231_v16 = vld [vmem:[#allocation35_spill] sm:$0xff] }
 0x26a   :  { %1051 = vmatpush1.msra.mxu0 %v4897_v17  ;;  %1122 = vmatpush1.msra.mxu1 %v4899_v18  ;;  %v7232_v17 = vld [vmem:[#allocation36_spill] sm:$0xff]  ;;  %v7233_v18 = vld [vmem:[#allocation37_spill] sm:$0xff] }
 0x26b   :  { %1052 = vmatprep.subr.mxu0 %v4903_v19  ;;  %1123 = vmatprep.subr.mxu1 %v4905_v20  ;;  %v7234_v19 = vld [vmem:[#allocation38_spill] sm:$0xff]  ;;  %v7235_v20 = vld [vmem:[#allocation39_spill] sm:$0xff] }
 0x26c   :  { %1053 = vmatpush1.msra.mxu0 %v4911_v21  ;;  %1124 = vmatpush1.msra.mxu1 %v4913_v22  ;;  %v7236_v21 = vld [vmem:[#allocation40_spill] sm:$0xff]  ;;  %v7237_v22 = vld [vmem:[#allocation41_spill] sm:$0xff] }
 0x26d   :  { %1054 = vmatprep.subr.mxu0 %v4922_v24  ;;  %1125 = vmatprep.subr.mxu1 %v4924_v25  ;;  %v7238_v24 = vld [vmem:[#allocation42_spill] sm:$0xff]  ;;  %v7239_v25 = vld [vmem:[#allocation43_spill] sm:$0xff] }
 0x26e   :  { %1055 = vmatpush1.msra.mxu0 %v4928_v26  ;;  %1126 = vmatpush1.msra.mxu1 %v4930_v27  ;;  %v7240_v26 = vmov 0.0   ;;  %v7241_v27 = vld [vmem:[#allocation44_spill] sm:$0xff] }
 0x26f   :  { %1056 = vmatprep.subr.mxu0 %v4934_v28  ;;  %1127 = vmatprep.subr.mxu1 %v4936_v29  ;;  %v5431_v28 = vld [vmem:[#allocation4 + $0x1e8] sm:$0xff]  ;;  %v5434_v29 = vld [vmem:[#allocation4 + $0x1f8] sm:$0xff] }
 0x270   :  { %1057 = vmatpush1.msra.mxu0 %v4942_v30  ;;  %1128 = vmatpush1.msra.mxu1 %v4944_v31  ;;  %7242 = vst [vmem:[#allocation25_spill] sm:$0xff] %v5431_v28  ;;  %7243 = vst [vmem:[#allocation26_spill] sm:$0xff] %v5434_v29  ;;  %v7244_v31 = vld [vmem:[#allocation49_spill] sm:$0xff] }
 0x271   :  { %1058 = vmatprep.subr.mxu0 %v4953_v33  ;;  %1129 = vmatprep.subr.mxu1 %v4955_v34 }
 0x272   :  { %1059 = vmatpush1.msra.mxu0 %v4959_v35  ;;  %1130 = vmatpush1.msra.mxu1 %v4961_v36 }
 0x273   :  { %1060 = vmatprep.subr.mxu0 %v4965_v37  ;;  %1131 = vmatprep.subr.mxu1 %v4967_v38 }
 0x274   :  { %1061 = vmatpush1.msra.mxu0 %v4973_v39  ;;  %1132 = vmatpush1.msra.mxu1 %v4975_v40 }
 0x275   :  { %1062 = vmatprep.subr.mxu0 %v4984_v42  ;;  %1133 = vmatprep.subr.mxu1 %v4986_v43 }
 0x276   :  { %1063 = vmatpush1.msra.mxu0 %v4990_v44  ;;  %1134 = vmatpush1.msra.mxu1 %v4992_v45 }
 0x277   :  { %1064 = vmatprep.subr.mxu0 %v4996_v46  ;;  %1135 = vmatprep.subr.mxu1 %v4998_v47 }
 0x278   :  { %1065 = vmatpush1.msra.mxu0 %v5004_v48  ;;  %1136 = vmatpush1.msra.mxu1 %v5006_v49 }
 0x279   :  { %1066 = vmatprep.subr.mxu0 %v5015_v51  ;;  %1137 = vmatprep.subr.mxu1 %v5017_v52 }
 0x27a   :  { %1067 = vmatpush1.msra.mxu0 %v5021_v53  ;;  %1138 = vmatpush1.msra.mxu1 %v7196_v23 }
 0x27b   :  { %1068 = vmatprep.subr.mxu0 %v7197_v2  ;;  %1139 = vmatprep.subr.mxu1 %v7198_v57 }
 0x27c   :  { %1069 = vmatpush1.msra.mxu0 %v7199_v56  ;;  %1140 = vmatpush1.msra.mxu1 %v7224_v8 }
 0x27d   :  { %1070 = vmatprep.subr.mxu0 %v7225_v9  ;;  %1141 = vmatprep.subr.mxu1 %v7226_v10 }
 0x27e   :  { %1071 = vmatpush1.msra.mxu0 %v7227_v11  ;;  %1142 = vmatpush1.msra.mxu1 %v7228_v12 }
 0x27f   :  { %1072 = vmatprep.subr.mxu0 %v7229_v13  ;;  %1143 = vmatprep.subr.mxu1 %v7230_v15 }
 0x280   :  { %1073 = vmatpush1.msra.mxu0 %v7231_v16  ;;  %1144 = vmatpush1.msra.mxu1 %v7232_v17 }
 0x281   :  { %1074 = vmatprep.subr.mxu0 %v7233_v18  ;;  %1145 = vmatprep.subr.mxu1 %v7234_v19 }
 0x282   :  { %1075 = vmatpush1.msra.mxu0 %v7235_v20  ;;  %1146 = vmatpush1.msra.mxu1 %v7236_v21 }
 0x283   :  { %1076 = vmatprep.subr.mxu0 %v7237_v22  ;;  %1147 = vmatprep.subr.mxu1 %v7238_v24 }
 0x284   :  { %1077 = vmatpush1.msra.mxu0 %v7239_v25  ;;  %1110 = vmatprep.mubr.f32.mxu0 %v7240_v26 }
 0x285   :  { %1148 = vmatpush1.msra.mxu1 %v7241_v27  ;;  %1181 = vmatprep.mubr.f32.mxu1 %v7240_v26 }
 0x286   :  { %1225 = vmatprep.subr.mxu0 %v5431_v28  ;;  %1296 = vmatprep.subr.mxu1 %v5434_v29 }
 0x325   :  { %v933_v30 = vpop.f32.mrf.mxu0  ;;  %v1004_v54 = vpop.f32.mrf.mxu1 }
 0x326   :  { %v1009_v33 = vadd.f32 %v933_v30, %v7244_v31  ;;  %v1011_v59 = vadd.f32 %v1004_v54, %v7247_v60  ;;  %v5461_v60 = vld [vmem:[#allocation4 + $0x1c0] sm:$0xff] }
 0x327   :  { %v935_v34 = vpop.f32.mrf.mxu0  ;;  %v1006_v32 = vpop.f32.mrf.mxu1 }
 0x328   :  { %v4019_v7 = vmul.f32 -1.442695, %v1009_v33  ;;  %v1010_v3 = vadd.f32 %v935_v34, %v7245_v4  ;;  %v1012_v62 = vadd.f32 %v1006_v32, %v7246_v0  ;;  %v5449_v32 = vld [vmem:[#allocation4 + $0x1e0] sm:$0xff]  ;;  %v5452_v0 = vld [vmem:[#allocation4 + $0x1f0] sm:$0xff] }
 0x32a   :  { %4215 = vpow2.f32 %v4019_v7  ;;  %v4020_v55 = vmul.f32 -1.442695, %v1010_v3  ;;  %v4021_v58 = vmul.f32 -1.442695, %v1012_v62  ;;  %v5458_v62 = vld [vmem:[#allocation4 + $0x1d8] sm:$0xff] }
 0x32c   :  { %4217 = vpow2.f32 %v4020_v55 }
 0x32d   :  { %4219 = vtanh.f32 %v1011_v59  ;;  %v5464_v59 = vld [vmem:[#allocation4 + $0x1d0] sm:$0xff] }
 0x32e   :  { %4221 = vpow2.f32 %v4021_v58  ;;  %v5467_v58 = vld [vmem:[#allocation4 + $0x1a8] sm:$0xff] }
 0x337   :  { %v4216_v6 = vpop.eup %4215 }
 0x338   :  { %v1016_v5 = vadd.f32 1.0, %v4216_v6  ;;  %v5470_v6 = vld [vmem:[#allocation4 + $0x1b8] sm:$0xff] }
 0x339   :  { %v4218_v63 = vpop.eup %4217 }
 0x33a   :  { %4223 = vrcp.f32 %v1016_v5  ;;  %v1022_v61 = vadd.f32 1.0, %v4218_v63  ;;  %v4220_v14 = vpop.eup %4219  ;;  %v5473_v5 = vld [vmem:[#allocation4 + $0x1a0] sm:$0xff]  ;;  %v5476_v63 = vld [vmem:[#allocation4 + $0x1b0] sm:$0xff] }
 0x33b   :  { %v4222_v50 = vpop.eup %4221 }
 0x33c   :  { %4225 = vrcp.f32 %v1022_v61  ;;  %v1029_v34 = vadd.f32 1.0, %v4222_v50  ;;  %v5479_v61 = vld [vmem:[#allocation4 + $0x188] sm:$0xff]  ;;  %v5485_v50 = vld [vmem:[#allocation4 + $0x180] sm:$0xff] }
 0x33e   :  { %4227 = vrcp.f32 %v1029_v34  ;;  %v5497_v34 = vld [vmem:[#allocation4 + $0x160] sm:$0xff] }
 0x33f   :  { %7249 = vst [vmem:[#allocation22_spill] sm:$0xff] %v5497_v34 }
 0x347   :  { %v4224_v30 = vpop.eup %4223 }
 0x348   :  { %v1033_v31 = vmul.f32 %v4224_v30, %v4220_v14  ;;  %v5482_v14 = vld [vmem:[#allocation4 + $0x198] sm:$0xff]  ;;  %v5488_v30 = vld [vmem:[#allocation4 + $0x190] sm:$0xff] }
 0x349   :  { %v4226_v33 = vpop.eup %4225 }
 0x34a   :  { %v1032_v7 = vmul.f32 %v4226_v33, %v5360_v41  ;;  %v5455_v41 = vld [vmem:[#allocation4 + $0x1c8] sm:$0xff]  ;;  %v5494_v33 = vld [vmem:[#allocation4 + $0x178] sm:$0xff] }
 0x34b   :  { %v4228_v3 = vpop.eup %4227 }
 0x34c   :  { %v5442_v4 = vadd.f32 %v1033_v31, %v1032_v7  ;;  %v5491_v31 = vld [vmem:[#allocation4 + $0x168] sm:$0xff]  ;;  %v5500_v7 = vld [vmem:[#allocation4 + $0x170] sm:$0xff] }
 0x34d   :  { %7250 = vst [vmem:[#allocation23_spill] sm:$0xff] %v5500_v7 }
 0x34e   :  { %4229 = vtanh.f32 %v5442_v4 }
 0x35b   :  { %v4230_v54 = vpop.eup %4229 }
 0x35c   :  { %v5445_v55 = vmul.f32 %v4230_v54, %v4228_v3  ;;  %v5503_v3 = vld [vmem:[#allocation4 + $0x148] sm:$0xff]  ;;  %v5506_v54 = vld [vmem:[#allocation4 + $0x158] sm:$0xff] }
 0x35e   :  { %7248 = vst [vmem:[#allocation27_spill] sm:$0xff] %v5445_v55  ;;  %1111 = vmatmul.mubr.f32.vlgmr.msra.gmra.mxu0 %v5445_v55  ;;  %1182 = vmatmul.mubr.f32.vlgmr.msra.gmra.mxu1 %v5445_v55  ;;  %v5509_v55 = vld [vmem:[#allocation4 + $0x140] sm:$0xff] }
 0x35f   :  { %1226 = vmatpush1.msra.mxu0 %v5449_v32  ;;  %1297 = vmatpush1.msra.mxu1 %v5452_v0 }
 0x360   :  { %1227 = vmatprep.subr.mxu0 %v5455_v41  ;;  %1298 = vmatprep.subr.mxu1 %v5458_v62 }
 0x361   :  { %1228 = vmatpush1.msra.mxu0 %v5461_v60  ;;  %1299 = vmatpush1.msra.mxu1 %v5464_v59 }
 0x362   :  { %1229 = vmatprep.subr.mxu0 %v5467_v58  ;;  %1300 = vmatprep.subr.mxu1 %v5470_v6 }
 0x363   :  { %1230 = vmatpush1.msra.mxu0 %v5473_v5  ;;  %1301 = vmatpush1.msra.mxu1 %v5476_v63 }
 0x364   :  { %1231 = vmatprep.subr.mxu0 %v5479_v61  ;;  %1302 = vmatprep.subr.mxu1 %v5482_v14 }
 0x365   :  { %1232 = vmatpush1.msra.mxu0 %v5485_v50  ;;  %1303 = vmatpush1.msra.mxu1 %v5488_v30 }
 0x366   :  { %1233 = vmatprep.subr.mxu0 %v5491_v31  ;;  %1304 = vmatprep.subr.mxu1 %v5494_v33 }
 0x367   :  { %1234 = vmatpush1.msra.mxu0 %v5497_v34  ;;  %1305 = vmatpush1.msra.mxu1 %v5500_v7  ;;  %v5515_v34 = vld [vmem:[#allocation4 + $0x128] sm:$0xff]  ;;  %v5518_v7 = vld [vmem:[#allocation4 + $0x138] sm:$0xff] }
 0x368   :  { %1235 = vmatprep.subr.mxu0 %v5503_v3  ;;  %1306 = vmatprep.subr.mxu1 %v5506_v54 }
 0x369   :  { %1236 = vmatpush1.msra.mxu0 %v5509_v55  ;;  %1307 = vmatpush1.msra.mxu1 %v5512_v1 }
 0x36a   :  { %1237 = vmatprep.subr.mxu0 %v5515_v34  ;;  %1308 = vmatprep.subr.mxu1 %v5518_v7 }
 0x36b   :  { %1238 = vmatpush1.msra.mxu0 %v4959_v35  ;;  %1309 = vmatpush1.msra.mxu1 %v4961_v36  ;;  %v7251_v36 = vld [vmem:[#allocation53_spill] sm:$0xff] }
 0x36c   :  { %1239 = vmatprep.subr.mxu0 %v4965_v37  ;;  %1310 = vmatprep.subr.mxu1 %v4967_v38 }
 0x36d   :  { %1240 = vmatpush1.msra.mxu0 %v4973_v39  ;;  %1311 = vmatpush1.msra.mxu1 %v4975_v40  ;;  %v7252_v40 = vld [vmem:[#allocation55_spill] sm:$0xff] }
 0x36e   :  { %1241 = vmatprep.subr.mxu0 %v4984_v42  ;;  %1312 = vmatprep.subr.mxu1 %v4986_v43 }
 0x36f   :  { %1242 = vmatpush1.msra.mxu0 %v4990_v44  ;;  %1313 = vmatpush1.msra.mxu1 %v4992_v45 }
 0x370   :  { %1243 = vmatprep.subr.mxu0 %v4996_v46  ;;  %1314 = vmatprep.subr.mxu1 %v4998_v47  ;;  %v7253_v46 = vld [vmem:[#allocation56_spill] sm:$0xff] }
 0x371   :  { %1244 = vmatpush1.msra.mxu0 %v5004_v48  ;;  %1315 = vmatpush1.msra.mxu1 %v5006_v49  ;;  %v7254_v48 = vld [vmem:[#allocation54_spill] sm:$0xff] }
 0x372   :  { %1245 = vmatprep.subr.mxu0 %v5015_v51  ;;  %1316 = vmatprep.subr.mxu1 %v5017_v52 }
 0x373   :  { %1246 = vmatpush1.msra.mxu0 %v5021_v53  ;;  %1317 = vmatpush1.msra.mxu1 %v7196_v23 }
 0x374   :  { %1247 = vmatprep.subr.mxu0 %v7197_v2  ;;  %1318 = vmatprep.subr.mxu1 %v7198_v57 }
 0x375   :  { %1248 = vmatpush1.msra.mxu0 %v7199_v56  ;;  %1319 = vmatpush1.msra.mxu1 %v7224_v8 }
 0x376   :  { %1249 = vmatprep.subr.mxu0 %v7225_v9  ;;  %1320 = vmatprep.subr.mxu1 %v7226_v10 }
 0x377   :  { %1250 = vmatpush1.msra.mxu0 %v7227_v11  ;;  %1321 = vmatpush1.msra.mxu1 %v7228_v12 }
 0x378   :  { %1251 = vmatprep.subr.mxu0 %v7229_v13  ;;  %1322 = vmatprep.subr.mxu1 %v7230_v15 }
 0x379   :  { %1252 = vmatpush1.msra.mxu0 %v7231_v16  ;;  %1323 = vmatpush1.msra.mxu1 %v7232_v17 }
 0x37a   :  { %1253 = vmatprep.subr.mxu0 %v7233_v18  ;;  %1324 = vmatprep.subr.mxu1 %v7234_v19  ;;  %v7256_v18 = vld [vmem:[#allocation22_spill] sm:$0xff]  ;;  %v7257_v19 = vld [vmem:[#allocation23_spill] sm:$0xff] }
 0x37b   :  { %1254 = vmatpush1.msra.mxu0 %v7235_v20  ;;  %1325 = vmatpush1.msra.mxu1 %v7236_v21  ;;  %v5599_v20 = vld [vmem:[#allocation4 + $0x120] sm:$0xff]  ;;  %v5602_v21 = vld [vmem:[#allocation4 + $0x130] sm:$0xff] }
 0x37c   :  { %1255 = vmatprep.subr.mxu0 %v7237_v22  ;;  %1326 = vmatprep.subr.mxu1 %v7238_v24  ;;  %v5605_v22 = vld [vmem:[#allocation4 + $0x108] sm:$0xff]  ;;  %v5608_v24 = vld [vmem:[#allocation4 + $0x118] sm:$0xff] }
 0x37d   :  { %1256 = vmatpush1.msra.mxu0 %v7239_v25  ;;  %1289 = vmatprep.mubr.f32.mxu0 %v7240_v26  ;;  %v5611_v25 = vld [vmem:[#allocation4 + $0x100] sm:$0xff] }
 0x37e   :  { %1327 = vmatpush1.msra.mxu1 %v7241_v27  ;;  %1360 = vmatprep.mubr.f32.mxu1 %v7240_v26  ;;  %v5614_v27 = vld [vmem:[#allocation4 + $0x110] sm:$0xff] }
 0x37f   :  { %1404 = vmatprep.subr.mxu0 %v5431_v28  ;;  %1475 = vmatprep.subr.mxu1 %v5434_v29 }
 0x41e   :  { %v1112_v35 = vpop.f32.mrf.mxu0  ;;  %v1183_v43 = vpop.f32.mrf.mxu1 }
 0x41f   :  { %v1188_v37 = vadd.f32 %v1112_v35, %v7251_v36  ;;  %v1190_v49 = vadd.f32 %v1183_v43, %v7254_v48  ;;  %v5620_v35 = vld [vmem:[#allocation4 + $0xf8] sm:$0xff]  ;;  %v5623_v36 = vld [vmem:[#allocation4 + $0xe0] sm:$0xff]  ;;  %v5641_v43 = vld [vmem:[#allocation4 + $0xa8] sm:$0xff] }
 0x420   :  { %v1114_v38 = vpop.f32.mrf.mxu0  ;;  %v1185_v45 = vpop.f32.mrf.mxu1  ;;  %v5656_v48 = vld [vmem:[#allocation4 + $0x98] sm:$0xff] }
 0x421   :  { %v4022_v39 = vmul.f32 -1.442695, %v1188_v37  ;;  %v1189_v42 = vadd.f32 %v1114_v38, %v7252_v40  ;;  %v1191_v47 = vadd.f32 %v1185_v45, %v7253_v46  ;;  %v5626_v37 = vld [vmem:[#allocation4 + $0xf0] sm:$0xff]  ;;  %v5629_v38 = vld [vmem:[#allocation4 + $0xc8] sm:$0xff]  ;;  %v5635_v40 = vld [vmem:[#allocation4 + $0xc0] sm:$0xff] }
 0x422   :  { %v5647_v45 = vld [vmem:[#allocation4 + $0xa0] sm:$0xff]  ;;  %v5650_v46 = vld [vmem:[#allocation4 + $0xb0] sm:$0xff] }
 0x423   :  { %4231 = vpow2.f32 %v4022_v39  ;;  %v4023_v44 = vmul.f32 -1.442695, %v1189_v42  ;;  %v4024_v51 = vmul.f32 -1.442695, %v1191_v47  ;;  %v5632_v39 = vld [vmem:[#allocation4 + $0xd8] sm:$0xff]  ;;  %v5638_v42 = vld [vmem:[#allocation4 + $0xd0] sm:$0xff] }
 0x424   :  { %v5653_v47 = vld [vmem:[#allocation4 + $0x88] sm:$0xff] }
 0x425   :  { %4233 = vpow2.f32 %v4023_v44  ;;  %v5644_v44 = vld [vmem:[#allocation4 + $0xb8] sm:$0xff] }
 0x426   :  { %4235 = vtanh.f32 %v1190_v49  ;;  %v5659_v49 = vld [vmem:[#allocation4 + $0x80] sm:$0xff] }
 0x427   :  { %4237 = vpow2.f32 %v4024_v51  ;;  %v5662_v51 = vld [vmem:[#allocation4 + $0x90] sm:$0xff] }
 0x428   :  { %7258 = vst [vmem:[#allocation48_spill] sm:$0xff] %v5662_v51 }
 0x430   :  { %v4232_v52 = vpop.eup %4231 }
 0x431   :  { %v1195_v53 = vadd.f32 1.0, %v4232_v52  ;;  %v5665_v52 = vld [vmem:[#allocation4 + $0x68] sm:$0xff] }
 0x432   :  { %v4234_v23 = vpop.eup %4233  ;;  %7259 = vst [vmem:[#allocation46_spill] sm:$0xff] %v5665_v52 }
 0x433   :  { %4239 = vrcp.f32 %v1195_v53  ;;  %v1201_v2 = vadd.f32 1.0, %v4234_v23  ;;  %v4236_v57 = vpop.eup %4235  ;;  %v5668_v53 = vld [vmem:[#allocation4 + $0x78] sm:$0xff]  ;;  %v5671_v23 = vld [vmem:[#allocation4 + $0x60] sm:$0xff] }
 0x434   :  { %v4238_v56 = vpop.eup %4237  ;;  %7260 = vst [vmem:[#allocation28_spill] sm:$0xff] %v5668_v53  ;;  %7261 = vst [vmem:[#allocation29_spill] sm:$0xff] %v5671_v23 }
 0x435   :  { %4241 = vrcp.f32 %v1201_v2  ;;  %v1208_v11 = vadd.f32 1.0, %v4238_v56  ;;  %v5674_v2 = vld [vmem:[#allocation4 + $0x70] sm:$0xff]  ;;  %v5680_v56 = vld [vmem:[#allocation4 + $0x58] sm:$0xff] }
 0x436   :  { %7262 = vst [vmem:[#allocation30_spill] sm:$0xff] %v5674_v2  ;;  %7264 = vst [vmem:[#allocation32_spill] sm:$0xff] %v5680_v56 }
 0x437   :  { %4243 = vrcp.f32 %v1208_v11  ;;  %v5692_v11 = vld [vmem:[#allocation4 + $0x38] sm:$0xff] }
 0x438   :  { %7268 = vst [vmem:[#allocation36_spill] sm:$0xff] %v5692_v11 }
 0x440   :  { %v4240_v8 = vpop.eup %4239 }
 0x441   :  { %v1212_v9 = vmul.f32 %v4240_v8, %v4236_v57  ;;  %v5677_v57 = vld [vmem:[#allocation4 + $0x48] sm:$0xff]  ;;  %v5683_v8 = vld [vmem:[#allocation4 + $0x40] sm:$0xff] }
 0x442   :  { %v4242_v10 = vpop.eup %4241  ;;  %7263 = vst [vmem:[#allocation31_spill] sm:$0xff] %v5677_v57  ;;  %7265 = vst [vmem:[#allocation33_spill] sm:$0xff] %v5683_v8 }
 0x443   :  { %v1211_v12 = vmul.f32 %v4242_v10, %v5442_v4  ;;  %v5617_v4 = vld [vmem:[#allocation4 + $0xe8] sm:$0xff] }
 0x444   :  { %v4244_v15 = vpop.eup %4243  ;;  %v5689_v10 = vld [vmem:[#allocation4 + $0x28] sm:$0xff] }
 0x445   :  { %v5568_v13 = vadd.f32 %v1212_v9, %v1211_v12  ;;  %v5686_v9 = vld [vmem:[#allocation4 + $0x50] sm:$0xff]  ;;  %7267 = vst [vmem:[#allocation35_spill] sm:$0xff] %v5689_v10  ;;  %v5695_v12 = vld [vmem:[#allocation4 + $0x20] sm:$0xff] }
 0x446   :  { %7266 = vst [vmem:[#allocation34_spill] sm:$0xff] %v5686_v9  ;;  %7269 = vst [vmem:[#allocation37_spill] sm:$0xff] %v5695_v12 }
 0x447   :  { %4245 = vtanh.f32 %v5568_v13 }
 0x454   :  { %v4246_v16 = vpop.eup %4245 }
 0x455   :  { %v5571_v17 = vmul.f32 %v4246_v16, %v4244_v15  ;;  %v5698_v15 = vld [vmem:[#allocation4 + $0x30] sm:$0xff]  ;;  %v5701_v16 = vld [vmem:[#allocation4 + $0x8] sm:$0xff] }
 0x456   :  { %7270 = vst [vmem:[#allocation38_spill] sm:$0xff] %v5698_v15  ;;  %7271 = vst [vmem:[#allocation39_spill] sm:$0xff] %v5701_v16 }
 0x457   :  { %7255 = vst [vmem:[#allocation47_spill] sm:$0xff] %v5571_v17  ;;  %1290 = vmatmul.mubr.f32.vlgmr.msra.gmra.mxu0 %v5571_v17  ;;  %1361 = vmatmul.mubr.f32.vlgmr.msra.gmra.mxu1 %v5571_v17  ;;  %v5704_v17 = vld [vmem:[#allocation4 + $0x18] sm:$0xff] }
 0x458   :  { %1405 = vmatpush1.msra.mxu0 %v5449_v32  ;;  %1476 = vmatpush1.msra.mxu1 %v5452_v0  ;;  %7272 = vst [vmem:[#allocation40_spill] sm:$0xff] %v5704_v17 }
 0x459   :  { %1406 = vmatprep.subr.mxu0 %v5455_v41  ;;  %1477 = vmatprep.subr.mxu1 %v5458_v62 }
 0x45a   :  { %1407 = vmatpush1.msra.mxu0 %v5461_v60  ;;  %1478 = vmatpush1.msra.mxu1 %v5464_v59 }
 0x45b   :  { %1408 = vmatprep.subr.mxu0 %v5467_v58  ;;  %1479 = vmatprep.subr.mxu1 %v5470_v6 }
 0x45c   :  { %1409 = vmatpush1.msra.mxu0 %v5473_v5  ;;  %1480 = vmatpush1.msra.mxu1 %v5476_v63 }
 0x45d   :  { %1410 = vmatprep.subr.mxu0 %v5479_v61  ;;  %1481 = vmatprep.subr.mxu1 %v5482_v14 }
 0x45e   :  { %1411 = vmatpush1.msra.mxu0 %v5485_v50  ;;  %1482 = vmatpush1.msra.mxu1 %v5488_v30 }
 0x45f   :  { %1412 = vmatprep.subr.mxu0 %v5491_v31  ;;  %1483 = vmatprep.subr.mxu1 %v5494_v33 }
 0x460   :  { %1413 = vmatpush1.msra.mxu0 %v7256_v18  ;;  %1484 = vmatpush1.msra.mxu1 %v7257_v19 }
 0x461   :  { %1414 = vmatprep.subr.mxu0 %v5503_v3  ;;  %1485 = vmatprep.subr.mxu1 %v5506_v54 }
 0x462   :  { %1415 = vmatpush1.msra.mxu0 %v5509_v55  ;;  %1486 = vmatpush1.msra.mxu1 %v5512_v1 }
 0x463   :  { %1416 = vmatprep.subr.mxu0 %v5515_v34  ;;  %1487 = vmatprep.subr.mxu1 %v5518_v7 }
 0x464   :  { %1417 = vmatpush1.msra.mxu0 %v5599_v20  ;;  %1488 = vmatpush1.msra.mxu1 %v5602_v21 }
 0x465   :  { %1418 = vmatprep.subr.mxu0 %v5605_v22  ;;  %1489 = vmatprep.subr.mxu1 %v5608_v24 }
 0x466   :  { %1419 = vmatpush1.msra.mxu0 %v5611_v25  ;;  %1490 = vmatpush1.msra.mxu1 %v5614_v27 }
 0x467   :  { %1420 = vmatprep.subr.mxu0 %v5617_v4  ;;  %1491 = vmatprep.subr.mxu1 %v5620_v35 }
 0x468   :  { %1421 = vmatpush1.msra.mxu0 %v5623_v36  ;;  %1492 = vmatpush1.msra.mxu1 %v5626_v37 }
 0x469   :  { %1422 = vmatprep.subr.mxu0 %v5629_v38  ;;  %1493 = vmatprep.subr.mxu1 %v5632_v39 }
 0x46a   :  { %1423 = vmatpush1.msra.mxu0 %v5635_v40  ;;  %1494 = vmatpush1.msra.mxu1 %v5638_v42 }
 0x46b   :  { %1424 = vmatprep.subr.mxu0 %v5641_v43  ;;  %1495 = vmatprep.subr.mxu1 %v5644_v44 }
 0x46c   :  { %1425 = vmatpush1.msra.mxu0 %v5647_v45  ;;  %1496 = vmatpush1.msra.mxu1 %v5650_v46 }
 0x46d   :  { %1426 = vmatprep.subr.mxu0 %v5653_v47  ;;  %1497 = vmatprep.subr.mxu1 %v5656_v48 }
 0x46e   :  { %1427 = vmatpush1.msra.mxu0 %v5659_v49  ;;  %1498 = vmatpush1.msra.mxu1 %v5662_v51 }
 0x46f   :  { %1428 = vmatprep.subr.mxu0 %v5665_v52  ;;  %1499 = vmatprep.subr.mxu1 %v5668_v53  ;;  %v7278_v53 = vld [vmem:[#allocation58_spill] sm:$0xff] }
 0x470   :  { %1429 = vmatpush1.msra.mxu0 %v5671_v23  ;;  %1500 = vmatpush1.msra.mxu1 %v5674_v2  ;;  %v7277_v23 = vld [vmem:[#allocation60_spill] sm:$0xff] }
 0x471   :  { %1430 = vmatprep.subr.mxu0 %v5677_v57  ;;  %1501 = vmatprep.subr.mxu1 %v5680_v56 }
 0x472   :  { %1431 = vmatpush1.msra.mxu0 %v5683_v8  ;;  %1502 = vmatpush1.msra.mxu1 %v5686_v9  ;;  %v7276_v8 = vld [vmem:[#allocation59_spill] sm:$0xff] }
 0x473   :  { %1432 = vmatprep.subr.mxu0 %v5689_v10  ;;  %1503 = vmatprep.subr.mxu1 %v5692_v11  ;;  %v5707_v10 = vld [vmem:[#allocation4] sm:$0xff]  ;;  %v5711_v11 = vld [vmem:[#allocation4 + $0x10] sm:$0xff] }
 0x474   :  { %1433 = vmatpush1.msra.mxu0 %v5695_v12  ;;  %1504 = vmatpush1.msra.mxu1 %v5698_v15  ;;  %7273 = vst [vmem:[#allocation41_spill] sm:$0xff] %v5707_v10  ;;  %7274 = vst [vmem:[#allocation42_spill] sm:$0xff] %v5711_v11  ;;  %v7275_v15 = vld [vmem:[#allocation57_spill] sm:$0xff] }
 0x475   :  { %1434 = vmatprep.subr.mxu0 %v5701_v16  ;;  %1505 = vmatprep.subr.mxu1 %v5704_v17 }
 0x476   :  { %1435 = vmatpush1.msra.mxu0 %v5707_v10  ;;  %1468 = vmatprep.mubr.f32.mxu0 %v7240_v26 }
 0x477   :  { %1506 = vmatpush1.msra.mxu1 %v5711_v11  ;;  %1539 = vmatprep.mubr.f32.mxu1 %v7240_v26 }
 0x478   :  { %1583 = vmatprep.subr.mxu0 %v5431_v28  ;;  %1654 = vmatprep.subr.mxu1 %v5434_v29 }
 0x517   :  { %v1291_v16 = vpop.f32.mrf.mxu0  ;;  %v1362_v10 = vpop.f32.mrf.mxu1 }
 0x518   :  { %v1367_v12 = vadd.f32 %v1291_v16, %v7275_v15  ;;  %v1369_v26 = vadd.f32 %v1362_v10, %v7278_v53  ;;  %v7285_v10 = vld [vmem:[#allocation31_spill] sm:$0xff] }
 0x519   :  { %v1293_v17 = vpop.f32.mrf.mxu0  ;;  %v1364_v2 = vpop.f32.mrf.mxu1 }
 0x51a   :  { %v4025_v9 = vmul.f32 -1.442695, %v1367_v12  ;;  %v1368_v56 = vadd.f32 %v1293_v17, %v7276_v8  ;;  %v1370_v11 = vadd.f32 %v1364_v2, %v7277_v23  ;;  %v7284_v2 = vld [vmem:[#allocation30_spill] sm:$0xff] }
 0x51c   :  { %4247 = vpow2.f32 %v4025_v9  ;;  %v4026_v57 = vmul.f32 -1.442695, %v1368_v56  ;;  %v4027_v52 = vmul.f32 -1.442695, %v1370_v11  ;;  %v7286_v11 = vld [vmem:[#allocation32_spill] sm:$0xff] }
 0x51e   :  { %4249 = vpow2.f32 %v4026_v57 }
 0x51f   :  { %4251 = vtanh.f32 %v1369_v26 }
 0x520   :  { %4253 = vpow2.f32 %v4027_v52  ;;  %v7283_v52 = vld [vmem:[#allocation29_spill] sm:$0xff] }
 0x529   :  { %v4248_v28 = vpop.eup %4247 }
 0x52a   :  { %v1374_v51 = vadd.f32 1.0, %v4248_v28 }
 0x52b   :  { %v4250_v29 = vpop.eup %4249 }
 0x52c   :  { %4255 = vrcp.f32 %v1374_v51  ;;  %v1380_v15 = vadd.f32 1.0, %v4250_v29  ;;  %v4252_v12 = vpop.eup %4251  ;;  %v7280_v29 = vld [vmem:[#allocation48_spill] sm:$0xff] }
 0x52d   :  { %v4254_v17 = vpop.eup %4253  ;;  %v7282_v51 = vld [vmem:[#allocation28_spill] sm:$0xff] }
 0x52e   :  { %4257 = vrcp.f32 %v1380_v15  ;;  %v1387_v57 = vadd.f32 1.0, %v4254_v17  ;;  %v7287_v15 = vld [vmem:[#allocation33_spill] sm:$0xff]  ;;  %v7289_v17 = vld [vmem:[#allocation35_spill] sm:$0xff] }
 0x530   :  { %4259 = vrcp.f32 %v1387_v57  ;;  %v7293_v57 = vld [vmem:[#allocation39_spill] sm:$0xff] }
 0x539   :  { %v4256_v8 = vpop.eup %4255 }
 0x53a   :  { %v1391_v9 = vmul.f32 %v4256_v8, %v4252_v12  ;;  %v7288_v12 = vld [vmem:[#allocation34_spill] sm:$0xff]  ;;  %v7290_v8 = vld [vmem:[#allocation36_spill] sm:$0xff] }
 0x53b   :  { %v4258_v56 = vpop.eup %4257 }
 0x53c   :  { %v1390_v16 = vmul.f32 %v4258_v56, %v5568_v13  ;;  %v7281_v13 = vld [vmem:[#allocation46_spill] sm:$0xff] }
 0x53d   :  { %v4260_v28 = vpop.eup %4259  ;;  %v7292_v56 = vld [vmem:[#allocation38_spill] sm:$0xff] }
 0x53e   :  { %v5722_v23 = vadd.f32 %v1391_v9, %v1390_v16  ;;  %v7291_v9 = vld [vmem:[#allocation37_spill] sm:$0xff]  ;;  %v7294_v16 = vld [vmem:[#allocation40_spill] sm:$0xff] }
 0x540   :  { %4261 = vtanh.f32 %v5722_v23 }
 0x54d   :  { %v4262_v26 = vpop.eup %4261 }
 0x54e   :  { %v5725_v53 = vmul.f32 %v4262_v26, %v4260_v28  ;;  %v7295_v28 = vld [vmem:[#allocation41_spill] sm:$0xff]  ;;  %v7296_v26 = vmov 0.0  }
 0x550   :  { %7279 = vst [vmem:[#allocation43_spill] sm:$0xff] %v5725_v53  ;;  %1469 = vmatmul.mubr.f32.vlgmr.msra.gmra.mxu0 %v5725_v53  ;;  %1540 = vmatmul.mubr.f32.vlgmr.msra.gmra.mxu1 %v5725_v53  ;;  %v7297_v53 = vld [vmem:[#allocation42_spill] sm:$0xff] }
 0x551   :  { %1584 = vmatpush1.msra.mxu0 %v5449_v32  ;;  %1655 = vmatpush1.msra.mxu1 %v5452_v0 }
 0x552   :  { %1585 = vmatprep.subr.mxu0 %v5455_v41  ;;  %1656 = vmatprep.subr.mxu1 %v5458_v62 }
 0x553   :  { %1586 = vmatpush1.msra.mxu0 %v5461_v60  ;;  %1657 = vmatpush1.msra.mxu1 %v5464_v59 }
 0x554   :  { %1587 = vmatprep.subr.mxu0 %v5467_v58  ;;  %1658 = vmatprep.subr.mxu1 %v5470_v6 }
 0x555   :  { %1588 = vmatpush1.msra.mxu0 %v5473_v5  ;;  %1659 = vmatpush1.msra.mxu1 %v5476_v63 }
 0x556   :  { %1589 = vmatprep.subr.mxu0 %v5479_v61  ;;  %1660 = vmatprep.subr.mxu1 %v5482_v14 }
 0x557   :  { %1590 = vmatpush1.msra.mxu0 %v5485_v50  ;;  %1661 = vmatpush1.msra.mxu1 %v5488_v30 }
 0x558   :  { %1591 = vmatprep.subr.mxu0 %v5491_v31  ;;  %1662 = vmatprep.subr.mxu1 %v5494_v33 }
 0x559   :  { %1592 = vmatpush1.msra.mxu0 %v7256_v18  ;;  %1663 = vmatpush1.msra.mxu1 %v7257_v19 }
 0x55a   :  { %1593 = vmatprep.subr.mxu0 %v5503_v3  ;;  %1664 = vmatprep.subr.mxu1 %v5506_v54 }
 0x55b   :  { %1594 = vmatpush1.msra.mxu0 %v5509_v55  ;;  %1665 = vmatpush1.msra.mxu1 %v5512_v1 }
 0x55c   :  { %1595 = vmatprep.subr.mxu0 %v5515_v34  ;;  %1666 = vmatprep.subr.mxu1 %v5518_v7 }
 0x55d   :  { %1596 = vmatpush1.msra.mxu0 %v5599_v20  ;;  %1667 = vmatpush1.msra.mxu1 %v5602_v21 }
 0x55e   :  { %1597 = vmatprep.subr.mxu0 %v5605_v22  ;;  %1668 = vmatprep.subr.mxu1 %v5608_v24 }
 0x55f   :  { %1598 = vmatpush1.msra.mxu0 %v5611_v25  ;;  %1669 = vmatpush1.msra.mxu1 %v5614_v27 }
 0x560   :  { %1599 = vmatprep.subr.mxu0 %v5617_v4  ;;  %1670 = vmatprep.subr.mxu1 %v5620_v35 }
 0x561   :  { %1600 = vmatpush1.msra.mxu0 %v5623_v36  ;;  %1671 = vmatpush1.msra.mxu1 %v5626_v37 }
 0x562   :  { %1601 = vmatprep.subr.mxu0 %v5629_v38  ;;  %1672 = vmatprep.subr.mxu1 %v5632_v39 }
 0x563   :  { %1602 = vmatpush1.msra.mxu0 %v5635_v40  ;;  %1673 = vmatpush1.msra.mxu1 %v5638_v42 }
 0x564   :  { %1603 = vmatprep.subr.mxu0 %v5641_v43  ;;  %1674 = vmatprep.subr.mxu1 %v5644_v44 }
 0x565   :  { %1604 = vmatpush1.msra.mxu0 %v5647_v45  ;;  %1675 = vmatpush1.msra.mxu1 %v5650_v46 }
 0x566   :  { %1605 = vmatprep.subr.mxu0 %v5653_v47  ;;  %1676 = vmatprep.subr.mxu1 %v5656_v48 }
 0x567   :  { %1606 = vmatpush1.msra.mxu0 %v5659_v49  ;;  %1677 = vmatpush1.msra.mxu1 %v7280_v29 }
 0x568   :  { %1607 = vmatprep.subr.mxu0 %v7281_v13  ;;  %1678 = vmatprep.subr.mxu1 %v7282_v51  ;;  %v7303_v51 = vld [vmem:[#allocation62_spill] sm:$0xff] }
 0x569   :  { %1608 = vmatpush1.msra.mxu0 %v7283_v52  ;;  %1679 = vmatpush1.msra.mxu1 %v7284_v2  ;;  %v7302_v52 = vld [vmem:[#allocation64_spill] sm:$0xff] }
 0x56a   :  { %1609 = vmatprep.subr.mxu0 %v7285_v10  ;;  %1680 = vmatprep.subr.mxu1 %v7286_v11 }
 0x56b   :  { %1610 = vmatpush1.msra.mxu0 %v7287_v15  ;;  %1681 = vmatpush1.msra.mxu1 %v7288_v12  ;;  %v7298_v12 = vld [vmem:[#allocation25_spill] sm:$0xff] }
 0x56c   :  { %1611 = vmatprep.subr.mxu0 %v7289_v17  ;;  %1682 = vmatprep.subr.mxu1 %v7290_v8  ;;  %v7299_v17 = vld [vmem:[#allocation26_spill] sm:$0xff] }
 0x56d   :  { %1612 = vmatpush1.msra.mxu0 %v7291_v9  ;;  %1683 = vmatpush1.msra.mxu1 %v7292_v56  ;;  %v7300_v9 = vld [vmem:[#allocation61_spill] sm:$0xff] }
 0x56e   :  { %1613 = vmatprep.subr.mxu0 %v7293_v57  ;;  %1684 = vmatprep.subr.mxu1 %v7294_v16  ;;  %v7301_v57 = vld [vmem:[#allocation63_spill] sm:$0xff] }
 0x56f   :  { %1614 = vmatpush1.msra.mxu0 %v7295_v28  ;;  %1647 = vmatprep.mubr.f32.mxu0 %v7296_v26 }
 0x570   :  { %1685 = vmatpush1.msra.mxu1 %v7297_v53  ;;  %1718 = vmatprep.mubr.f32.mxu1 %v7296_v26 }
 0x571   :  { %1762 = vmatprep.subr.mxu0 %v7298_v12  ;;  %1833 = vmatprep.subr.mxu1 %v7299_v17 }
 0x610   :  { %v1470_v8 = vpop.f32.mrf.mxu0  ;;  %v1541_v16 = vpop.f32.mrf.mxu1 }
 0x611   :  { %v1546_v15 = vadd.f32 %v1470_v8, %v7300_v9  ;;  %v1548_v26 = vadd.f32 %v1541_v16, %v7303_v51 }
 0x612   :  { %v1472_v56 = vpop.f32.mrf.mxu0  ;;  %v1543_v2 = vpop.f32.mrf.mxu1 }
 0x613   :  { %v4028_v11 = vmul.f32 -1.442695, %v1546_v15  ;;  %v1547_v10 = vadd.f32 %v1472_v56, %v7301_v57  ;;  %v1549_v53 = vadd.f32 %v1543_v2, %v7302_v52 }
 0x615   :  { %4263 = vpow2.f32 %v4028_v11  ;;  %v4029_v28 = vmul.f32 -1.442695, %v1547_v10  ;;  %v4030_v13 = vmul.f32 -1.442695, %v1549_v53 }
 0x617   :  { %4265 = vpow2.f32 %v4029_v28 }
 0x618   :  { %4267 = vtanh.f32 %v1548_v26 }
 0x619   :  { %4269 = vpow2.f32 %v4030_v13 }
 0x622   :  { %v4264_v12 = vpop.eup %4263 }
 0x623   :  { %v1553_v29 = vadd.f32 1.0, %v4264_v12  ;;  %v2004_v12 = vld [vmem:[#allocation7 + $0x1e0] sm:$0xff] }
 0x624   :  { %v4266_v17 = vpop.eup %4265 }
 0x625   :  { %4271 = vrcp.f32 %v1553_v29  ;;  %v1559_v8 = vadd.f32 1.0, %v4266_v17  ;;  %v4268_v15 = vpop.eup %4267  ;;  %v2006_v17 = vld [vmem:[#allocation7 + $0x1f0] sm:$0xff] }
 0x626   :  { %v4270_v9 = vpop.eup %4269 }
 0x627   :  { %4273 = vrcp.f32 %v1559_v8  ;;  %v1566_v57 = vadd.f32 1.0, %v4270_v9  ;;  %v2001_v8 = vld [vmem:[#allocation7 + $0x1c8] sm:$0xff]  ;;  %v2000_v9 = vld [vmem:[#allocation7 + $0x1c0] sm:$0xff] }
 0x629   :  { %4275 = vrcp.f32 %v1566_v57  ;;  %v1996_v57 = vld [vmem:[#allocation7 + $0x1a0] sm:$0xff] }
 0x632   :  { %v4272_v11 = vpop.eup %4271 }
 0x633   :  { %v1570_v56 = vmul.f32 %v4272_v11, %v4268_v15  ;;  %v2003_v15 = vld [vmem:[#allocation7 + $0x1d8] sm:$0xff]  ;;  %v2002_v11 = vld [vmem:[#allocation7 + $0x1d0] sm:$0xff] }
 0x634   :  { %v4274_v10 = vpop.eup %4273 }
 0x635   :  { %v1569_v28 = vmul.f32 %v4274_v10, %v5722_v23  ;;  %v1999_v10 = vld [vmem:[#allocation7 + $0x1b8] sm:$0xff] }
 0x636   :  { %v4276_v53 = vpop.eup %4275 }
 0x637   :  { %v5800_v52 = vadd.f32 %v1570_v56, %v1569_v28  ;;  %v1997_v56 = vld [vmem:[#allocation7 + $0x1a8] sm:$0xff]  ;;  %v1998_v28 = vld [vmem:[#allocation7 + $0x1b0] sm:$0xff] }
 0x639   :  { %4277 = vtanh.f32 %v5800_v52 }
 0x646   :  { %v4278_v51 = vpop.eup %4277 }
 0x647   :  { %v5803_v2 = vmul.f32 %v4278_v51, %v4276_v53  ;;  %v1995_v53 = vld [vmem:[#allocation7 + $0x198] sm:$0xff]  ;;  %v1992_v51 = vld [vmem:[#allocation7 + $0x180] sm:$0xff] }
 0x649   :  { %1648 = vmatmul.mubr.f32.vlgmr.msra.gmra.mxu0 %v5803_v2  ;;  %1719 = vmatmul.mubr.f32.vlgmr.msra.gmra.mxu1 %v5803_v2 }
 0x64a   :  { %1763 = vmatpush1.msra.mxu0 %v5449_v32  ;;  %1834 = vmatpush1.msra.mxu1 %v5452_v0  ;;  %v7306_v32 = vld [vmem:[#allocation28_spill] sm:$0xff]  ;;  %v7307_v0 = vld [vmem:[#allocation29_spill] sm:$0xff] }
 0x64b   :  { %1764 = vmatprep.subr.mxu0 %v5455_v41  ;;  %1835 = vmatprep.subr.mxu1 %v5458_v62  ;;  %v7308_v41 = vld [vmem:[#allocation30_spill] sm:$0xff]  ;;  %v7309_v62 = vld [vmem:[#allocation31_spill] sm:$0xff] }
 0x64c   :  { %1765 = vmatpush1.msra.mxu0 %v5461_v60  ;;  %1836 = vmatpush1.msra.mxu1 %v5464_v59  ;;  %v7310_v60 = vld [vmem:[#allocation32_spill] sm:$0xff]  ;;  %v7311_v59 = vld [vmem:[#allocation33_spill] sm:$0xff] }
 0x64d   :  { %1766 = vmatprep.subr.mxu0 %v5467_v58  ;;  %1837 = vmatprep.subr.mxu1 %v5470_v6  ;;  %v7312_v58 = vld [vmem:[#allocation34_spill] sm:$0xff]  ;;  %v7313_v6 = vld [vmem:[#allocation35_spill] sm:$0xff] }
 0x64e   :  { %1767 = vmatpush1.msra.mxu0 %v5473_v5  ;;  %1838 = vmatpush1.msra.mxu1 %v5476_v63  ;;  %v7314_v5 = vld [vmem:[#allocation36_spill] sm:$0xff]  ;;  %v7315_v63 = vld [vmem:[#allocation37_spill] sm:$0xff] }
 0x64f   :  { %1768 = vmatprep.subr.mxu0 %v5479_v61  ;;  %1839 = vmatprep.subr.mxu1 %v5482_v14  ;;  %v7316_v61 = vld [vmem:[#allocation38_spill] sm:$0xff]  ;;  %v7317_v14 = vld [vmem:[#allocation39_spill] sm:$0xff] }
 0x650   :  { %1769 = vmatpush1.msra.mxu0 %v5485_v50  ;;  %1840 = vmatpush1.msra.mxu1 %v5488_v30  ;;  %v7318_v50 = vld [vmem:[#allocation40_spill] sm:$0xff]  ;;  %v7319_v30 = vld [vmem:[#allocation41_spill] sm:$0xff] }
 0x651   :  { %1770 = vmatprep.subr.mxu0 %v5491_v31  ;;  %1841 = vmatprep.subr.mxu1 %v5494_v33  ;;  %v7320_v31 = vld [vmem:[#allocation42_spill] sm:$0xff]  ;;  %v7321_v33 = vmov 0.0  }
 0x652   :  { %1771 = vmatpush1.msra.mxu0 %v7256_v18  ;;  %1842 = vmatpush1.msra.mxu1 %v7257_v19 }
 0x653   :  { %1772 = vmatprep.subr.mxu0 %v5503_v3  ;;  %1843 = vmatprep.subr.mxu1 %v5506_v54  ;;  %v7322_v54 = vld [vmem:[#allocation65_spill] sm:$0xff] }
 0x654   :  { %1773 = vmatpush1.msra.mxu0 %v5509_v55  ;;  %1844 = vmatpush1.msra.mxu1 %v5512_v1  ;;  %v7304_v1 = vld [vmem:[#allocation48_spill] sm:$0xff]  ;;  %v7305_v55 = vld [vmem:[#allocation46_spill] sm:$0xff] }
 0x655   :  { %1774 = vmatprep.subr.mxu0 %v5515_v34  ;;  %1845 = vmatprep.subr.mxu1 %v5518_v7  ;;  %v2005_v34 = vld [vmem:[#allocation7 + $0x1e8] sm:$0xff]  ;;  %v2007_v7 = vld [vmem:[#allocation7 + $0x1f8] sm:$0xff] }
 0x656   :  { %1775 = vmatpush1.msra.mxu0 %v5599_v20  ;;  %1846 = vmatpush1.msra.mxu1 %v5602_v21  ;;  %v7323_v21 = vld [vmem:[#allocation67_spill] sm:$0xff] }
 0x657   :  { %1776 = vmatprep.subr.mxu0 %v5605_v22  ;;  %1847 = vmatprep.subr.mxu1 %v5608_v24 }
 0x658   :  { %1777 = vmatpush1.msra.mxu0 %v5611_v25  ;;  %1848 = vmatpush1.msra.mxu1 %v5614_v27 }
 0x659   :  { %1778 = vmatprep.subr.mxu0 %v5617_v4  ;;  %1849 = vmatprep.subr.mxu1 %v5620_v35  ;;  %v7324_v4 = vld [vmem:[#allocation68_spill] sm:$0xff] }
 0x65a   :  { %1779 = vmatpush1.msra.mxu0 %v5623_v36  ;;  %1850 = vmatpush1.msra.mxu1 %v5626_v37  ;;  %v7325_v36 = vld [vmem:[#allocation66_spill] sm:$0xff] }
 0x65b   :  { %1780 = vmatprep.subr.mxu0 %v5629_v38  ;;  %1851 = vmatprep.subr.mxu1 %v5632_v39 }
 0x65c   :  { %1781 = vmatpush1.msra.mxu0 %v5635_v40  ;;  %1852 = vmatpush1.msra.mxu1 %v5638_v42 }
 0x65d   :  { %1782 = vmatprep.subr.mxu0 %v5641_v43  ;;  %1853 = vmatprep.subr.mxu1 %v5644_v44 }
 0x65e   :  { %1783 = vmatpush1.msra.mxu0 %v5647_v45  ;;  %1854 = vmatpush1.msra.mxu1 %v5650_v46 }
 0x65f   :  { %1784 = vmatprep.subr.mxu0 %v5653_v47  ;;  %1855 = vmatprep.subr.mxu1 %v5656_v48 }
 0x660   :  { %1785 = vmatpush1.msra.mxu0 %v5659_v49  ;;  %1856 = vmatpush1.msra.mxu1 %v7304_v1  ;;  %v1994_v1 = vld [vmem:[#allocation7 + $0x190] sm:$0xff] }
 0x661   :  { %1786 = vmatprep.subr.mxu0 %v7305_v55  ;;  %1857 = vmatprep.subr.mxu1 %v7306_v32  ;;  %v1989_v55 = vld [vmem:[#allocation7 + $0x168] sm:$0xff]  ;;  %v1991_v32 = vld [vmem:[#allocation7 + $0x178] sm:$0xff] }
 0x662   :  { %1787 = vmatpush1.msra.mxu0 %v7307_v0  ;;  %1858 = vmatpush1.msra.mxu1 %v7308_v41  ;;  %v1988_v0 = vld [vmem:[#allocation7 + $0x160] sm:$0xff]  ;;  %v1990_v41 = vld [vmem:[#allocation7 + $0x170] sm:$0xff] }
 0x663   :  { %1788 = vmatprep.subr.mxu0 %v7309_v62  ;;  %1859 = vmatprep.subr.mxu1 %v7310_v60  ;;  %v1985_v62 = vld [vmem:[#allocation7 + $0x148] sm:$0xff]  ;;  %v1987_v60 = vld [vmem:[#allocation7 + $0x158] sm:$0xff] }
 0x664   :  { %1789 = vmatpush1.msra.mxu0 %v7311_v59  ;;  %1860 = vmatpush1.msra.mxu1 %v7312_v58  ;;  %v1984_v59 = vld [vmem:[#allocation7 + $0x140] sm:$0xff]  ;;  %v1986_v58 = vld [vmem:[#allocation7 + $0x150] sm:$0xff] }
 0x665   :  { %1790 = vmatprep.subr.mxu0 %v7313_v6  ;;  %1861 = vmatprep.subr.mxu1 %v7314_v5  ;;  %v1981_v6 = vld [vmem:[#allocation7 + $0x128] sm:$0xff]  ;;  %v1983_v5 = vld [vmem:[#allocation7 + $0x138] sm:$0xff] }
 0x666   :  { %1791 = vmatpush1.msra.mxu0 %v7315_v63  ;;  %1862 = vmatpush1.msra.mxu1 %v7316_v61  ;;  %v1980_v63 = vld [vmem:[#allocation7 + $0x120] sm:$0xff]  ;;  %v1982_v61 = vld [vmem:[#allocation7 + $0x130] sm:$0xff] }
 0x667   :  { %1792 = vmatprep.subr.mxu0 %v7317_v14  ;;  %1863 = vmatprep.subr.mxu1 %v7318_v50  ;;  %v1977_v14 = vld [vmem:[#allocation7 + $0x108] sm:$0xff]  ;;  %v1979_v50 = vld [vmem:[#allocation7 + $0x118] sm:$0xff] }
 0x668   :  { %1793 = vmatpush1.msra.mxu0 %v7319_v30  ;;  %1864 = vmatpush1.msra.mxu1 %v7320_v31  ;;  %v1976_v30 = vld [vmem:[#allocation7 + $0x100] sm:$0xff]  ;;  %v1978_v31 = vld [vmem:[#allocation7 + $0x110] sm:$0xff] }
 0x669   :  { %1826 = vmatprep.mubr.f32.mxu0 %v7321_v33  ;;  %1897 = vmatprep.mubr.f32.mxu1 %v7321_v33 }
 0x66a   :  { %2030 = vmatprep.subr.mxu0 %v2005_v34  ;;  %2143 = vmatprep.subr.mxu1 %v2007_v7  ;;  %v1973_v34 = vld [vmem:[#allocation7 + $0xe8] sm:$0xff]  ;;  %v1975_v7 = vld [vmem:[#allocation7 + $0xf8] sm:$0xff] }
 0x709   :  { %v1649_v3 = vpop.f32.mrf.mxu0  ;;  %v1720_v24 = vpop.f32.mrf.mxu1 }
 0x70a   :  { %v1725_v18 = vadd.f32 %v1649_v3, %v7322_v54  ;;  %v1727_v37 = vadd.f32 %v1720_v24, %v7325_v36  ;;  %v1972_v3 = vld [vmem:[#allocation7 + $0xe0] sm:$0xff]  ;;  %v1974_v54 = vld [vmem:[#allocation7 + $0xf0] sm:$0xff]  ;;  %v1967_v24 = vld [vmem:[#allocation7 + $0xb8] sm:$0xff] }
 0x70b   :  { %v1651_v19 = vpop.f32.mrf.mxu0  ;;  %v1722_v27 = vpop.f32.mrf.mxu1  ;;  %v1960_v36 = vld [vmem:[#allocation7 + $0x80] sm:$0xff] }
 0x70c   :  { %v4031_v20 = vmul.f32 -1.442695, %v1725_v18  ;;  %v1726_v22 = vadd.f32 %v1651_v19, %v7323_v21  ;;  %v1728_v35 = vadd.f32 %v1722_v27, %v7324_v4  ;;  %v1969_v18 = vld [vmem:[#allocation7 + $0xc8] sm:$0xff]  ;;  %v1971_v19 = vld [vmem:[#allocation7 + $0xd8] sm:$0xff]  ;;  %v1970_v21 = vld [vmem:[#allocation7 + $0xd0] sm:$0xff] }
 0x70d   :  { %v1966_v27 = vld [vmem:[#allocation7 + $0xb0] sm:$0xff]  ;;  %v1961_v4 = vld [vmem:[#allocation7 + $0x88] sm:$0xff] }
 0x70e   :  { %4279 = vpow2.f32 %v4031_v20  ;;  %v4032_v25 = vmul.f32 -1.442695, %v1726_v22  ;;  %v4033_v38 = vmul.f32 -1.442695, %v1728_v35  ;;  %v1968_v20 = vld [vmem:[#allocation7 + $0xc0] sm:$0xff]  ;;  %v1965_v22 = vld [vmem:[#allocation7 + $0xa8] sm:$0xff] }
 0x70f   :  { %v1963_v35 = vld [vmem:[#allocation7 + $0x98] sm:$0xff] }
 0x710   :  { %4281 = vpow2.f32 %v4032_v25  ;;  %v1964_v25 = vld [vmem:[#allocation7 + $0xa0] sm:$0xff] }
 0x711   :  { %4283 = vtanh.f32 %v1727_v37  ;;  %v1962_v37 = vld [vmem:[#allocation7 + $0x90] sm:$0xff] }
 0x712   :  { %4285 = vpow2.f32 %v4033_v38  ;;  %v1957_v38 = vld [vmem:[#allocation7 + $0x68] sm:$0xff] }
 0x71b   :  { %v4280_v39 = vpop.eup %4279 }
 0x71c   :  { %v1732_v40 = vadd.f32 1.0, %v4280_v39  ;;  %v1959_v39 = vld [vmem:[#allocation7 + $0x78] sm:$0xff] }
 0x71d   :  { %v4282_v42 = vpop.eup %4281 }
 0x71e   :  { %4287 = vrcp.f32 %v1732_v40  ;;  %v1738_v43 = vadd.f32 1.0, %v4282_v42  ;;  %v4284_v44 = vpop.eup %4283  ;;  %v1956_v40 = vld [vmem:[#allocation7 + $0x60] sm:$0xff]  ;;  %v1958_v42 = vld [vmem:[#allocation7 + $0x70] sm:$0xff] }
 0x71f   :  { %v4286_v45 = vpop.eup %4285 }
 0x720   :  { %4289 = vrcp.f32 %v1738_v43  ;;  %v1745_v49 = vadd.f32 1.0, %v4286_v45  ;;  %v1953_v43 = vld [vmem:[#allocation7 + $0x48] sm:$0xff]  ;;  %v1952_v45 = vld [vmem:[#allocation7 + $0x40] sm:$0xff] }
 0x722   :  { %4291 = vrcp.f32 %v1745_v49  ;;  %v1948_v49 = vld [vmem:[#allocation7 + $0x20] sm:$0xff] }
 0x72b   :  { %v4288_v46 = vpop.eup %4287 }
 0x72c   :  { %v1749_v47 = vmul.f32 %v4288_v46, %v4284_v44  ;;  %v1955_v44 = vld [vmem:[#allocation7 + $0x58] sm:$0xff]  ;;  %v1954_v46 = vld [vmem:[#allocation7 + $0x50] sm:$0xff] }
 0x72d   :  { %v4290_v48 = vpop.eup %4289 }
 0x72e   :  { %v1748_v23 = vmul.f32 %v4290_v48, %v5800_v52  ;;  %v1993_v52 = vld [vmem:[#allocation7 + $0x188] sm:$0xff]  ;;  %v1951_v48 = vld [vmem:[#allocation7 + $0x38] sm:$0xff] }
 0x72f   :  { %v4292_v13 = vpop.eup %4291 }
 0x730   :  { %v5876_v29 = vadd.f32 %v1749_v47, %v1748_v23  ;;  %v1949_v47 = vld [vmem:[#allocation7 + $0x28] sm:$0xff]  ;;  %v1950_v23 = vld [vmem:[#allocation7 + $0x30] sm:$0xff] }
 0x732   :  { %4293 = vtanh.f32 %v5876_v29 }
 0x73f   :  { %v4294_v16 = vpop.eup %4293 }
 0x740   :  { %v5879_v26 = vmul.f32 %v4294_v16, %v4292_v13  ;;  %v1945_v13 = vld [vmem:[#allocation7 + $0x8] sm:$0xff]  ;;  %v1947_v16 = vld [vmem:[#allocation7 + $0x18] sm:$0xff] }
 0x742   :  { %1827 = vmatmul.mubr.f32.vlgmr.msra.gmra.mxu0 %v5879_v26  ;;  %1898 = vmatmul.mubr.f32.vlgmr.msra.gmra.mxu1 %v5879_v26 }
 0x743   :  { %2031 = vmatpush1.msra.mxu0 %v2004_v12  ;;  %2144 = vmatpush1.msra.mxu1 %v2006_v17  ;;  %v1944_v12 = vld [vmem:[#allocation7] sm:$0xff]  ;;  %v1946_v17 = vld [vmem:[#allocation7 + $0x10] sm:$0xff] }
 0x744   :  { %2032 = vmatprep.subr.mxu0 %v2001_v8  ;;  %2145 = vmatprep.subr.mxu1 %v2003_v15  ;;  %v7326_v8 = vld [vmem:[#allocation73_spill] sm:$0xff]  ;;  %v7327_v15 = vld [vmem:[#allocation24_spill] sm:$0xff] }
 0x745   :  { %2033 = vmatpush1.msra.mxu0 %v2000_v9  ;;  %2146 = vmatpush1.msra.mxu1 %v2002_v11  ;;  %v7328_v9 = vld [vmem:[#allocation27_spill] sm:$0xff] }
 0x746   :  { %2034 = vmatprep.subr.mxu0 %v1997_v56  ;;  %2147 = vmatprep.subr.mxu1 %v1999_v10  ;;  %v7329_v11 = vld [vmem:[#allocation47_spill] sm:$0xff]  ;;  %v5913_v10 = vld [vmem:[#allocation9 + $0x1e8] sm:$0xff] }
 0x747   :  { %2035 = vmatpush1.msra.mxu0 %v1996_v57  ;;  %2148 = vmatpush1.msra.mxu1 %v1998_v28  ;;  %v7330_v56 = vld [vmem:[#allocation43_spill] sm:$0xff]  ;;  %7331 = vst [vmem:[#allocation44_spill] sm:$0xff] %v5913_v10  ;;  %v5915_v57 = vld [vmem:[#allocation9 + $0x1f8] sm:$0xff] }
 0x748   :  { %2036 = vmatprep.subr.mxu0 %v1993_v52  ;;  %2149 = vmatprep.subr.mxu1 %v1995_v53  ;;  %7332 = vst [vmem:[#allocation49_spill] sm:$0xff] %v5915_v57  ;;  %v5921_v28 = vld [vmem:[#allocation9 + $0x1f0] sm:$0xff]  ;;  %v5927_v52 = vld [vmem:[#allocation9 + $0x1d8] sm:$0xff]  ;;  %v5931_v53 = vld [vmem:[#allocation9 + $0x1c0] sm:$0xff] }
 0x749   :  { %2037 = vmatpush1.msra.mxu0 %v1992_v51  ;;  %2150 = vmatpush1.msra.mxu1 %v1994_v1  ;;  %v5933_v51 = vld [vmem:[#allocation9 + $0x1d0] sm:$0xff]  ;;  %v5937_v1 = vld [vmem:[#allocation9 + $0x1a8] sm:$0xff] }
 0x74a   :  { %2038 = vmatprep.subr.mxu0 %v1989_v55  ;;  %2151 = vmatprep.subr.mxu1 %v1991_v32  ;;  %v5939_v55 = vld [vmem:[#allocation9 + $0x1b8] sm:$0xff]  ;;  %v5943_v32 = vld [vmem:[#allocation9 + $0x1a0] sm:$0xff] }
 0x74b   :  { %2039 = vmatpush1.msra.mxu0 %v1988_v0  ;;  %2152 = vmatpush1.msra.mxu1 %v1990_v41  ;;  %v5945_v0 = vld [vmem:[#allocation9 + $0x1b0] sm:$0xff]  ;;  %v5949_v41 = vld [vmem:[#allocation9 + $0x188] sm:$0xff] }
 0x74c   :  { %2040 = vmatprep.subr.mxu0 %v1985_v62  ;;  %2153 = vmatprep.subr.mxu1 %v1987_v60  ;;  %v5951_v62 = vld [vmem:[#allocation9 + $0x198] sm:$0xff]  ;;  %v5955_v60 = vld [vmem:[#allocation9 + $0x180] sm:$0xff] }
 0x74d   :  { %2041 = vmatpush1.msra.mxu0 %v1984_v59  ;;  %2154 = vmatpush1.msra.mxu1 %v1986_v58  ;;  %v5957_v59 = vld [vmem:[#allocation9 + $0x190] sm:$0xff]  ;;  %v5961_v58 = vld [vmem:[#allocation9 + $0x168] sm:$0xff] }
 0x74e   :  { %2042 = vmatprep.subr.mxu0 %v1981_v6  ;;  %2155 = vmatprep.subr.mxu1 %v1983_v5  ;;  %v5963_v6 = vld [vmem:[#allocation9 + $0x178] sm:$0xff]  ;;  %v5967_v5 = vld [vmem:[#allocation9 + $0x160] sm:$0xff] }
 0x74f   :  { %2043 = vmatpush1.msra.mxu0 %v1980_v63  ;;  %2156 = vmatpush1.msra.mxu1 %v1982_v61  ;;  %v5969_v63 = vld [vmem:[#allocation9 + $0x170] sm:$0xff]  ;;  %v5973_v61 = vld [vmem:[#allocation9 + $0x148] sm:$0xff] }
 0x750   :  { %2044 = vmatprep.subr.mxu0 %v1977_v14  ;;  %2157 = vmatprep.subr.mxu1 %v1979_v50  ;;  %v5975_v14 = vld [vmem:[#allocation9 + $0x158] sm:$0xff]  ;;  %v5979_v50 = vld [vmem:[#allocation9 + $0x140] sm:$0xff] }
 0x751   :  { %2045 = vmatpush1.msra.mxu0 %v1976_v30  ;;  %2158 = vmatpush1.msra.mxu1 %v1978_v31  ;;  %v5981_v30 = vld [vmem:[#allocation9 + $0x150] sm:$0xff]  ;;  %v5985_v31 = vld [vmem:[#allocation9 + $0x128] sm:$0xff] }
 0x752   :  { %2046 = vmatprep.subr.mxu0 %v1973_v34  ;;  %2159 = vmatprep.subr.mxu1 %v1975_v7  ;;  %v5987_v34 = vld [vmem:[#allocation9 + $0x138] sm:$0xff]  ;;  %v5991_v7 = vld [vmem:[#allocation9 + $0x120] sm:$0xff] }
 0x753   :  { %2047 = vmatpush1.msra.mxu0 %v1972_v3  ;;  %2160 = vmatpush1.msra.mxu1 %v1974_v54  ;;  %v5993_v3 = vld [vmem:[#allocation9 + $0x130] sm:$0xff]  ;;  %v5997_v54 = vld [vmem:[#allocation9 + $0x108] sm:$0xff] }
 0x754   :  { %2048 = vmatprep.subr.mxu0 %v1969_v18  ;;  %2161 = vmatprep.subr.mxu1 %v1971_v19  ;;  %v5999_v18 = vld [vmem:[#allocation9 + $0x118] sm:$0xff]  ;;  %v6003_v19 = vld [vmem:[#allocation9 + $0x100] sm:$0xff] }
 0x755   :  { %2049 = vmatpush1.msra.mxu0 %v1968_v20  ;;  %2162 = vmatpush1.msra.mxu1 %v1970_v21  ;;  %v6005_v20 = vld [vmem:[#allocation9 + $0x110] sm:$0xff]  ;;  %v6009_v21 = vld [vmem:[#allocation9 + $0xe8] sm:$0xff] }
 0x756   :  { %2050 = vmatprep.subr.mxu0 %v1965_v22  ;;  %2163 = vmatprep.subr.mxu1 %v1967_v24  ;;  %v6011_v22 = vld [vmem:[#allocation9 + $0xf8] sm:$0xff]  ;;  %v6015_v24 = vld [vmem:[#allocation9 + $0xe0] sm:$0xff] }
 0x757   :  { %2051 = vmatpush1.msra.mxu0 %v1964_v25  ;;  %2164 = vmatpush1.msra.mxu1 %v1966_v27  ;;  %v6017_v25 = vld [vmem:[#allocation9 + $0xf0] sm:$0xff]  ;;  %v6021_v27 = vld [vmem:[#allocation9 + $0xc8] sm:$0xff] }
 0x758   :  { %2052 = vmatprep.subr.mxu0 %v1961_v4  ;;  %2165 = vmatprep.subr.mxu1 %v1963_v35  ;;  %v6023_v4 = vld [vmem:[#allocation9 + $0xd8] sm:$0xff]  ;;  %v6027_v35 = vld [vmem:[#allocation9 + $0xc0] sm:$0xff] }
 0x759   :  { %2053 = vmatpush1.msra.mxu0 %v1960_v36  ;;  %2166 = vmatpush1.msra.mxu1 %v1962_v37  ;;  %v6029_v36 = vld [vmem:[#allocation9 + $0xd0] sm:$0xff]  ;;  %v6033_v37 = vld [vmem:[#allocation9 + $0xa8] sm:$0xff] }
 0x75a   :  { %2054 = vmatprep.subr.mxu0 %v1957_v38  ;;  %2167 = vmatprep.subr.mxu1 %v1959_v39  ;;  %v6035_v38 = vld [vmem:[#allocation9 + $0xb8] sm:$0xff]  ;;  %v6039_v39 = vld [vmem:[#allocation9 + $0xa0] sm:$0xff] }
 0x75b   :  { %2055 = vmatpush1.msra.mxu0 %v1956_v40  ;;  %2168 = vmatpush1.msra.mxu1 %v1958_v42  ;;  %v6041_v40 = vld [vmem:[#allocation9 + $0xb0] sm:$0xff]  ;;  %v6045_v42 = vld [vmem:[#allocation9 + $0x88] sm:$0xff] }
 0x75c   :  { %2056 = vmatprep.subr.mxu0 %v1953_v43  ;;  %2169 = vmatprep.subr.mxu1 %v1955_v44  ;;  %7333 = vst [vmem:[#allocation51_spill] sm:$0xff] %v6041_v40  ;;  %7334 = vst [vmem:[#allocation52_spill] sm:$0xff] %v6045_v42  ;;  %v6047_v43 = vld [vmem:[#allocation9 + $0x98] sm:$0xff]  ;;  %v6051_v44 = vld [vmem:[#allocation9 + $0x80] sm:$0xff] }
 0x75d   :  { %2057 = vmatpush1.msra.mxu0 %v1952_v45  ;;  %2170 = vmatpush1.msra.mxu1 %v1954_v46  ;;  %7335 = vst [vmem:[#allocation50_spill] sm:$0xff] %v6047_v43  ;;  %7336 = vst [vmem:[#allocation53_spill] sm:$0xff] %v6051_v44  ;;  %v6053_v45 = vld [vmem:[#allocation9 + $0x90] sm:$0xff]  ;;  %v6057_v46 = vld [vmem:[#allocation9 + $0x68] sm:$0xff] }
 0x75e   :  { %2058 = vmatprep.subr.mxu0 %v1949_v47  ;;  %2171 = vmatprep.subr.mxu1 %v1951_v48  ;;  %7337 = vst [vmem:[#allocation55_spill] sm:$0xff] %v6053_v45  ;;  %7338 = vst [vmem:[#allocation56_spill] sm:$0xff] %v6057_v46  ;;  %v6059_v47 = vld [vmem:[#allocation9 + $0x78] sm:$0xff]  ;;  %v6063_v48 = vld [vmem:[#allocation9 + $0x60] sm:$0xff] }
 0x75f   :  { %2059 = vmatpush1.msra.mxu0 %v1948_v49  ;;  %2172 = vmatpush1.msra.mxu1 %v1950_v23  ;;  %7339 = vst [vmem:[#allocation54_spill] sm:$0xff] %v6059_v47  ;;  %7340 = vst [vmem:[#allocation22_spill] sm:$0xff] %v6063_v48  ;;  %v6065_v49 = vld [vmem:[#allocation9 + $0x70] sm:$0xff]  ;;  %v6069_v23 = vld [vmem:[#allocation9 + $0x48] sm:$0xff] }
 0x760   :  { %2060 = vmatprep.subr.mxu0 %v1945_v13  ;;  %2173 = vmatprep.subr.mxu1 %v1947_v16  ;;  %7341 = vst [vmem:[#allocation23_spill] sm:$0xff] %v6065_v49  ;;  %7342 = vst [vmem:[#allocation57_spill] sm:$0xff] %v6069_v23  ;;  %v6071_v13 = vld [vmem:[#allocation9 + $0x58] sm:$0xff]  ;;  %v6075_v16 = vld [vmem:[#allocation9 + $0x40] sm:$0xff] }
 0x761   :  { %2061 = vmatpush1.msra.mxu0 %v1944_v12  ;;  %2094 = vmatprep.mubr.f32.mxu0 %v7321_v33  ;;  %7343 = vst [vmem:[#allocation59_spill] sm:$0xff] %v6071_v13  ;;  %7344 = vst [vmem:[#allocation60_spill] sm:$0xff] %v6075_v16  ;;  %v6077_v12 = vld [vmem:[#allocation9 + $0x50] sm:$0xff] }
 0x762   :  { %2174 = vmatpush1.msra.mxu1 %v1946_v17  ;;  %2207 = vmatprep.mubr.f32.mxu1 %v7321_v33  ;;  %7345 = vst [vmem:[#allocation58_spill] sm:$0xff] %v6077_v12  ;;  %v6081_v17 = vld [vmem:[#allocation9 + $0x28] sm:$0xff] }
 0x763   :  { %2095 = vmatmul.mubr.f32.vlgmr.msra.gmra.mxu0 %v7326_v8  ;;  %2208 = vmatmul.mubr.f32.vlgmr.msra.gmra.mxu1 %v7326_v8  ;;  %7346 = vst [vmem:[#allocation25_spill] sm:$0xff] %v6081_v17  ;;  %v6083_v8 = vld [vmem:[#allocation9 + $0x38] sm:$0xff] }
 0x764   :  { %2100 = vmatprep.mubr.f32.mxu0 %v7321_v33  ;;  %2213 = vmatprep.mubr.f32.mxu1 %v7321_v33  ;;  %7347 = vst [vmem:[#allocation26_spill] sm:$0xff] %v6083_v8 }
 0x765   :  { %2356 = vmatprep.subr.mxu0 %v5913_v10  ;;  %2427 = vmatprep.subr.mxu1 %v5915_v57 }
 0x766   :  { %2428 = vmatpush1.msra.mxu1 %v5921_v28 }
 0x767   :  { %2101 = vmatmul.mubr.f32.gmra.mxu0 %v7327_v15  ;;  %2214 = vmatmul.mubr.f32.gmra.mxu1 %v7327_v15  ;;  %v6087_v15 = vld [vmem:[#allocation9 + $0x20] sm:$0xff] }
 0x768   :  { %2106 = vmatprep.mubr.f32.mxu0 %v7321_v33  ;;  %2219 = vmatprep.mubr.f32.mxu1 %v7321_v33  ;;  %7348 = vst [vmem:[#allocation61_spill] sm:$0xff] %v6087_v15 }
 0x769   :  { %2429 = vmatprep.subr.mxu1 %v5927_v52 }
 0x76a   :  { %2430 = vmatpush1.msra.mxu1 %v5933_v51 }
 0x76b   :  { %2107 = vmatmul.mubr.f32.gmra.mxu0 %v7328_v9  ;;  %2220 = vmatmul.mubr.f32.gmra.mxu1 %v7328_v9  ;;  %v6089_v9 = vld [vmem:[#allocation9 + $0x30] sm:$0xff] }
 0x76c   :  { %2112 = vmatprep.mubr.f32.mxu0 %v7321_v33  ;;  %2225 = vmatprep.mubr.f32.mxu1 %v7321_v33  ;;  %7349 = vst [vmem:[#allocation63_spill] sm:$0xff] %v6089_v9 }
 0x76d   :  { %2431 = vmatprep.subr.mxu1 %v5939_v55 }
 0x76e   :  { %2432 = vmatpush1.msra.mxu1 %v5945_v0 }
 0x76f   :  { %2113 = vmatmul.mubr.f32.gmra.mxu0 %v7329_v11  ;;  %2226 = vmatmul.mubr.f32.gmra.mxu1 %v7329_v11  ;;  %v6093_v11 = vld [vmem:[#allocation9 + $0x8] sm:$0xff] }
 0x770   :  { %2118 = vmatprep.mubr.f32.mxu0 %v7321_v33  ;;  %2231 = vmatprep.mubr.f32.mxu1 %v7321_v33  ;;  %7350 = vst [vmem:[#allocation64_spill] sm:$0xff] %v6093_v11 }
 0x771   :  { %2433 = vmatprep.subr.mxu1 %v5951_v62 }
 0x772   :  { %2434 = vmatpush1.msra.mxu1 %v5957_v59 }
 0x773   :  { %2119 = vmatmul.mubr.f32.gmra.mxu0 %v7330_v56  ;;  %2232 = vmatmul.mubr.f32.gmra.mxu1 %v7330_v56  ;;  %v6095_v56 = vld [vmem:[#allocation9 + $0x18] sm:$0xff] }
 0x774   :  { %2124 = vmatprep.mubr.f32.mxu0 %v7321_v33  ;;  %2237 = vmatprep.mubr.f32.mxu1 %v7321_v33  ;;  %7351 = vst [vmem:[#allocation62_spill] sm:$0xff] %v6095_v56 }
 0x775   :  { %2435 = vmatprep.subr.mxu1 %v5963_v6 }
 0x776   :  { %2436 = vmatpush1.msra.mxu1 %v5969_v63 }
 0x777   :  { %2125 = vmatmul.mubr.f32.gmra.mxu0 %v5803_v2  ;;  %2238 = vmatmul.mubr.f32.gmra.mxu1 %v5803_v2  ;;  %v5919_v2 = vld [vmem:[#allocation9 + $0x1e0] sm:$0xff] }
 0x778   :  { %2130 = vmatprep.mubr.f32.mxu0 %v7321_v33  ;;  %2243 = vmatprep.mubr.f32.mxu1 %v7321_v33 }
 0x779   :  { %2357 = vmatpush1.msra.mxu0 %v5919_v2  ;;  %2437 = vmatprep.subr.mxu1 %v5975_v14 }
 0x77a   :  { %2438 = vmatpush1.msra.mxu1 %v5981_v30 }
 0x77b   :  { %2131 = vmatmul.mubr.f32.gmra.mxu0 %v5879_v26  ;;  %2244 = vmatmul.mubr.f32.gmra.mxu1 %v5879_v26  ;;  %v5925_v26 = vld [vmem:[#allocation9 + $0x1c8] sm:$0xff] }
 0x77c   :  { %2136 = vmatprep.mubr.f32.mxu0 %v7321_v33  ;;  %2249 = vmatprep.mubr.f32.mxu1 %v7321_v33 }
 0x77d   :  { %2358 = vmatprep.subr.mxu0 %v5925_v26  ;;  %2439 = vmatprep.subr.mxu1 %v5987_v34 }
 0x77e   :  { %2359 = vmatpush1.msra.mxu0 %v5931_v53  ;;  %2440 = vmatpush1.msra.mxu1 %v5993_v3 }
 0x77f   :  { %2360 = vmatprep.subr.mxu0 %v5937_v1  ;;  %2441 = vmatprep.subr.mxu1 %v5999_v18 }
 0x780   :  { %2361 = vmatpush1.msra.mxu0 %v5943_v32  ;;  %2442 = vmatpush1.msra.mxu1 %v6005_v20 }
 0x781   :  { %2362 = vmatprep.subr.mxu0 %v5949_v41  ;;  %2443 = vmatprep.subr.mxu1 %v6011_v22 }
 0x782   :  { %2363 = vmatpush1.msra.mxu0 %v5955_v60  ;;  %2444 = vmatpush1.msra.mxu1 %v6017_v25 }
 0x783   :  { %2364 = vmatprep.subr.mxu0 %v5961_v58  ;;  %2445 = vmatprep.subr.mxu1 %v6023_v4 }
 0x784   :  { %2365 = vmatpush1.msra.mxu0 %v5967_v5  ;;  %2446 = vmatpush1.msra.mxu1 %v6029_v36 }
 0x785   :  { %2366 = vmatprep.subr.mxu0 %v5973_v61  ;;  %2447 = vmatprep.subr.mxu1 %v6035_v38 }
 0x786   :  { %2367 = vmatpush1.msra.mxu0 %v5979_v50  ;;  %2448 = vmatpush1.msra.mxu1 %v6041_v40 }
 0x787   :  { %2368 = vmatprep.subr.mxu0 %v5985_v31  ;;  %2449 = vmatprep.subr.mxu1 %v6047_v43 }
 0x788   :  { %2369 = vmatpush1.msra.mxu0 %v5991_v7  ;;  %2450 = vmatpush1.msra.mxu1 %v6053_v45 }
 0x789   :  { %2370 = vmatprep.subr.mxu0 %v5997_v54  ;;  %2451 = vmatprep.subr.mxu1 %v6059_v47  ;;  %v7356_v47 = vld [vmem:[#allocation72_spill] sm:$0xff] }
 0x78a   :  { %2371 = vmatpush1.msra.mxu0 %v6003_v19  ;;  %2452 = vmatpush1.msra.mxu1 %v6065_v49 }
 0x78b   :  { %2372 = vmatprep.subr.mxu0 %v6009_v21  ;;  %2453 = vmatprep.subr.mxu1 %v6071_v13 }
 0x78c   :  { %2373 = vmatpush1.msra.mxu0 %v6015_v24  ;;  %2454 = vmatpush1.msra.mxu1 %v6077_v12  ;;  %v6097_v12 = vld [vmem:[#allocation9] sm:$0xff] }
 0x78d   :  { %2374 = vmatprep.subr.mxu0 %v6021_v27  ;;  %2455 = vmatprep.subr.mxu1 %v6083_v8  ;;  %7352 = vst [vmem:[#allocation48_spill] sm:$0xff] %v6097_v12 }
 0x78e   :  { %2375 = vmatpush1.msra.mxu0 %v6027_v35  ;;  %2456 = vmatpush1.msra.mxu1 %v6089_v9 }
 0x78f   :  { %2376 = vmatprep.subr.mxu0 %v6033_v37  ;;  %2457 = vmatprep.subr.mxu1 %v6095_v56 }
 0x790   :  { %2377 = vmatpush1.msra.mxu0 %v6039_v39 }
 0x791   :  { %2378 = vmatprep.subr.mxu0 %v6045_v42 }
 0x792   :  { %2379 = vmatpush1.msra.mxu0 %v6051_v44 }
 0x793   :  { %2380 = vmatprep.subr.mxu0 %v6057_v46  ;;  %v7357_v46 = vld [vmem:[#allocation70_spill] sm:$0xff] }
 0x794   :  { %2381 = vmatpush1.msra.mxu0 %v6063_v48 }
 0x795   :  { %2382 = vmatprep.subr.mxu0 %v6069_v23  ;;  %v7355_v23 = vld [vmem:[#allocation71_spill] sm:$0xff] }
 0x796   :  { %2383 = vmatpush1.msra.mxu0 %v6075_v16 }
 0x797   :  { %2384 = vmatprep.subr.mxu0 %v6081_v17  ;;  %v6101_v17 = vld [vmem:[#allocation9 + $0x10] sm:$0xff] }
 0x798   :  { %2385 = vmatpush1.msra.mxu0 %v6087_v15  ;;  %7353 = vst [vmem:[#allocation46_spill] sm:$0xff] %v6101_v17  ;;  %2458 = vmatpush1.msra.mxu1 %v6101_v17  ;;  %v7354_v15 = vld [vmem:[#allocation69_spill] sm:$0xff] }
 0x799   :  { %2386 = vmatprep.subr.mxu0 %v6093_v11  ;;  %2601 = vmatprep.subr.mxu1 %v5915_v57 }
 0x79a   :  { %2387 = vmatpush1.msra.mxu0 %v6097_v12 }
 0x79b   :  { %2530 = vmatprep.subr.mxu0 %v5913_v10 }
 0x802   :  { %v1828_v9 = vpop.f32.mrf.mxu0  ;;  %v1899_v11 = vpop.f32.mrf.mxu1 }
 0x803   :  { %v1904_v8 = vadd.f32 %v1828_v9, %v7354_v15  ;;  %v1906_v17 = vadd.f32 %v1899_v11, %v7357_v46  ;;  %v7364_v11 = vld [vmem:[#allocation57_spill] sm:$0xff] }
 0x804   :  { %v1830_v16 = vpop.f32.mrf.mxu0  ;;  %v1901_v48 = vpop.f32.mrf.mxu1 }
 0x805   :  { %v4034_v13 = vmul.f32 -1.442695, %v1904_v8  ;;  %v1905_v49 = vadd.f32 %v1830_v16, %v7355_v23  ;;  %v1907_v12 = vadd.f32 %v1901_v48, %v7356_v47 }
 0x807   :  { %4295 = vpow2.f32 %v4034_v13  ;;  %v4035_v56 = vmul.f32 -1.442695, %v1905_v49  ;;  %v4036_v45 = vmul.f32 -1.442695, %v1907_v12  ;;  %v7362_v12 = vld [vmem:[#allocation22_spill] sm:$0xff] }
 0x809   :  { %4297 = vpow2.f32 %v4035_v56 }
 0x80a   :  { %4299 = vtanh.f32 %v1906_v17  ;;  %v7363_v17 = vld [vmem:[#allocation23_spill] sm:$0xff] }
 0x80b   :  { %4301 = vpow2.f32 %v4036_v45  ;;  %v7361_v45 = vld [vmem:[#allocation54_spill] sm:$0xff] }
 0x814   :  { %v4296_v10 = vpop.eup %4295 }
 0x815   :  { %v1911_v44 = vadd.f32 1.0, %v4296_v10 }
 0x816   :  { %v4298_v57 = vpop.eup %4297 }
 0x817   :  { %4303 = vrcp.f32 %v1911_v44  ;;  %v1917_v15 = vadd.f32 1.0, %v4298_v57  ;;  %v4300_v8 = vpop.eup %4299  ;;  %v7359_v57 = vld [vmem:[#allocation55_spill] sm:$0xff]  ;;  %v7360_v44 = vld [vmem:[#allocation56_spill] sm:$0xff] }
 0x818   :  { %v4302_v23 = vpop.eup %4301 }
 0x819   :  { %4305 = vrcp.f32 %v1917_v15  ;;  %v1924_v9 = vadd.f32 1.0, %v4302_v23  ;;  %v7365_v15 = vld [vmem:[#allocation59_spill] sm:$0xff]  ;;  %v7367_v23 = vld [vmem:[#allocation58_spill] sm:$0xff] }
 0x81b   :  { %4307 = vrcp.f32 %v1924_v9  ;;  %v7371_v9 = vld [vmem:[#allocation63_spill] sm:$0xff] }
 0x824   :  { %v4304_v13 = vpop.eup %4303 }
 0x825   :  { %v1928_v16 = vmul.f32 %v4304_v13, %v4300_v8  ;;  %v7366_v8 = vld [vmem:[#allocation60_spill] sm:$0xff]  ;;  %v7368_v13 = vld [vmem:[#allocation25_spill] sm:$0xff] }
 0x826   :  { %v4306_v49 = vpop.eup %4305 }
 0x827   :  { %v1927_v56 = vmul.f32 %v4306_v49, %v5876_v29  ;;  %v7358_v29 = vld [vmem:[#allocation53_spill] sm:$0xff] }
 0x828   :  { %v4308_v46 = vpop.eup %4307  ;;  %v7370_v49 = vld [vmem:[#allocation61_spill] sm:$0xff] }
 0x829   :  { %v1929_v47 = vadd.f32 %v1928_v16, %v1927_v56  ;;  %v7369_v16 = vld [vmem:[#allocation26_spill] sm:$0xff]  ;;  %v7372_v56 = vld [vmem:[#allocation64_spill] sm:$0xff] }
 0x82b   :  { %4309 = vtanh.f32 %v1929_v47  ;;  %1935 = vst [vmem:[#allocation16] sm:$0xff] %v1929_v47  ;;  %v7373_v47 = vld [vmem:[#allocation62_spill] sm:$0xff] }
 0x838   :  { %v4310_v10 = vpop.eup %4309 }
 0x839   :  { %v1931_v48 = vmul.f32 %v4310_v10, %v4308_v46  ;;  %v7374_v46 = vld [vmem:[#allocation48_spill] sm:$0xff]  ;;  %v7375_v10 = vld [vmem:[#allocation46_spill] sm:$0xff] }
 0x83b   :  { %2137 = vmatmul.mubr.f32.gmra.mxu0 %v1931_v48  ;;  %1934 = vst [vmem:[#allocation14] sm:$0xff] %v1931_v48  ;;  %2250 = vmatmul.mubr.f32.gmra.mxu1 %v1931_v48  ;;  %v7376_v48 = vld [vmem:[#allocation44_spill] sm:$0xff] }
 0x83c   :  { %2420 = vmatprep.mubr.f32.mxu0 %v7321_v33  ;;  %2491 = vmatprep.mubr.f32.mxu1 %v7321_v33 }
 0x83f   :  { %2421 = vmatmul.mubr.f32.vlgmr.msra.gmra.mxu0 %v7321_v33  ;;  %2492 = vmatmul.mubr.f32.vlgmr.msra.gmra.mxu1 %v7321_v33 }
 0x840   :  { %2531 = vmatpush1.msra.mxu0 %v5919_v2  ;;  %2602 = vmatpush1.msra.mxu1 %v5921_v28 }
 0x841   :  { %2532 = vmatprep.subr.mxu0 %v5925_v26  ;;  %2603 = vmatprep.subr.mxu1 %v5927_v52 }
 0x842   :  { %2533 = vmatpush1.msra.mxu0 %v5931_v53  ;;  %2604 = vmatpush1.msra.mxu1 %v5933_v51 }
 0x843   :  { %2534 = vmatprep.subr.mxu0 %v5937_v1  ;;  %2605 = vmatprep.subr.mxu1 %v5939_v55 }
 0x844   :  { %2535 = vmatpush1.msra.mxu0 %v5943_v32  ;;  %2606 = vmatpush1.msra.mxu1 %v5945_v0 }
 0x845   :  { %2536 = vmatprep.subr.mxu0 %v5949_v41  ;;  %2607 = vmatprep.subr.mxu1 %v5951_v62 }
 0x846   :  { %2537 = vmatpush1.msra.mxu0 %v5955_v60  ;;  %2608 = vmatpush1.msra.mxu1 %v5957_v59 }
 0x847   :  { %2538 = vmatprep.subr.mxu0 %v5961_v58  ;;  %2609 = vmatprep.subr.mxu1 %v5963_v6 }
 0x848   :  { %2539 = vmatpush1.msra.mxu0 %v5967_v5  ;;  %2610 = vmatpush1.msra.mxu1 %v5969_v63 }
 0x849   :  { %2540 = vmatprep.subr.mxu0 %v5973_v61  ;;  %2611 = vmatprep.subr.mxu1 %v5975_v14 }
 0x84a   :  { %2541 = vmatpush1.msra.mxu0 %v5979_v50  ;;  %2612 = vmatpush1.msra.mxu1 %v5981_v30 }
 0x84b   :  { %2542 = vmatprep.subr.mxu0 %v5985_v31  ;;  %2613 = vmatprep.subr.mxu1 %v5987_v34 }
 0x84c   :  { %2543 = vmatpush1.msra.mxu0 %v5991_v7  ;;  %2614 = vmatpush1.msra.mxu1 %v5993_v3 }
 0x84d   :  { %2544 = vmatprep.subr.mxu0 %v5997_v54  ;;  %2615 = vmatprep.subr.mxu1 %v5999_v18 }
 0x84e   :  { %2545 = vmatpush1.msra.mxu0 %v6003_v19  ;;  %2616 = vmatpush1.msra.mxu1 %v6005_v20 }
 0x84f   :  { %2546 = vmatprep.subr.mxu0 %v6009_v21  ;;  %2617 = vmatprep.subr.mxu1 %v6011_v22 }
 0x850   :  { %2547 = vmatpush1.msra.mxu0 %v6015_v24  ;;  %2618 = vmatpush1.msra.mxu1 %v6017_v25 }
 0x851   :  { %2548 = vmatprep.subr.mxu0 %v6021_v27  ;;  %2619 = vmatprep.subr.mxu1 %v6023_v4 }
 0x852   :  { %2549 = vmatpush1.msra.mxu0 %v6027_v35  ;;  %2620 = vmatpush1.msra.mxu1 %v6029_v36 }
 0x853   :  { %2550 = vmatprep.subr.mxu0 %v6033_v37  ;;  %2621 = vmatprep.subr.mxu1 %v6035_v38 }
 0x854   :  { %2551 = vmatpush1.msra.mxu0 %v6039_v39  ;;  %2622 = vmatpush1.msra.mxu1 %v6041_v40 }
 0x855   :  { %2552 = vmatprep.subr.mxu0 %v6045_v42  ;;  %2623 = vmatprep.subr.mxu1 %v6047_v43 }
 0x856   :  { %2553 = vmatpush1.msra.mxu0 %v7358_v29  ;;  %2624 = vmatpush1.msra.mxu1 %v7359_v57 }
 0x857   :  { %2554 = vmatprep.subr.mxu0 %v7360_v44  ;;  %2625 = vmatprep.subr.mxu1 %v7361_v45 }
 0x858   :  { %2555 = vmatpush1.msra.mxu0 %v7362_v12  ;;  %2626 = vmatpush1.msra.mxu1 %v7363_v17 }
 0x859   :  { %2556 = vmatprep.subr.mxu0 %v7364_v11  ;;  %2627 = vmatprep.subr.mxu1 %v7365_v15 }
 0x85a   :  { %2557 = vmatpush1.msra.mxu0 %v7366_v8  ;;  %2628 = vmatpush1.msra.mxu1 %v7367_v23 }
 0x85b   :  { %2558 = vmatprep.subr.mxu0 %v7368_v13  ;;  %2629 = vmatprep.subr.mxu1 %v7369_v16  ;;  %v7377_v13 = vld [vmem:[#allocation49_spill] sm:$0xff]  ;;  %v2096_v16 = vpop.f32.mrf.mxu0 }
 0x85c   :  { %2559 = vmatpush1.msra.mxu0 %v7370_v49  ;;  %2630 = vmatpush1.msra.mxu1 %v7371_v9  ;;  %v2209_v49 = vpop.f32.mrf.mxu1 }
 0x85d   :  { %2560 = vmatprep.subr.mxu0 %v7372_v56  ;;  %2631 = vmatprep.subr.mxu1 %v7373_v47  ;;  %v2098_v23 = vpop.f32.mrf.mxu0 }
 0x85e   :  { %2561 = vmatpush1.msra.mxu0 %v7374_v46  ;;  %2594 = vmatprep.mubr.f32.mxu0 %v7321_v33  ;;  %v2211_v9 = vpop.f32.mrf.mxu1 }
 0x85f   :  { %2632 = vmatpush1.msra.mxu1 %v7375_v10  ;;  %2665 = vmatprep.mubr.f32.mxu1 %v7321_v33  ;;  %v6182_v8 = vpop.f32.mrf.mxu0 }
 0x860   :  { %2704 = vmatprep.subr.mxu0 %v7376_v48  ;;  %2775 = vmatprep.subr.mxu1 %v7377_v13  ;;  %7378 = vst [vmem:[#allocation28_spill] sm:$0xff] %v6182_v8  ;;  %v6184_v56 = vpop.f32.mrf.mxu1 }
 0x861   :  { %7379 = vst [vmem:[#allocation29_spill] sm:$0xff] %v6184_v56  ;;  %v6186_v47 = vpop.f32.mrf.mxu0 }
 0x862   :  { %7380 = vst [vmem:[#allocation30_spill] sm:$0xff] %v6186_v47  ;;  %v6188_v46 = vpop.f32.mrf.mxu1 }
 0x863   :  { %7381 = vst [vmem:[#allocation31_spill] sm:$0xff] %v6188_v46  ;;  %v6190_v15 = vpop.f32.mrf.mxu0 }
 0x864   :  { %7382 = vst [vmem:[#allocation32_spill] sm:$0xff] %v6190_v15  ;;  %v6192_v10 = vpop.f32.mrf.mxu1 }
 0x865   :  { %7383 = vst [vmem:[#allocation33_spill] sm:$0xff] %v6192_v10  ;;  %v6194_v33 = vpop.f32.mrf.mxu0 }
 0x866   :  { %7384 = vst [vmem:[#allocation34_spill] sm:$0xff] %v6194_v33  ;;  %v6196_v48 = vpop.f32.mrf.mxu1 }
 0x867   :  { %7385 = vst [vmem:[#allocation35_spill] sm:$0xff] %v6196_v48  ;;  %v6198_v13 = vpop.f32.mrf.mxu0 }
 0x868   :  { %7386 = vst [vmem:[#allocation36_spill] sm:$0xff] %v6198_v13  ;;  %v6200_v11 = vpop.f32.mrf.mxu1 }
 0x869   :  { %7387 = vst [vmem:[#allocation37_spill] sm:$0xff] %v6200_v11  ;;  %v6202_v17 = vpop.f32.mrf.mxu0 }
 0x86a   :  { %7388 = vst [vmem:[#allocation38_spill] sm:$0xff] %v6202_v17  ;;  %v6204_v8 = vpop.f32.mrf.mxu1 }
 0x86b   :  { %7389 = vst [vmem:[#allocation39_spill] sm:$0xff] %v6204_v8  ;;  %v6206_v56 = vpop.f32.mrf.mxu0 }
 0x86c   :  { %7390 = vst [vmem:[#allocation40_spill] sm:$0xff] %v6206_v56  ;;  %v6208_v47 = vpop.f32.mrf.mxu1 }
 0x86d   :  { %7391 = vst [vmem:[#allocation41_spill] sm:$0xff] %v6208_v47  ;;  %v6210_v46 = vpop.f32.mrf.mxu0  ;;  %v2008_v47 = vld [vmem:[%s6928_s6] sm:$0xf] }
 0x86e   :  { %7392 = vst [vmem:[#allocation42_spill] sm:$0xff] %v6210_v46  ;;  %v6212_v15 = vpop.f32.mrf.mxu1  ;;  %v7401_v46 = vld [vmem:[#allocation45_spill] sm:$0xff] }
 0x86f   :  { %7393 = vst [vmem:[#allocation65_spill] sm:$0xff] %v6212_v15  ;;  %v6214_v10 = vpop.f32.mrf.mxu0  ;;  %v7402_v15 = vsub.s32 0, %v7401_v46 }
 0x870   :  { %7394 = vst [vmem:[#allocation67_spill] sm:$0xff] %v6214_v10  ;;  %v6216_v33 = vpop.f32.mrf.mxu1 }
 0x871   :  { %7395 = vst [vmem:[#allocation68_spill] sm:$0xff] %v6216_v33  ;;  %v6218_v48 = vpop.f32.mrf.mxu0  ;;  %v6233_v8 = vrot.slane %v2008_v47, %v7402_v15 }
 0x872   :  { %7396 = vst [vmem:[#allocation66_spill] sm:$0xff] %v6218_v48  ;;  %v6220_v13 = vpop.f32.mrf.mxu1 }
 0x873   :  { %7397 = vst [vmem:[#allocation73_spill] sm:$0xff] %v6220_v13  ;;  %v6222_v11 = vpop.f32.mrf.mxu0  ;;  %7403 = vst [vmem:[#allocation43_spill] sm:$0xff] %v6233_v8  ;;  %v7406_v13 = vsub.s32 1, %v7401_v46  ;;  %v2097_v12 = vadd.f32 %v2096_v16, %v6233_v8 }
 0x874   :  { %7398 = vst [vmem:[#allocation24_spill] sm:$0xff] %v6222_v11  ;;  %v6224_v17 = vpop.f32.mrf.mxu1 }
 0x875   :  { %7399 = vst [vmem:[#allocation27_spill] sm:$0xff] %v6224_v17  ;;  %v6229_v56 = vpop.f32.mrf.mxu0  ;;  %v6241_v48 = vrot.slane %v2008_v47, %v7406_v13  ;;  %v7410_v13 = vsub.s32 3, %v7401_v46 }
 0x876   :  { %7400 = vst [vmem:[#allocation47_spill] sm:$0xff] %v6229_v56  ;;  %v6235_v10 = vpop.f32.mrf.mxu1 }
 0x877   :  { %7404 = vst [vmem:[#allocation69_spill] sm:$0xff] %v6235_v10  ;;  %v2099_v56 = vadd.f32 %v2098_v23, %v6241_v48  ;;  %v6253_v42 = vrot.slane %v2008_v47, %v7410_v13 }
 0x879   :  { %7411 = vst [vmem:[#allocation74_spill] sm:$0xff] %v6253_v42  ;;  %v2212_v16 = vadd.f32 %v2211_v9, %v6253_v42 }
 0x8fb   :  { %v6237_v33 = vpop.f32.mrf.mxu0  ;;  %v6243_v11 = vpop.f32.mrf.mxu1 }
 0x8fc   :  { %7405 = vst [vmem:[#allocation71_spill] sm:$0xff] %v6237_v33  ;;  %7407 = vst [vmem:[#allocation72_spill] sm:$0xff] %v6243_v11 }
 0x8fd   :  { %v6245_v17 = vpop.f32.mrf.mxu0  ;;  %v6249_v44 = vpop.f32.mrf.mxu1 }
 0x8fe   :  { %7408 = vst [vmem:[#allocation70_spill] sm:$0xff] %v6245_v17  ;;  %7409 = vst [vmem:[#allocation45_spill] sm:$0xff] %v6249_v44  ;;  %v7412_v17 = vsub.s32 2, %v7401_v46 }
 0x8ff   :  { %v2422_v45 = vpop.f32.mrf.mxu0  ;;  %v2493_v33 = vpop.f32.mrf.mxu1 }
 0x900   :  { %v2498_v15 = vadd.f32 %v2422_v45, %v2097_v12  ;;  %v6258_v23 = vrot.slane %v2008_v47, %v7412_v17 }
 0x901   :  { %v2424_v57 = vpop.f32.mrf.mxu0  ;;  %v2495_v11 = vpop.f32.mrf.mxu1 }
 0x902   :  { %v4037_v10 = vmul.f32 -1.442695, %v2498_v15  ;;  %v2499_v29 = vadd.f32 %v2424_v57, %v2099_v56  ;;  %v2501_v44 = vadd.f32 %v2495_v11, %v2212_v16  ;;  %v2210_v45 = vadd.f32 %v2209_v49, %v6258_v23  ;;  %v7414_v16 = vld [vmem:[#allocation50_spill] sm:$0xff] }
 0x904   :  { %4311 = vpow2.f32 %v4037_v10  ;;  %v4038_v43 = vmul.f32 -1.442695, %v2499_v29  ;;  %v4039_v12 = vmul.f32 -1.442695, %v2501_v44  ;;  %v2500_v56 = vadd.f32 %v2493_v33, %v2210_v45  ;;  %v7415_v45 = vld [vmem:[#allocation53_spill] sm:$0xff] }
 0x906   :  { %4313 = vpow2.f32 %v4038_v43 }
 0x907   :  { %4315 = vpow2.f32 %v4039_v12  ;;  %v7416_v12 = vld [vmem:[#allocation55_spill] sm:$0xff] }
 0x911   :  { %v4312_v57 = vpop.eup %4311 }
 0x912   :  { %v2505_v10 = vadd.f32 1.0, %v4312_v57  ;;  %v7417_v57 = vld [vmem:[#allocation56_spill] sm:$0xff] }
 0x913   :  { %v4314_v29 = vpop.eup %4313 }
 0x914   :  { %4317 = vrcp.f32 %v2505_v10  ;;  %v2511_v15 = vadd.f32 1.0, %v4314_v29  ;;  %v4316_v43 = vpop.eup %4315  ;;  %v7419_v10 = vld [vmem:[#allocation22_spill] sm:$0xff]  ;;  %v7420_v29 = vld [vmem:[#allocation23_spill] sm:$0xff] }
 0x915   :  { %4319 = vtanh.f32 %v2500_v56  ;;  %v2518_v46 = vadd.f32 1.0, %v4316_v43  ;;  %v7418_v56 = vld [vmem:[#allocation54_spill] sm:$0xff]  ;;  %v7422_v43 = vld [vmem:[#allocation59_spill] sm:$0xff] }
 0x916   :  { %4321 = vrcp.f32 %v2511_v15  ;;  %v7421_v15 = vld [vmem:[#allocation57_spill] sm:$0xff] }
 0x917   :  { %4323 = vrcp.f32 %v2518_v46  ;;  %v7425_v46 = vld [vmem:[#allocation25_spill] sm:$0xff] }
 0x921   :  { %v4318_v13 = vpop.eup %4317 }
 0x922   :  { %v4320_v9 = vpop.eup %4319 }
 0x923   :  { %v4322_v42 = vpop.eup %4321  ;;  %v2522_v47 = vmul.f32 %v4320_v9, %v4318_v13  ;;  %v7423_v13 = vld [vmem:[#allocation60_spill] sm:$0xff]  ;;  %v7424_v9 = vld [vmem:[#allocation58_spill] sm:$0xff] }
 0x924   :  { %v2521_v17 = vmul.f32 0.0, %v4322_v42  ;;  %v4324_v33 = vpop.eup %4323  ;;  %v7413_v42 = vld [vmem:[#allocation52_spill] sm:$0xff] }
 0x926   :  { %v6261_v11 = vadd.f32 %v2522_v47, %v2521_v17  ;;  %v7426_v17 = vld [vmem:[#allocation26_spill] sm:$0xff]  ;;  %v7427_v47 = vld [vmem:[#allocation61_spill] sm:$0xff] }
 0x928   :  { %4325 = vtanh.f32 %v6261_v11 }
 0x935   :  { %v4326_v44 = vpop.eup %4325 }
 0x936   :  { %v2525_v49 = vmul.f32 %v4326_v44, %v4324_v33  ;;  %v7428_v33 = vld [vmem:[#allocation63_spill] sm:$0xff]  ;;  %v7429_v44 = vld [vmem:[#allocation64_spill] sm:$0xff] }
 0x938   :  { %2595 = vmatmul.mubr.f32.vlgmr.msra.gmra.mxu0 %v2525_v49  ;;  %2666 = vmatmul.mubr.f32.vlgmr.msra.gmra.mxu1 %v2525_v49  ;;  %v7430_v49 = vld [vmem:[#allocation62_spill] sm:$0xff] }
 0x939   :  { %2705 = vmatpush1.msra.mxu0 %v5919_v2  ;;  %2776 = vmatpush1.msra.mxu1 %v5921_v28 }
 0x93a   :  { %2706 = vmatprep.subr.mxu0 %v5925_v26  ;;  %2777 = vmatprep.subr.mxu1 %v5927_v52 }
 0x93b   :  { %2707 = vmatpush1.msra.mxu0 %v5931_v53  ;;  %2778 = vmatpush1.msra.mxu1 %v5933_v51 }
 0x93c   :  { %2708 = vmatprep.subr.mxu0 %v5937_v1  ;;  %2779 = vmatprep.subr.mxu1 %v5939_v55 }
 0x93d   :  { %2709 = vmatpush1.msra.mxu0 %v5943_v32  ;;  %2780 = vmatpush1.msra.mxu1 %v5945_v0 }
 0x93e   :  { %2710 = vmatprep.subr.mxu0 %v5949_v41  ;;  %2781 = vmatprep.subr.mxu1 %v5951_v62 }
 0x93f   :  { %2711 = vmatpush1.msra.mxu0 %v5955_v60  ;;  %2782 = vmatpush1.msra.mxu1 %v5957_v59 }
 0x940   :  { %2712 = vmatprep.subr.mxu0 %v5961_v58  ;;  %2783 = vmatprep.subr.mxu1 %v5963_v6 }
 0x941   :  { %2713 = vmatpush1.msra.mxu0 %v5967_v5  ;;  %2784 = vmatpush1.msra.mxu1 %v5969_v63 }
 0x942   :  { %2714 = vmatprep.subr.mxu0 %v5973_v61  ;;  %2785 = vmatprep.subr.mxu1 %v5975_v14 }
 0x943   :  { %2715 = vmatpush1.msra.mxu0 %v5979_v50  ;;  %2786 = vmatpush1.msra.mxu1 %v5981_v30 }
 0x944   :  { %2716 = vmatprep.subr.mxu0 %v5985_v31  ;;  %2787 = vmatprep.subr.mxu1 %v5987_v34 }
 0x945   :  { %2717 = vmatpush1.msra.mxu0 %v5991_v7  ;;  %2788 = vmatpush1.msra.mxu1 %v5993_v3 }
 0x946   :  { %2718 = vmatprep.subr.mxu0 %v5997_v54  ;;  %2789 = vmatprep.subr.mxu1 %v5999_v18 }
 0x947   :  { %2719 = vmatpush1.msra.mxu0 %v6003_v19  ;;  %2790 = vmatpush1.msra.mxu1 %v6005_v20 }
 0x948   :  { %2720 = vmatprep.subr.mxu0 %v6009_v21  ;;  %2791 = vmatprep.subr.mxu1 %v6011_v22 }
 0x949   :  { %2721 = vmatpush1.msra.mxu0 %v6015_v24  ;;  %2792 = vmatpush1.msra.mxu1 %v6017_v25 }
 0x94a   :  { %2722 = vmatprep.subr.mxu0 %v6021_v27  ;;  %2793 = vmatprep.subr.mxu1 %v6023_v4 }
 0x94b   :  { %2723 = vmatpush1.msra.mxu0 %v6027_v35  ;;  %2794 = vmatpush1.msra.mxu1 %v6029_v36 }
 0x94c   :  { %2724 = vmatprep.subr.mxu0 %v6033_v37  ;;  %2795 = vmatprep.subr.mxu1 %v6035_v38 }
 0x94d   :  { %2725 = vmatpush1.msra.mxu0 %v6039_v39  ;;  %2796 = vmatpush1.msra.mxu1 %v6041_v40 }
 0x94e   :  { %2726 = vmatprep.subr.mxu0 %v7413_v42  ;;  %2797 = vmatprep.subr.mxu1 %v7414_v16  ;;  %v7440_v16 = vld [vmem:[#allocation29_spill] sm:$0xff] }
 0x94f   :  { %2727 = vmatpush1.msra.mxu0 %v7415_v45  ;;  %2798 = vmatpush1.msra.mxu1 %v7416_v12  ;;  %v7438_v12 = vld [vmem:[#allocation74_spill] sm:$0xff] }
 0x950   :  { %2728 = vmatprep.subr.mxu0 %v7417_v57  ;;  %2799 = vmatprep.subr.mxu1 %v7418_v56 }
 0x951   :  { %2729 = vmatpush1.msra.mxu0 %v7419_v10  ;;  %2800 = vmatpush1.msra.mxu1 %v7420_v29  ;;  %v7431_v29 = vld [vmem:[#allocation48_spill] sm:$0xff] }
 0x952   :  { %2730 = vmatprep.subr.mxu0 %v7421_v15  ;;  %2801 = vmatprep.subr.mxu1 %v7422_v43  ;;  %v7432_v15 = vmov 0.0   ;;  %v7433_v43 = vld [vmem:[#allocation46_spill] sm:$0xff] }
 0x953   :  { %2731 = vmatpush1.msra.mxu0 %v7423_v13  ;;  %2802 = vmatpush1.msra.mxu1 %v7424_v9  ;;  %v7434_v9 = vld [vmem:[#allocation44_spill] sm:$0xff] }
 0x954   :  { %2732 = vmatprep.subr.mxu0 %v7425_v46  ;;  %2803 = vmatprep.subr.mxu1 %v7426_v17  ;;  %v7435_v46 = vld [vmem:[#allocation49_spill] sm:$0xff] }
 0x955   :  { %2733 = vmatpush1.msra.mxu0 %v7427_v47  ;;  %2804 = vmatpush1.msra.mxu1 %v7428_v33  ;;  %v7436_v47 = vld [vmem:[#allocation28_spill] sm:$0xff] }
 0x956   :  { %2734 = vmatprep.subr.mxu0 %v7429_v44  ;;  %2805 = vmatprep.subr.mxu1 %v7430_v49  ;;  %v2103_v17 = vadd.f32 %v7436_v47, %v6233_v8  ;;  %v7437_v44 = vld [vmem:[#allocation30_spill] sm:$0xff]  ;;  %v2216_v47 = vadd.f32 %v7440_v16, %v6258_v23 }
 0x957   :  { %2735 = vmatpush1.msra.mxu0 %v7431_v29  ;;  %2768 = vmatprep.mubr.f32.mxu0 %v7432_v15  ;;  %v2105_v13 = vadd.f32 %v7437_v44, %v6241_v48 }
 0x958   :  { %2806 = vmatpush1.msra.mxu1 %v7433_v43  ;;  %2839 = vmatprep.mubr.f32.mxu1 %v7432_v15 }
 0x959   :  { %2878 = vmatprep.subr.mxu0 %v7434_v9  ;;  %2949 = vmatprep.subr.mxu1 %v7435_v46  ;;  %v7439_v9 = vld [vmem:[#allocation31_spill] sm:$0xff] }
 0x95a   :  { %v2218_v45 = vadd.f32 %v7439_v9, %v7438_v12 }
 0x9f8   :  { %v2596_v33 = vpop.f32.mrf.mxu0  ;;  %v2667_v57 = vpop.f32.mrf.mxu1 }
 0x9f9   :  { %v2672_v49 = vadd.f32 %v2596_v33, %v2103_v17  ;;  %v2674_v8 = vadd.f32 %v2667_v57, %v2216_v47  ;;  %v7455_v57 = vld [vmem:[#allocation26_spill] sm:$0xff]  ;;  %v7458_v47 = vld [vmem:[#allocation64_spill] sm:$0xff] }
 0x9fa   :  { %v2598_v10 = vpop.f32.mrf.mxu0  ;;  %v2669_v15 = vpop.f32.mrf.mxu1 }
 0x9fb   :  { %v4040_v29 = vmul.f32 -1.442695, %v2672_v49  ;;  %v2673_v56 = vadd.f32 %v2598_v10, %v2105_v13  ;;  %v2675_v46 = vadd.f32 %v2669_v15, %v2218_v45  ;;  %v7457_v49 = vld [vmem:[#allocation63_spill] sm:$0xff] }
 0x9fd   :  { %4327 = vpow2.f32 %v4040_v29  ;;  %v4041_v43 = vmul.f32 -1.442695, %v2673_v56  ;;  %v4042_v42 = vmul.f32 -1.442695, %v2675_v46  ;;  %v7456_v46 = vld [vmem:[#allocation61_spill] sm:$0xff] }
 0x9ff   :  { %4329 = vpow2.f32 %v4041_v43 }
 0xa00   :  { %4331 = vtanh.f32 %v2674_v8 }
 0xa01   :  { %4333 = vpow2.f32 %v4042_v42  ;;  %v7454_v42 = vld [vmem:[#allocation25_spill] sm:$0xff] }
 0xa0a   :  { %v4328_v40 = vpop.eup %4327 }
 0xa0b   :  { %v2679_v44 = vadd.f32 1.0, %v4328_v40 }
 0xa0c   :  { %v4330_v17 = vpop.eup %4329 }
 0xa0d   :  { %4335 = vrcp.f32 %v2679_v44  ;;  %v2685_v10 = vadd.f32 1.0, %v4330_v17  ;;  %v4332_v56 = vpop.eup %4331  ;;  %v7459_v44 = vld [vmem:[#allocation62_spill] sm:$0xff]  ;;  %v7460_v17 = vld [vmem:[#allocation48_spill] sm:$0xff] }
 0xa0e   :  { %v4334_v29 = vpop.eup %4333 }
 0xa0f   :  { %4337 = vrcp.f32 %v2685_v10  ;;  %v2692_v9 = vadd.f32 1.0, %v4334_v29  ;;  %v7461_v10 = vmov 0.0   ;;  %v7463_v29 = vld [vmem:[#allocation44_spill] sm:$0xff] }
 0xa11   :  { %4339 = vrcp.f32 %v2692_v9 }
 0xa1a   :  { %v4336_v43 = vpop.eup %4335 }
 0xa1b   :  { %v2696_v13 = vmul.f32 %v4336_v43, %v4332_v56  ;;  %v7462_v56 = vld [vmem:[#allocation46_spill] sm:$0xff]  ;;  %v7464_v43 = vld [vmem:[#allocation49_spill] sm:$0xff] }
 0xa1c   :  { %v4338_v33 = vpop.eup %4337 }
 0xa1d   :  { %v2695_v45 = vmul.f32 %v4338_v33, %v6261_v11  ;;  %v7453_v11 = vld [vmem:[#allocation58_spill] sm:$0xff]  ;;  %v7466_v33 = vld [vmem:[#allocation32_spill] sm:$0xff] }
 0xa1e   :  { %v4340_v40 = vpop.eup %4339 }
 0xa1f   :  { %v6339_v15 = vadd.f32 %v2696_v13, %v2695_v45  ;;  %v7465_v13 = vld [vmem:[#allocation43_spill] sm:$0xff] }
 0xa20   :  { %v2109_v9 = vadd.f32 %v7466_v33, %v7465_v13 }
 0xa21   :  { %4341 = vtanh.f32 %v6339_v15 }
 0xa2e   :  { %v4342_v8 = vpop.eup %4341 }
 0xa2f   :  { %v2699_v16 = vmul.f32 %v4342_v8, %v4340_v40  ;;  %v7467_v40 = vld [vmem:[#allocation34_spill] sm:$0xff] }
 0xa30   :  { %v2111_v8 = vadd.f32 %v7467_v40, %v6241_v48 }
 0xa31   :  { %2769 = vmatmul.mubr.f32.vlgmr.msra.gmra.mxu0 %v2699_v16  ;;  %2840 = vmatmul.mubr.f32.vlgmr.msra.gmra.mxu1 %v2699_v16 }
 0xa32   :  { %2879 = vmatpush1.msra.mxu0 %v5919_v2  ;;  %2950 = vmatpush1.msra.mxu1 %v5921_v28  ;;  %v7441_v2 = vld [vmem:[#allocation51_spill] sm:$0xff]  ;;  %v7442_v28 = vld [vmem:[#allocation52_spill] sm:$0xff] }
 0xa33   :  { %2880 = vmatprep.subr.mxu0 %v5925_v26  ;;  %2951 = vmatprep.subr.mxu1 %v5927_v52  ;;  %v7443_v26 = vld [vmem:[#allocation50_spill] sm:$0xff]  ;;  %v7444_v52 = vld [vmem:[#allocation53_spill] sm:$0xff] }
 0xa34   :  { %2881 = vmatpush1.msra.mxu0 %v5931_v53  ;;  %2952 = vmatpush1.msra.mxu1 %v5933_v51  ;;  %v7445_v53 = vld [vmem:[#allocation55_spill] sm:$0xff]  ;;  %v7446_v51 = vld [vmem:[#allocation56_spill] sm:$0xff] }
 0xa35   :  { %2882 = vmatprep.subr.mxu0 %v5937_v1  ;;  %2953 = vmatprep.subr.mxu1 %v5939_v55  ;;  %v7447_v1 = vld [vmem:[#allocation54_spill] sm:$0xff] }
 0xa36   :  { %2883 = vmatpush1.msra.mxu0 %v5943_v32  ;;  %2954 = vmatpush1.msra.mxu1 %v5945_v0  ;;  %v7448_v55 = vld [vmem:[#allocation22_spill] sm:$0xff]  ;;  %v7449_v32 = vld [vmem:[#allocation23_spill] sm:$0xff]  ;;  %v7450_v0 = vld [vmem:[#allocation57_spill] sm:$0xff] }
 0xa37   :  { %2884 = vmatprep.subr.mxu0 %v5949_v41  ;;  %2955 = vmatprep.subr.mxu1 %v5951_v62  ;;  %v7451_v41 = vld [vmem:[#allocation59_spill] sm:$0xff]  ;;  %v7452_v62 = vld [vmem:[#allocation60_spill] sm:$0xff] }
 0xa38   :  { %2885 = vmatpush1.msra.mxu0 %v5955_v60  ;;  %2956 = vmatpush1.msra.mxu1 %v5957_v59 }
 0xa39   :  { %2886 = vmatprep.subr.mxu0 %v5961_v58  ;;  %2957 = vmatprep.subr.mxu1 %v5963_v6 }
 0xa3a   :  { %2887 = vmatpush1.msra.mxu0 %v5967_v5  ;;  %2958 = vmatpush1.msra.mxu1 %v5969_v63 }
 0xa3b   :  { %2888 = vmatprep.subr.mxu0 %v5973_v61  ;;  %2959 = vmatprep.subr.mxu1 %v5975_v14 }
 0xa3c   :  { %2889 = vmatpush1.msra.mxu0 %v5979_v50  ;;  %2960 = vmatpush1.msra.mxu1 %v5981_v30 }
 0xa3d   :  { %2890 = vmatprep.subr.mxu0 %v5985_v31  ;;  %2961 = vmatprep.subr.mxu1 %v5987_v34 }
 0xa3e   :  { %2891 = vmatpush1.msra.mxu0 %v5991_v7  ;;  %2962 = vmatpush1.msra.mxu1 %v5993_v3 }
 0xa3f   :  { %2892 = vmatprep.subr.mxu0 %v5997_v54  ;;  %2963 = vmatprep.subr.mxu1 %v5999_v18 }
 0xa40   :  { %2893 = vmatpush1.msra.mxu0 %v6003_v19  ;;  %2964 = vmatpush1.msra.mxu1 %v6005_v20 }
 0xa41   :  { %2894 = vmatprep.subr.mxu0 %v6009_v21  ;;  %2965 = vmatprep.subr.mxu1 %v6011_v22 }
 0xa42   :  { %2895 = vmatpush1.msra.mxu0 %v6015_v24  ;;  %2966 = vmatpush1.msra.mxu1 %v6017_v25 }
 0xa43   :  { %2896 = vmatprep.subr.mxu0 %v6021_v27  ;;  %2967 = vmatprep.subr.mxu1 %v6023_v4 }
 0xa44   :  { %2897 = vmatpush1.msra.mxu0 %v6027_v35  ;;  %2968 = vmatpush1.msra.mxu1 %v6029_v36 }
 0xa45   :  { %2898 = vmatprep.subr.mxu0 %v6033_v37  ;;  %2969 = vmatprep.subr.mxu1 %v6035_v38 }
 0xa46   :  { %2899 = vmatpush1.msra.mxu0 %v6039_v39  ;;  %2970 = vmatpush1.msra.mxu1 %v7441_v2 }
 0xa47   :  { %2900 = vmatprep.subr.mxu0 %v7442_v28  ;;  %2971 = vmatprep.subr.mxu1 %v7443_v26 }
 0xa48   :  { %2901 = vmatpush1.msra.mxu0 %v7444_v52  ;;  %2972 = vmatpush1.msra.mxu1 %v7445_v53 }
 0xa49   :  { %2902 = vmatprep.subr.mxu0 %v7446_v51  ;;  %2973 = vmatprep.subr.mxu1 %v7447_v1 }
 0xa4a   :  { %2903 = vmatpush1.msra.mxu0 %v7448_v55  ;;  %2974 = vmatpush1.msra.mxu1 %v7449_v32 }
 0xa4b   :  { %2904 = vmatprep.subr.mxu0 %v7450_v0  ;;  %2975 = vmatprep.subr.mxu1 %v7451_v41 }
 0xa4c   :  { %2905 = vmatpush1.msra.mxu0 %v7452_v62  ;;  %2976 = vmatpush1.msra.mxu1 %v7453_v11 }
 0xa4d   :  { %2906 = vmatprep.subr.mxu0 %v7454_v42  ;;  %2977 = vmatprep.subr.mxu1 %v7455_v57  ;;  %v7469_v57 = vld [vmem:[#allocation33_spill] sm:$0xff] }
 0xa4e   :  { %2907 = vmatpush1.msra.mxu0 %v7456_v46  ;;  %2978 = vmatpush1.msra.mxu1 %v7457_v49  ;;  %v2222_v33 = vadd.f32 %v7469_v57, %v6258_v23 }
 0xa4f   :  { %2908 = vmatprep.subr.mxu0 %v7458_v47  ;;  %2979 = vmatprep.subr.mxu1 %v7459_v44 }
 0xa50   :  { %2909 = vmatpush1.msra.mxu0 %v7460_v17  ;;  %2942 = vmatprep.mubr.f32.mxu0 %v7461_v10 }
 0xa51   :  { %2980 = vmatpush1.msra.mxu1 %v7462_v56  ;;  %3013 = vmatprep.mubr.f32.mxu1 %v7461_v10 }
 0xa52   :  { %3052 = vmatprep.subr.mxu0 %v7463_v29  ;;  %3123 = vmatprep.subr.mxu1 %v7464_v43  ;;  %v7468_v29 = vld [vmem:[#allocation35_spill] sm:$0xff] }
 0xa53   :  { %v2224_v46 = vadd.f32 %v7468_v29, %v7438_v12  ;;  %v6426_v29 = vld [vmem:[#allocation9 + $0x1c8] sm:$0xff] }
 0xaf1   :  { %v2770_v45 = vpop.f32.mrf.mxu0  ;;  %v2841_v49 = vpop.f32.mrf.mxu1 }
 0xaf2   :  { %v2846_v16 = vadd.f32 %v2770_v45, %v2109_v9  ;;  %v2848_v13 = vadd.f32 %v2841_v49, %v2222_v33  ;;  %v6435_v33 = vld [vmem:[#allocation9 + $0x1d0] sm:$0xff] }
 0xaf3   :  { %v2772_v44 = vpop.f32.mrf.mxu0  ;;  %v2843_v10 = vpop.f32.mrf.mxu1 }
 0xaf4   :  { %v4043_v17 = vmul.f32 -1.442695, %v2846_v16  ;;  %v2847_v47 = vadd.f32 %v2772_v44, %v2111_v8  ;;  %v2849_v43 = vadd.f32 %v2843_v10, %v2224_v46 }
 0xaf6   :  { %4343 = vpow2.f32 %v4043_v17  ;;  %v4044_v56 = vmul.f32 -1.442695, %v2847_v47  ;;  %v4045_v42 = vmul.f32 -1.442695, %v2849_v43  ;;  %v6432_v43 = vld [vmem:[#allocation9 + $0x1c0] sm:$0xff] }
 0xaf8   :  { %4345 = vpow2.f32 %v4044_v56 }
 0xaf9   :  { %4347 = vtanh.f32 %v2848_v13  ;;  %v6423_v13 = vld [vmem:[#allocation9 + $0x1f0] sm:$0xff] }
 0xafa   :  { %4349 = vpow2.f32 %v4045_v42  ;;  %v6420_v42 = vld [vmem:[#allocation9 + $0x1e0] sm:$0xff] }
 0xb03   :  { %v4344_v11 = vpop.eup %4343 }
 0xb04   :  { %v2853_v40 = vadd.f32 1.0, %v4344_v11 }
 0xb05   :  { %v4346_v9 = vpop.eup %4345 }
 0xb06   :  { %4351 = vrcp.f32 %v2853_v40  ;;  %v2859_v44 = vadd.f32 1.0, %v4346_v9  ;;  %v4348_v47 = vpop.eup %4347  ;;  %v6438_v40 = vld [vmem:[#allocation9 + $0x1a8] sm:$0xff]  ;;  %v6441_v9 = vld [vmem:[#allocation9 + $0x1b8] sm:$0xff] }
 0xb07   :  { %v4350_v17 = vpop.eup %4349 }
 0xb08   :  { %4353 = vrcp.f32 %v2859_v44  ;;  %v2866_v16 = vadd.f32 1.0, %v4350_v17  ;;  %v6444_v44 = vld [vmem:[#allocation9 + $0x1a0] sm:$0xff]  ;;  %v6450_v17 = vld [vmem:[#allocation9 + $0x188] sm:$0xff] }
 0xb0a   :  { %4355 = vrcp.f32 %v2866_v16 }
 0xb13   :  { %v4352_v56 = vpop.eup %4351 }
 0xb14   :  { %v2870_v45 = vmul.f32 %v4352_v56, %v4348_v47  ;;  %v6447_v47 = vld [vmem:[#allocation9 + $0x1b0] sm:$0xff]  ;;  %v6453_v56 = vld [vmem:[#allocation9 + $0x198] sm:$0xff] }
 0xb15   :  { %v4354_v8 = vpop.eup %4353 }
 0xb16   :  { %v2869_v46 = vmul.f32 %v4354_v8, %v6339_v15  ;;  %v6429_v15 = vld [vmem:[#allocation9 + $0x1d8] sm:$0xff] }
 0xb17   :  { %v4356_v11 = vpop.eup %4355 }
 0xb18   :  { %v6417_v10 = vadd.f32 %v2870_v45, %v2869_v46 }
 0xb1a   :  { %4357 = vtanh.f32 %v6417_v10 }
 0xb27   :  { %v4358_v57 = vpop.eup %4357 }
 0xb28   :  { %v2873_v49 = vmul.f32 %v4358_v57, %v4356_v11 }
 0xb2a   :  { %2943 = vmatmul.mubr.f32.vlgmr.msra.gmra.mxu0 %v2873_v49  ;;  %3014 = vmatmul.mubr.f32.vlgmr.msra.gmra.mxu1 %v2873_v49  ;;  %v6541_v49 = vld [vmem:[#allocation9 + $0x190] sm:$0xff] }
 0xb2b   :  { %3053 = vmatpush1.msra.mxu0 %v6420_v42  ;;  %3124 = vmatpush1.msra.mxu1 %v6423_v13 }
 0xb2c   :  { %3054 = vmatprep.subr.mxu0 %v6426_v29  ;;  %3125 = vmatprep.subr.mxu1 %v6429_v15 }
 0xb2d   :  { %3055 = vmatpush1.msra.mxu0 %v6432_v43  ;;  %3126 = vmatpush1.msra.mxu1 %v6435_v33 }
 0xb2e   :  { %3056 = vmatprep.subr.mxu0 %v6438_v40  ;;  %3127 = vmatprep.subr.mxu1 %v6441_v9 }
 0xb2f   :  { %3057 = vmatpush1.msra.mxu0 %v6444_v44  ;;  %3128 = vmatpush1.msra.mxu1 %v6447_v47 }
 0xb30   :  { %3058 = vmatprep.subr.mxu0 %v6450_v17  ;;  %3129 = vmatprep.subr.mxu1 %v6453_v56 }
 0xb31   :  { %3059 = vmatpush1.msra.mxu0 %v5955_v60  ;;  %3130 = vmatpush1.msra.mxu1 %v5957_v59  ;;  %v7470_v60 = vld [vmem:[#allocation58_spill] sm:$0xff]  ;;  %v7471_v59 = vld [vmem:[#allocation25_spill] sm:$0xff] }
 0xb32   :  { %3060 = vmatprep.subr.mxu0 %v5961_v58  ;;  %3131 = vmatprep.subr.mxu1 %v5963_v6  ;;  %v7472_v58 = vld [vmem:[#allocation26_spill] sm:$0xff]  ;;  %v7473_v6 = vld [vmem:[#allocation61_spill] sm:$0xff] }
 0xb33   :  { %3061 = vmatpush1.msra.mxu0 %v5967_v5  ;;  %3132 = vmatpush1.msra.mxu1 %v5969_v63  ;;  %v7474_v5 = vld [vmem:[#allocation63_spill] sm:$0xff]  ;;  %v7475_v63 = vld [vmem:[#allocation64_spill] sm:$0xff] }
 0xb34   :  { %3062 = vmatprep.subr.mxu0 %v5973_v61  ;;  %3133 = vmatprep.subr.mxu1 %v5975_v14  ;;  %v7476_v61 = vld [vmem:[#allocation62_spill] sm:$0xff]  ;;  %v7477_v14 = vld [vmem:[#allocation48_spill] sm:$0xff] }
 0xb35   :  { %3063 = vmatpush1.msra.mxu0 %v5979_v50  ;;  %3134 = vmatpush1.msra.mxu1 %v5981_v30  ;;  %v7478_v50 = vmov 0.0   ;;  %v7479_v30 = vld [vmem:[#allocation46_spill] sm:$0xff] }
 0xb36   :  { %3064 = vmatprep.subr.mxu0 %v5985_v31  ;;  %3135 = vmatprep.subr.mxu1 %v5987_v34  ;;  %v6508_v31 = vld [vmem:[#allocation9 + $0x1e8] sm:$0xff]  ;;  %v6511_v34 = vld [vmem:[#allocation9 + $0x1f8] sm:$0xff] }
 0xb37   :  { %3065 = vmatpush1.msra.mxu0 %v5991_v7  ;;  %3136 = vmatpush1.msra.mxu1 %v5993_v3  ;;  %7480 = vst [vmem:[#allocation28_spill] sm:$0xff] %v6508_v31  ;;  %7481 = vst [vmem:[#allocation30_spill] sm:$0xff] %v6511_v34  ;;  %v7482_v7 = vld [vmem:[#allocation43_spill] sm:$0xff]  ;;  %v7483_v3 = vld [vmem:[#allocation36_spill] sm:$0xff] }
 0xb38   :  { %3066 = vmatprep.subr.mxu0 %v5997_v54  ;;  %3137 = vmatprep.subr.mxu1 %v5999_v18  ;;  %v2115_v54 = vadd.f32 %v7483_v3, %v7482_v7  ;;  %v6571_v3 = vld [vmem:[#allocation9 + $0x138] sm:$0xff] }
 0xb39   :  { %3067 = vmatpush1.msra.mxu0 %v6003_v19  ;;  %3138 = vmatpush1.msra.mxu1 %v6005_v20  ;;  %v7484_v19 = vld [vmem:[#allocation38_spill] sm:$0xff] }
 0xb3a   :  { %3068 = vmatprep.subr.mxu0 %v6009_v21  ;;  %3139 = vmatprep.subr.mxu1 %v6011_v22  ;;  %v2117_v20 = vadd.f32 %v7484_v19, %v6241_v48  ;;  %v6580_v19 = vld [vmem:[#allocation9 + $0x108] sm:$0xff] }
 0xb3b   :  { %3069 = vmatpush1.msra.mxu0 %v6015_v24  ;;  %3140 = vmatpush1.msra.mxu1 %v6017_v25 }
 0xb3c   :  { %3070 = vmatprep.subr.mxu0 %v6021_v27  ;;  %3141 = vmatprep.subr.mxu1 %v6023_v4 }
 0xb3d   :  { %3071 = vmatpush1.msra.mxu0 %v6027_v35  ;;  %3142 = vmatpush1.msra.mxu1 %v6029_v36  ;;  %v7485_v36 = vld [vmem:[#allocation39_spill] sm:$0xff] }
 0xb3e   :  { %3072 = vmatprep.subr.mxu0 %v6033_v37  ;;  %3143 = vmatprep.subr.mxu1 %v6035_v38  ;;  %v2230_v37 = vadd.f32 %v7485_v36, %v7438_v12  ;;  %v6607_v36 = vld [vmem:[#allocation9 + $0xd8] sm:$0xff] }
 0xb3f   :  { %3073 = vmatpush1.msra.mxu0 %v6039_v39  ;;  %3144 = vmatpush1.msra.mxu1 %v7441_v2  ;;  %v7486_v39 = vld [vmem:[#allocation37_spill] sm:$0xff] }
 0xb40   :  { %3074 = vmatprep.subr.mxu0 %v7442_v28  ;;  %3145 = vmatprep.subr.mxu1 %v7443_v26  ;;  %v2228_v2 = vadd.f32 %v7486_v39, %v6258_v23  ;;  %v6616_v39 = vld [vmem:[#allocation9 + $0xa8] sm:$0xff] }
 0xb41   :  { %3075 = vmatpush1.msra.mxu0 %v7444_v52  ;;  %3146 = vmatpush1.msra.mxu1 %v7445_v53 }
 0xb42   :  { %3076 = vmatprep.subr.mxu0 %v7446_v51  ;;  %3147 = vmatprep.subr.mxu1 %v7447_v1 }
 0xb43   :  { %3077 = vmatpush1.msra.mxu0 %v7448_v55  ;;  %3148 = vmatpush1.msra.mxu1 %v7449_v32 }
 0xb44   :  { %3078 = vmatprep.subr.mxu0 %v7450_v0  ;;  %3149 = vmatprep.subr.mxu1 %v7451_v41 }
 0xb45   :  { %3079 = vmatpush1.msra.mxu0 %v7452_v62  ;;  %3150 = vmatpush1.msra.mxu1 %v7470_v60  ;;  %v6544_v60 = vld [vmem:[#allocation9 + $0x168] sm:$0xff] }
 0xb46   :  { %3080 = vmatprep.subr.mxu0 %v7471_v59  ;;  %3151 = vmatprep.subr.mxu1 %v7472_v58  ;;  %v6547_v59 = vld [vmem:[#allocation9 + $0x178] sm:$0xff]  ;;  %v6550_v58 = vld [vmem:[#allocation9 + $0x160] sm:$0xff] }
 0xb47   :  { %3081 = vmatpush1.msra.mxu0 %v7473_v6  ;;  %3152 = vmatpush1.msra.mxu1 %v7474_v5  ;;  %v6553_v6 = vld [vmem:[#allocation9 + $0x170] sm:$0xff]  ;;  %v6556_v5 = vld [vmem:[#allocation9 + $0x148] sm:$0xff] }
 0xb48   :  { %3082 = vmatprep.subr.mxu0 %v7475_v63  ;;  %3153 = vmatprep.subr.mxu1 %v7476_v61  ;;  %v6559_v63 = vld [vmem:[#allocation9 + $0x158] sm:$0xff]  ;;  %v6562_v61 = vld [vmem:[#allocation9 + $0x140] sm:$0xff] }
 0xb49   :  { %3083 = vmatpush1.msra.mxu0 %v7477_v14  ;;  %3116 = vmatprep.mubr.f32.mxu0 %v7478_v50  ;;  %v6565_v14 = vld [vmem:[#allocation9 + $0x150] sm:$0xff] }
 0xb4a   :  { %3154 = vmatpush1.msra.mxu1 %v7479_v30  ;;  %3187 = vmatprep.mubr.f32.mxu1 %v7478_v50  ;;  %v6568_v30 = vld [vmem:[#allocation9 + $0x128] sm:$0xff] }
 0xb4b   :  { %3226 = vmatprep.subr.mxu0 %v6508_v31  ;;  %3297 = vmatprep.subr.mxu1 %v6511_v34 }
 0xbea   :  { %v2944_v18 = vpop.f32.mrf.mxu0  ;;  %v3015_v27 = vpop.f32.mrf.mxu1 }
 0xbeb   :  { %v3020_v21 = vadd.f32 %v2944_v18, %v2115_v54  ;;  %v3022_v28 = vadd.f32 %v3015_v27, %v2228_v2  ;;  %v6574_v54 = vld [vmem:[#allocation9 + $0x120] sm:$0xff]  ;;  %v6577_v18 = vld [vmem:[#allocation9 + $0x130] sm:$0xff]  ;;  %v6619_v2 = vld [vmem:[#allocation9 + $0xb8] sm:$0xff] }
 0xbec   :  { %v2946_v22 = vpop.f32.mrf.mxu0  ;;  %v3017_v35 = vpop.f32.mrf.mxu1  ;;  %v6598_v27 = vld [vmem:[#allocation9 + $0xe0] sm:$0xff] }
 0xbed   :  { %v4046_v24 = vmul.f32 -1.442695, %v3020_v21  ;;  %v3021_v25 = vadd.f32 %v2946_v22, %v2117_v20  ;;  %v3023_v38 = vadd.f32 %v3017_v35, %v2230_v37  ;;  %v6583_v20 = vld [vmem:[#allocation9 + $0x118] sm:$0xff]  ;;  %v6586_v21 = vld [vmem:[#allocation9 + $0x100] sm:$0xff]  ;;  %v6589_v22 = vld [vmem:[#allocation9 + $0x110] sm:$0xff] }
 0xbee   :  { %v6604_v35 = vld [vmem:[#allocation9 + $0xc8] sm:$0xff]  ;;  %v6610_v37 = vld [vmem:[#allocation9 + $0xc0] sm:$0xff] }
 0xbef   :  { %4359 = vpow2.f32 %v4046_v24  ;;  %v4047_v4 = vmul.f32 -1.442695, %v3021_v25  ;;  %v4048_v26 = vmul.f32 -1.442695, %v3023_v38  ;;  %v6592_v24 = vld [vmem:[#allocation9 + $0xe8] sm:$0xff]  ;;  %v6595_v25 = vld [vmem:[#allocation9 + $0xf8] sm:$0xff] }
 0xbf0   :  { %v6613_v38 = vld [vmem:[#allocation9 + $0xd0] sm:$0xff] }
 0xbf1   :  { %4361 = vpow2.f32 %v4047_v4  ;;  %v6601_v4 = vld [vmem:[#allocation9 + $0xf0] sm:$0xff] }
 0xbf2   :  { %4363 = vtanh.f32 %v3022_v28  ;;  %v6622_v28 = vld [vmem:[#allocation9 + $0xa0] sm:$0xff] }
 0xbf3   :  { %4365 = vpow2.f32 %v4048_v26  ;;  %v6625_v26 = vld [vmem:[#allocation9 + $0xb0] sm:$0xff] }
 0xbf4   :  { %7487 = vst [vmem:[#allocation74_spill] sm:$0xff] %v6625_v26 }
 0xbfc   :  { %v4360_v52 = vpop.eup %4359 }
 0xbfd   :  { %v3027_v53 = vadd.f32 1.0, %v4360_v52  ;;  %v6628_v52 = vld [vmem:[#allocation9 + $0x88] sm:$0xff] }
 0xbfe   :  { %v4362_v51 = vpop.eup %4361  ;;  %7488 = vst [vmem:[#allocation31_spill] sm:$0xff] %v6628_v52 }
 0xbff   :  { %4367 = vrcp.f32 %v3027_v53  ;;  %v3033_v1 = vadd.f32 1.0, %v4362_v51  ;;  %v4364_v55 = vpop.eup %4363  ;;  %v6631_v53 = vld [vmem:[#allocation9 + $0x98] sm:$0xff]  ;;  %v6634_v51 = vld [vmem:[#allocation9 + $0x80] sm:$0xff] }
 0xc00   :  { %v4366_v32 = vpop.eup %4365  ;;  %7489 = vst [vmem:[#allocation29_spill] sm:$0xff] %v6631_v53  ;;  %7490 = vst [vmem:[#allocation51_spill] sm:$0xff] %v6634_v51 }
 0xc01   :  { %4369 = vrcp.f32 %v3033_v1  ;;  %v3040_v45 = vadd.f32 1.0, %v4366_v32  ;;  %v6637_v1 = vld [vmem:[#allocation9 + $0x90] sm:$0xff]  ;;  %v6643_v32 = vld [vmem:[#allocation9 + $0x78] sm:$0xff] }
 0xc02   :  { %7491 = vst [vmem:[#allocation52_spill] sm:$0xff] %v6637_v1  ;;  %7493 = vst [vmem:[#allocation53_spill] sm:$0xff] %v6643_v32 }
 0xc03   :  { %4371 = vrcp.f32 %v3040_v45  ;;  %v6655_v45 = vld [vmem:[#allocation9 + $0x58] sm:$0xff] }
 0xc04   :  { %7497 = vst [vmem:[#allocation22_spill] sm:$0xff] %v6655_v45 }
 0xc0c   :  { %v4368_v0 = vpop.eup %4367 }
 0xc0d   :  { %v3044_v41 = vmul.f32 %v4368_v0, %v4364_v55  ;;  %v6640_v55 = vld [vmem:[#allocation9 + $0x68] sm:$0xff]  ;;  %v6646_v0 = vld [vmem:[#allocation9 + $0x60] sm:$0xff] }
 0xc0e   :  { %v4370_v62 = vpop.eup %4369  ;;  %7492 = vst [vmem:[#allocation50_spill] sm:$0xff] %v6640_v55  ;;  %7494 = vst [vmem:[#allocation55_spill] sm:$0xff] %v6646_v0 }
 0xc0f   :  { %v3043_v8 = vmul.f32 %v4370_v62, %v6417_v10  ;;  %v6538_v10 = vld [vmem:[#allocation9 + $0x180] sm:$0xff]  ;;  %v6652_v62 = vld [vmem:[#allocation9 + $0x48] sm:$0xff] }
 0xc10   :  { %v4372_v46 = vpop.eup %4371  ;;  %7496 = vst [vmem:[#allocation54_spill] sm:$0xff] %v6652_v62 }
 0xc11   :  { %v6523_v16 = vadd.f32 %v3044_v41, %v3043_v8  ;;  %v6649_v41 = vld [vmem:[#allocation9 + $0x70] sm:$0xff]  ;;  %v6658_v8 = vld [vmem:[#allocation9 + $0x40] sm:$0xff] }
 0xc12   :  { %7495 = vst [vmem:[#allocation56_spill] sm:$0xff] %v6649_v41  ;;  %7498 = vst [vmem:[#allocation23_spill] sm:$0xff] %v6658_v8 }
 0xc13   :  { %4373 = vtanh.f32 %v6523_v16 }
 0xc20   :  { %v4374_v11 = vpop.eup %4373 }
 0xc21   :  { %v3047_v57 = vmul.f32 %v4374_v11, %v4372_v46  ;;  %v6661_v46 = vld [vmem:[#allocation9 + $0x50] sm:$0xff]  ;;  %v6664_v11 = vld [vmem:[#allocation9 + $0x28] sm:$0xff] }
 0xc22   :  { %7499 = vst [vmem:[#allocation57_spill] sm:$0xff] %v6661_v46  ;;  %7500 = vst [vmem:[#allocation59_spill] sm:$0xff] %v6664_v11 }
 0xc23   :  { %3117 = vmatmul.mubr.f32.vlgmr.msra.gmra.mxu0 %v3047_v57  ;;  %3188 = vmatmul.mubr.f32.vlgmr.msra.gmra.mxu1 %v3047_v57  ;;  %v6667_v57 = vld [vmem:[#allocation9 + $0x38] sm:$0xff] }
 0xc24   :  { %3227 = vmatpush1.msra.mxu0 %v6420_v42  ;;  %3298 = vmatpush1.msra.mxu1 %v6423_v13  ;;  %7501 = vst [vmem:[#allocation60_spill] sm:$0xff] %v6667_v57 }
 0xc25   :  { %3228 = vmatprep.subr.mxu0 %v6426_v29  ;;  %3299 = vmatprep.subr.mxu1 %v6429_v15 }
 0xc26   :  { %3229 = vmatpush1.msra.mxu0 %v6432_v43  ;;  %3300 = vmatpush1.msra.mxu1 %v6435_v33 }
 0xc27   :  { %3230 = vmatprep.subr.mxu0 %v6438_v40  ;;  %3301 = vmatprep.subr.mxu1 %v6441_v9 }
 0xc28   :  { %3231 = vmatpush1.msra.mxu0 %v6444_v44  ;;  %3302 = vmatpush1.msra.mxu1 %v6447_v47 }
 0xc29   :  { %3232 = vmatprep.subr.mxu0 %v6450_v17  ;;  %3303 = vmatprep.subr.mxu1 %v6453_v56 }
 0xc2a   :  { %3233 = vmatpush1.msra.mxu0 %v6538_v10  ;;  %3304 = vmatpush1.msra.mxu1 %v6541_v49 }
 0xc2b   :  { %3234 = vmatprep.subr.mxu0 %v6544_v60  ;;  %3305 = vmatprep.subr.mxu1 %v6547_v59 }
 0xc2c   :  { %3235 = vmatpush1.msra.mxu0 %v6550_v58  ;;  %3306 = vmatpush1.msra.mxu1 %v6553_v6 }
 0xc2d   :  { %3236 = vmatprep.subr.mxu0 %v6556_v5  ;;  %3307 = vmatprep.subr.mxu1 %v6559_v63 }
 0xc2e   :  { %3237 = vmatpush1.msra.mxu0 %v6562_v61  ;;  %3308 = vmatpush1.msra.mxu1 %v6565_v14 }
 0xc2f   :  { %3238 = vmatprep.subr.mxu0 %v6568_v30  ;;  %3309 = vmatprep.subr.mxu1 %v6571_v3 }
 0xc30   :  { %3239 = vmatpush1.msra.mxu0 %v6574_v54  ;;  %3310 = vmatpush1.msra.mxu1 %v6577_v18 }
 0xc31   :  { %3240 = vmatprep.subr.mxu0 %v6580_v19  ;;  %3311 = vmatprep.subr.mxu1 %v6583_v20 }
 0xc32   :  { %3241 = vmatpush1.msra.mxu0 %v6586_v21  ;;  %3312 = vmatpush1.msra.mxu1 %v6589_v22 }
 0xc33   :  { %3242 = vmatprep.subr.mxu0 %v6592_v24  ;;  %3313 = vmatprep.subr.mxu1 %v6595_v25 }
 0xc34   :  { %3243 = vmatpush1.msra.mxu0 %v6598_v27  ;;  %3314 = vmatpush1.msra.mxu1 %v6601_v4 }
 0xc35   :  { %3244 = vmatprep.subr.mxu0 %v6604_v35  ;;  %3315 = vmatprep.subr.mxu1 %v6607_v36 }
 0xc36   :  { %3245 = vmatpush1.msra.mxu0 %v6610_v37  ;;  %3316 = vmatpush1.msra.mxu1 %v6613_v38 }
 0xc37   :  { %3246 = vmatprep.subr.mxu0 %v6616_v39  ;;  %3317 = vmatprep.subr.mxu1 %v6619_v2 }
 0xc38   :  { %3247 = vmatpush1.msra.mxu0 %v6622_v28  ;;  %3318 = vmatpush1.msra.mxu1 %v6625_v26 }
 0xc39   :  { %3248 = vmatprep.subr.mxu0 %v6628_v52  ;;  %3319 = vmatprep.subr.mxu1 %v6631_v53  ;;  %v7511_v53 = vld [vmem:[#allocation41_spill] sm:$0xff] }
 0xc3a   :  { %3249 = vmatpush1.msra.mxu0 %v6634_v51  ;;  %3320 = vmatpush1.msra.mxu1 %v6637_v1 }
 0xc3b   :  { %3250 = vmatprep.subr.mxu0 %v6640_v55  ;;  %3321 = vmatprep.subr.mxu1 %v6643_v32 }
 0xc3c   :  { %3251 = vmatpush1.msra.mxu0 %v6646_v0  ;;  %3322 = vmatpush1.msra.mxu1 %v6649_v41 }
 0xc3d   :  { %3252 = vmatprep.subr.mxu0 %v6652_v62  ;;  %3323 = vmatprep.subr.mxu1 %v6655_v45  ;;  %v6670_v62 = vld [vmem:[#allocation9 + $0x20] sm:$0xff]  ;;  %v6673_v45 = vld [vmem:[#allocation9 + $0x30] sm:$0xff] }
 0xc3e   :  { %3253 = vmatpush1.msra.mxu0 %v6658_v8  ;;  %3324 = vmatpush1.msra.mxu1 %v6661_v46  ;;  %7502 = vst [vmem:[#allocation44_spill] sm:$0xff] %v6670_v62  ;;  %7503 = vst [vmem:[#allocation49_spill] sm:$0xff] %v6673_v45  ;;  %v6676_v8 = vld [vmem:[#allocation9 + $0x8] sm:$0xff]  ;;  %v6679_v46 = vld [vmem:[#allocation9 + $0x18] sm:$0xff] }
 0xc3f   :  { %3254 = vmatprep.subr.mxu0 %v6664_v11  ;;  %3325 = vmatprep.subr.mxu1 %v6667_v57  ;;  %7504 = vst [vmem:[#allocation32_spill] sm:$0xff] %v6676_v8  ;;  %7505 = vst [vmem:[#allocation34_spill] sm:$0xff] %v6679_v46  ;;  %v6682_v11 = vld [vmem:[#allocation9] sm:$0xff]  ;;  %v6686_v57 = vld [vmem:[#allocation9 + $0x10] sm:$0xff] }
 0xc40   :  { %3255 = vmatpush1.msra.mxu0 %v6670_v62  ;;  %3326 = vmatpush1.msra.mxu1 %v6673_v45  ;;  %7506 = vst [vmem:[#allocation35_spill] sm:$0xff] %v6682_v11  ;;  %7507 = vst [vmem:[#allocation33_spill] sm:$0xff] %v6686_v57  ;;  %v7509_v62 = vld [vmem:[#allocation42_spill] sm:$0xff] }
 0xc41   :  { %3256 = vmatprep.subr.mxu0 %v6676_v8  ;;  %3327 = vmatprep.subr.mxu1 %v6679_v46  ;;  %v7508_v8 = vld [vmem:[#allocation40_spill] sm:$0xff]  ;;  %v2123_v41 = vadd.f32 %v7509_v62, %v6241_v48 }
 0xc42   :  { %3257 = vmatpush1.msra.mxu0 %v6682_v11  ;;  %3290 = vmatprep.mubr.f32.mxu0 %v7478_v50  ;;  %v2121_v45 = vadd.f32 %v7508_v8, %v7482_v7  ;;  %v2234_v8 = vadd.f32 %v7511_v53, %v6258_v23  ;;  %v7514_v53 = vld [vmem:[#allocation29_spill] sm:$0xff] }
 0xc43   :  { %3328 = vmatpush1.msra.mxu1 %v6686_v57  ;;  %3361 = vmatprep.mubr.f32.mxu1 %v7478_v50 }
 0xc44   :  { %3400 = vmatprep.subr.mxu0 %v6508_v31  ;;  %3471 = vmatprep.subr.mxu1 %v6511_v34  ;;  %v7510_v31 = vld [vmem:[#allocation65_spill] sm:$0xff] }
 0xc45   :  { %v2236_v51 = vadd.f32 %v7510_v31, %v7438_v12 }
 0xce3   :  { %v3118_v46 = vpop.f32.mrf.mxu0  ;;  %v3189_v1 = vpop.f32.mrf.mxu1 }
 0xce4   :  { %v3194_v11 = vadd.f32 %v3118_v46, %v2121_v45  ;;  %v3196_v7 = vadd.f32 %v3189_v1, %v2234_v8  ;;  %v7515_v1 = vld [vmem:[#allocation51_spill] sm:$0xff]  ;;  %v7517_v8 = vld [vmem:[#allocation50_spill] sm:$0xff] }
 0xce5   :  { %v3120_v0 = vpop.f32.mrf.mxu0  ;;  %v3191_v50 = vpop.f32.mrf.mxu1 }
 0xce6   :  { %v4049_v32 = vmul.f32 -1.442695, %v3194_v11  ;;  %v3195_v55 = vadd.f32 %v3120_v0, %v2123_v41  ;;  %v3197_v34 = vadd.f32 %v3191_v50, %v2236_v51 }
 0xce8   :  { %4375 = vpow2.f32 %v4049_v32  ;;  %v4050_v57 = vmul.f32 -1.442695, %v3195_v55  ;;  %v4051_v52 = vmul.f32 -1.442695, %v3197_v34 }
 0xcea   :  { %4377 = vpow2.f32 %v4050_v57  ;;  %v7516_v57 = vld [vmem:[#allocation52_spill] sm:$0xff] }
 0xceb   :  { %4379 = vtanh.f32 %v3196_v7 }
 0xcec   :  { %4381 = vpow2.f32 %v4051_v52  ;;  %v7513_v52 = vld [vmem:[#allocation31_spill] sm:$0xff] }
 0xcf5   :  { %v4376_v26 = vpop.eup %4375 }
 0xcf6   :  { %v3201_v62 = vadd.f32 1.0, %v4376_v26 }
 0xcf7   :  { %v4378_v45 = vpop.eup %4377 }
 0xcf8   :  { %4383 = vrcp.f32 %v3201_v62  ;;  %v3207_v32 = vadd.f32 1.0, %v4378_v45  ;;  %v4380_v55 = vpop.eup %4379  ;;  %v7518_v62 = vld [vmem:[#allocation53_spill] sm:$0xff]  ;;  %v7519_v45 = vld [vmem:[#allocation55_spill] sm:$0xff] }
 0xcf9   :  { %v4382_v0 = vpop.eup %4381 }
 0xcfa   :  { %4385 = vrcp.f32 %v3207_v32  ;;  %v3214_v31 = vadd.f32 1.0, %v4382_v0  ;;  %v7520_v32 = vld [vmem:[#allocation56_spill] sm:$0xff]  ;;  %v7522_v0 = vld [vmem:[#allocation22_spill] sm:$0xff] }
 0xcfc   :  { %4387 = vrcp.f32 %v3214_v31  ;;  %v7526_v31 = vld [vmem:[#allocation60_spill] sm:$0xff] }
 0xd05   :  { %v4384_v41 = vpop.eup %4383 }
 0xd06   :  { %v3218_v46 = vmul.f32 %v4384_v41, %v4380_v55  ;;  %v7521_v55 = vld [vmem:[#allocation54_spill] sm:$0xff]  ;;  %v7523_v41 = vld [vmem:[#allocation23_spill] sm:$0xff] }
 0xd07   :  { %v4386_v11 = vpop.eup %4385 }
 0xd08   :  { %v3217_v50 = vmul.f32 %v4386_v11, %v6523_v16  ;;  %v7512_v16 = vld [vmem:[#allocation74_spill] sm:$0xff]  ;;  %v7525_v11 = vld [vmem:[#allocation59_spill] sm:$0xff] }
 0xd09   :  { %v4388_v34 = vpop.eup %4387 }
 0xd0a   :  { %v6701_v51 = vadd.f32 %v3218_v46, %v3217_v50  ;;  %v7524_v46 = vld [vmem:[#allocation57_spill] sm:$0xff]  ;;  %v7527_v50 = vld [vmem:[#allocation44_spill] sm:$0xff] }
 0xd0c   :  { %4389 = vtanh.f32 %v6701_v51 }
 0xd19   :  { %v4390_v7 = vpop.eup %4389 }
 0xd1a   :  { %v3221_v26 = vmul.f32 %v4390_v7, %v4388_v34  ;;  %v7528_v34 = vld [vmem:[#allocation49_spill] sm:$0xff]  ;;  %v7529_v7 = vld [vmem:[#allocation32_spill] sm:$0xff] }
 0xd1c   :  { %3291 = vmatmul.mubr.f32.vlgmr.msra.gmra.mxu0 %v3221_v26  ;;  %3362 = vmatmul.mubr.f32.vlgmr.msra.gmra.mxu1 %v3221_v26  ;;  %v7530_v26 = vld [vmem:[#allocation34_spill] sm:$0xff] }
 0xd1d   :  { %3401 = vmatpush1.msra.mxu0 %v6420_v42  ;;  %3472 = vmatpush1.msra.mxu1 %v6423_v13 }
 0xd1e   :  { %3402 = vmatprep.subr.mxu0 %v6426_v29  ;;  %3473 = vmatprep.subr.mxu1 %v6429_v15 }
 0xd1f   :  { %3403 = vmatpush1.msra.mxu0 %v6432_v43  ;;  %3474 = vmatpush1.msra.mxu1 %v6435_v33 }
 0xd20   :  { %3404 = vmatprep.subr.mxu0 %v6438_v40  ;;  %3475 = vmatprep.subr.mxu1 %v6441_v9 }
 0xd21   :  { %3405 = vmatpush1.msra.mxu0 %v6444_v44  ;;  %3476 = vmatpush1.msra.mxu1 %v6447_v47 }
 0xd22   :  { %3406 = vmatprep.subr.mxu0 %v6450_v17  ;;  %3477 = vmatprep.subr.mxu1 %v6453_v56 }
 0xd23   :  { %3407 = vmatpush1.msra.mxu0 %v6538_v10  ;;  %3478 = vmatpush1.msra.mxu1 %v6541_v49 }
 0xd24   :  { %3408 = vmatprep.subr.mxu0 %v6544_v60  ;;  %3479 = vmatprep.subr.mxu1 %v6547_v59 }
 0xd25   :  { %3409 = vmatpush1.msra.mxu0 %v6550_v58  ;;  %3480 = vmatpush1.msra.mxu1 %v6553_v6 }
 0xd26   :  { %3410 = vmatprep.subr.mxu0 %v6556_v5  ;;  %3481 = vmatprep.subr.mxu1 %v6559_v63 }
 0xd27   :  { %3411 = vmatpush1.msra.mxu0 %v6562_v61  ;;  %3482 = vmatpush1.msra.mxu1 %v6565_v14 }
 0xd28   :  { %3412 = vmatprep.subr.mxu0 %v6568_v30  ;;  %3483 = vmatprep.subr.mxu1 %v6571_v3 }
 0xd29   :  { %3413 = vmatpush1.msra.mxu0 %v6574_v54  ;;  %3484 = vmatpush1.msra.mxu1 %v6577_v18 }
 0xd2a   :  { %3414 = vmatprep.subr.mxu0 %v6580_v19  ;;  %3485 = vmatprep.subr.mxu1 %v6583_v20 }
 0xd2b   :  { %3415 = vmatpush1.msra.mxu0 %v6586_v21  ;;  %3486 = vmatpush1.msra.mxu1 %v6589_v22 }
 0xd2c   :  { %3416 = vmatprep.subr.mxu0 %v6592_v24  ;;  %3487 = vmatprep.subr.mxu1 %v6595_v25 }
 0xd2d   :  { %3417 = vmatpush1.msra.mxu0 %v6598_v27  ;;  %3488 = vmatpush1.msra.mxu1 %v6601_v4 }
 0xd2e   :  { %3418 = vmatprep.subr.mxu0 %v6604_v35  ;;  %3489 = vmatprep.subr.mxu1 %v6607_v36 }
 0xd2f   :  { %3419 = vmatpush1.msra.mxu0 %v6610_v37  ;;  %3490 = vmatpush1.msra.mxu1 %v6613_v38 }
 0xd30   :  { %3420 = vmatprep.subr.mxu0 %v6616_v39  ;;  %3491 = vmatprep.subr.mxu1 %v6619_v2 }
 0xd31   :  { %3421 = vmatpush1.msra.mxu0 %v6622_v28  ;;  %3492 = vmatpush1.msra.mxu1 %v7512_v16 }
 0xd32   :  { %3422 = vmatprep.subr.mxu0 %v7513_v52  ;;  %3493 = vmatprep.subr.mxu1 %v7514_v53  ;;  %v7540_v53 = vld [vmem:[#allocation68_spill] sm:$0xff] }
 0xd33   :  { %3423 = vmatpush1.msra.mxu0 %v7515_v1  ;;  %3494 = vmatpush1.msra.mxu1 %v7516_v57 }
 0xd34   :  { %3424 = vmatprep.subr.mxu0 %v7517_v8  ;;  %3495 = vmatprep.subr.mxu1 %v7518_v62 }
 0xd35   :  { %3425 = vmatpush1.msra.mxu0 %v7519_v45  ;;  %3496 = vmatpush1.msra.mxu1 %v7520_v32  ;;  %v7531_v32 = vld [vmem:[#allocation35_spill] sm:$0xff] }
 0xd36   :  { %3426 = vmatprep.subr.mxu0 %v7521_v55  ;;  %3497 = vmatprep.subr.mxu1 %v7522_v0  ;;  %v7532_v55 = vmov 0.0   ;;  %v7533_v0 = vld [vmem:[#allocation33_spill] sm:$0xff] }
 0xd37   :  { %3427 = vmatpush1.msra.mxu0 %v7523_v41  ;;  %3498 = vmatpush1.msra.mxu1 %v7524_v46  ;;  %v7534_v46 = vld [vmem:[#allocation28_spill] sm:$0xff] }
 0xd38   :  { %3428 = vmatprep.subr.mxu0 %v7525_v11  ;;  %3499 = vmatprep.subr.mxu1 %v7526_v31  ;;  %v7535_v11 = vld [vmem:[#allocation30_spill] sm:$0xff]  ;;  %v7536_v31 = vld [vmem:[#allocation43_spill] sm:$0xff] }
 0xd39   :  { %3429 = vmatpush1.msra.mxu0 %v7527_v50  ;;  %3500 = vmatpush1.msra.mxu1 %v7528_v34  ;;  %v7537_v50 = vld [vmem:[#allocation67_spill] sm:$0xff] }
 0xd3a   :  { %3430 = vmatprep.subr.mxu0 %v7529_v7  ;;  %3501 = vmatprep.subr.mxu1 %v7530_v26  ;;  %v2127_v41 = vadd.f32 %v7537_v50, %v7536_v31  ;;  %v7538_v7 = vld [vmem:[#allocation66_spill] sm:$0xff]  ;;  %v2240_v50 = vadd.f32 %v7540_v53, %v6258_v23 }
 0xd3b   :  { %3431 = vmatpush1.msra.mxu0 %v7531_v32  ;;  %3464 = vmatprep.mubr.f32.mxu0 %v7532_v55  ;;  %v2129_v45 = vadd.f32 %v7538_v7, %v6241_v48 }
 0xd3c   :  { %3502 = vmatpush1.msra.mxu1 %v7533_v0  ;;  %3535 = vmatprep.mubr.f32.mxu1 %v7532_v55 }
 0xd3d   :  { %3574 = vmatprep.subr.mxu0 %v7534_v46  ;;  %3645 = vmatprep.subr.mxu1 %v7535_v11  ;;  %v7539_v46 = vld [vmem:[#allocation73_spill] sm:$0xff] }
 0xd3e   :  { %v2242_v1 = vadd.f32 %v7539_v46, %v7438_v12 }
 0xddc   :  { %v3292_v34 = vpop.f32.mrf.mxu0  ;;  %v3363_v57 = vpop.f32.mrf.mxu1 }
 0xddd   :  { %v3368_v26 = vadd.f32 %v3292_v34, %v2127_v41  ;;  %v3370_v31 = vadd.f32 %v3363_v57, %v2240_v50 }
 0xdde   :  { %v3294_v62 = vpop.f32.mrf.mxu0  ;;  %v3365_v55 = vpop.f32.mrf.mxu1 }
 0xddf   :  { %v4052_v32 = vmul.f32 -1.442695, %v3368_v26  ;;  %v3369_v8 = vadd.f32 %v3294_v62, %v2129_v45  ;;  %v3371_v11 = vadd.f32 %v3365_v55, %v2242_v1 }
 0xde1   :  { %4391 = vpow2.f32 %v4052_v32  ;;  %v4053_v0 = vmul.f32 -1.442695, %v3369_v8  ;;  %v4054_v52 = vmul.f32 -1.442695, %v3371_v11 }
 0xde3   :  { %4393 = vpow2.f32 %v4053_v0 }
 0xde4   :  { %4395 = vtanh.f32 %v3370_v31 }
 0xde5   :  { %4397 = vpow2.f32 %v4054_v52 }
 0xdee   :  { %v4392_v16 = vpop.eup %4391 }
 0xdef   :  { %v3375_v7 = vadd.f32 1.0, %v4392_v16 }
 0xdf0   :  { %v4394_v41 = vpop.eup %4393 }
 0xdf1   :  { %4399 = vrcp.f32 %v3375_v7  ;;  %v3381_v62 = vadd.f32 1.0, %v4394_v41  ;;  %v4396_v8 = vpop.eup %4395 }
 0xdf2   :  { %v4398_v45 = vpop.eup %4397 }
 0xdf3   :  { %4401 = vrcp.f32 %v3381_v62  ;;  %v3388_v26 = vadd.f32 1.0, %v4398_v45 }
 0xdf5   :  { %4403 = vrcp.f32 %v3388_v26 }
 0xdfe   :  { %v4400_v32 = vpop.eup %4399 }
 0xdff   :  { %v3392_v0 = vmul.f32 %v4400_v32, %v4396_v8 }
 0xe00   :  { %v4402_v34 = vpop.eup %4401 }
 0xe01   :  { %v3391_v1 = vmul.f32 %v4402_v34, %v6701_v51 }
 0xe02   :  { %v4404_v16 = vpop.eup %4403 }
 0xe03   :  { %v6779_v55 = vadd.f32 %v3392_v0, %v3391_v1 }
 0xe05   :  { %4405 = vtanh.f32 %v6779_v55 }
 0xe12   :  { %v4406_v53 = vpop.eup %4405 }
 0xe13   :  { %v3395_v57 = vmul.f32 %v4406_v53, %v4404_v16  ;;  %v3763_v16 = vld [vmem:[#allocation10 + $0x78] sm:$0xff]  ;;  %v3762_v53 = vld [vmem:[#allocation10 + $0x70] sm:$0xff] }
 0xe15   :  { %3465 = vmatmul.mubr.f32.vlgmr.msra.gmra.mxu0 %v3395_v57  ;;  %3536 = vmatmul.mubr.f32.vlgmr.msra.gmra.mxu1 %v3395_v57  ;;  %v3761_v57 = vld [vmem:[#allocation10 + $0x68] sm:$0xff] }
 0xe16   :  { %3575 = vmatpush1.msra.mxu0 %v6420_v42  ;;  %3646 = vmatpush1.msra.mxu1 %v6423_v13  ;;  %v7541_v42 = vld [vmem:[#allocation74_spill] sm:$0xff]  ;;  %v7542_v13 = vld [vmem:[#allocation31_spill] sm:$0xff] }
 0xe17   :  { %3576 = vmatprep.subr.mxu0 %v6426_v29  ;;  %3647 = vmatprep.subr.mxu1 %v6429_v15  ;;  %v7543_v29 = vld [vmem:[#allocation29_spill] sm:$0xff]  ;;  %v7544_v15 = vld [vmem:[#allocation51_spill] sm:$0xff] }
 0xe18   :  { %3577 = vmatpush1.msra.mxu0 %v6432_v43  ;;  %3648 = vmatpush1.msra.mxu1 %v6435_v33  ;;  %v7545_v43 = vld [vmem:[#allocation52_spill] sm:$0xff]  ;;  %v7546_v33 = vld [vmem:[#allocation50_spill] sm:$0xff] }
 0xe19   :  { %3578 = vmatprep.subr.mxu0 %v6438_v40  ;;  %3649 = vmatprep.subr.mxu1 %v6441_v9  ;;  %v7547_v40 = vld [vmem:[#allocation53_spill] sm:$0xff]  ;;  %v7548_v9 = vld [vmem:[#allocation55_spill] sm:$0xff] }
 0xe1a   :  { %3579 = vmatpush1.msra.mxu0 %v6444_v44  ;;  %3650 = vmatpush1.msra.mxu1 %v6447_v47  ;;  %v7549_v44 = vld [vmem:[#allocation56_spill] sm:$0xff]  ;;  %v7550_v47 = vld [vmem:[#allocation54_spill] sm:$0xff] }
 0xe1b   :  { %3580 = vmatprep.subr.mxu0 %v6450_v17  ;;  %3651 = vmatprep.subr.mxu1 %v6453_v56  ;;  %v7551_v17 = vld [vmem:[#allocation22_spill] sm:$0xff]  ;;  %v7552_v56 = vld [vmem:[#allocation23_spill] sm:$0xff] }
 0xe1c   :  { %3581 = vmatpush1.msra.mxu0 %v6538_v10  ;;  %3652 = vmatpush1.msra.mxu1 %v6541_v49  ;;  %v7553_v10 = vld [vmem:[#allocation57_spill] sm:$0xff]  ;;  %v7554_v49 = vld [vmem:[#allocation59_spill] sm:$0xff] }
 0xe1d   :  { %3582 = vmatprep.subr.mxu0 %v6544_v60  ;;  %3653 = vmatprep.subr.mxu1 %v6547_v59  ;;  %v7555_v60 = vld [vmem:[#allocation60_spill] sm:$0xff] }
 0xe1e   :  { %3583 = vmatpush1.msra.mxu0 %v6550_v58  ;;  %3654 = vmatpush1.msra.mxu1 %v6553_v6  ;;  %v7556_v59 = vld [vmem:[#allocation44_spill] sm:$0xff]  ;;  %v7557_v58 = vld [vmem:[#allocation49_spill] sm:$0xff] }
 0xe1f   :  { %3584 = vmatprep.subr.mxu0 %v6556_v5  ;;  %3655 = vmatprep.subr.mxu1 %v6559_v63  ;;  %v7558_v6 = vld [vmem:[#allocation32_spill] sm:$0xff]  ;;  %v7559_v5 = vld [vmem:[#allocation34_spill] sm:$0xff]  ;;  %v7560_v63 = vld [vmem:[#allocation35_spill] sm:$0xff] }
 0xe20   :  { %3585 = vmatpush1.msra.mxu0 %v6562_v61  ;;  %3656 = vmatpush1.msra.mxu1 %v6565_v14  ;;  %v7561_v61 = vmov 0.0   ;;  %v7562_v14 = vld [vmem:[#allocation33_spill] sm:$0xff] }
 0xe21   :  { %3586 = vmatprep.subr.mxu0 %v6568_v30  ;;  %3657 = vmatprep.subr.mxu1 %v6571_v3  ;;  %v7563_v30 = vld [vmem:[#allocation43_spill] sm:$0xff]  ;;  %v7564_v3 = vld [vmem:[#allocation24_spill] sm:$0xff] }
 0xe22   :  { %3587 = vmatpush1.msra.mxu0 %v6574_v54  ;;  %3658 = vmatpush1.msra.mxu1 %v6577_v18  ;;  %v2133_v54 = vadd.f32 %v7564_v3, %v7563_v30  ;;  %v3850_v3 = vld [vmem:[#allocation12 + $0x30] sm:$0xff] }
 0xe23   :  { %3588 = vmatprep.subr.mxu0 %v6580_v19  ;;  %3659 = vmatprep.subr.mxu1 %v6583_v20  ;;  %v7565_v19 = vld [vmem:[#allocation47_spill] sm:$0xff] }
 0xe24   :  { %3589 = vmatpush1.msra.mxu0 %v6586_v21  ;;  %3660 = vmatpush1.msra.mxu1 %v6589_v22  ;;  %v2135_v20 = vadd.f32 %v7565_v19, %v6241_v48  ;;  %v3847_v19 = vld [vmem:[#allocation12 + $0x18] sm:$0xff] }
 0xe25   :  { %3590 = vmatprep.subr.mxu0 %v6592_v24  ;;  %3661 = vmatprep.subr.mxu1 %v6595_v25 }
 0xe26   :  { %3591 = vmatpush1.msra.mxu0 %v6598_v27  ;;  %3662 = vmatpush1.msra.mxu1 %v6601_v4 }
 0xe27   :  { %3592 = vmatprep.subr.mxu0 %v6604_v35  ;;  %3663 = vmatprep.subr.mxu1 %v6607_v36  ;;  %v7566_v36 = vld [vmem:[#allocation69_spill] sm:$0xff] }
 0xe28   :  { %3593 = vmatpush1.msra.mxu0 %v6610_v37  ;;  %3664 = vmatpush1.msra.mxu1 %v6613_v38  ;;  %v2248_v37 = vadd.f32 %v7566_v36, %v7438_v12 }
 0xe29   :  { %3594 = vmatprep.subr.mxu0 %v6616_v39  ;;  %3665 = vmatprep.subr.mxu1 %v6619_v2  ;;  %v7567_v39 = vld [vmem:[#allocation27_spill] sm:$0xff] }
 0xe2a   :  { %3595 = vmatpush1.msra.mxu0 %v6622_v28  ;;  %3666 = vmatpush1.msra.mxu1 %v7541_v42  ;;  %v2246_v2 = vadd.f32 %v7567_v39, %v6258_v23  ;;  %v3759_v42 = vld [vmem:[#allocation10 + $0x58] sm:$0xff] }
 0xe2b   :  { %3596 = vmatprep.subr.mxu0 %v7542_v13  ;;  %3667 = vmatprep.subr.mxu1 %v7543_v29  ;;  %v3758_v13 = vld [vmem:[#allocation10 + $0x50] sm:$0xff]  ;;  %v3757_v29 = vld [vmem:[#allocation10 + $0x48] sm:$0xff] }
 0xe2c   :  { %3597 = vmatpush1.msra.mxu0 %v7544_v15  ;;  %3668 = vmatpush1.msra.mxu1 %v7545_v43  ;;  %v3756_v15 = vld [vmem:[#allocation10 + $0x40] sm:$0xff]  ;;  %v3755_v43 = vld [vmem:[#allocation10 + $0x38] sm:$0xff] }
 0xe2d   :  { %3598 = vmatprep.subr.mxu0 %v7546_v33  ;;  %3669 = vmatprep.subr.mxu1 %v7547_v40  ;;  %v3754_v33 = vld [vmem:[#allocation10 + $0x30] sm:$0xff]  ;;  %v3753_v40 = vld [vmem:[#allocation10 + $0x28] sm:$0xff] }
 0xe2e   :  { %3599 = vmatpush1.msra.mxu0 %v7548_v9  ;;  %3670 = vmatpush1.msra.mxu1 %v7549_v44  ;;  %v3752_v9 = vld [vmem:[#allocation10 + $0x20] sm:$0xff]  ;;  %v3751_v44 = vld [vmem:[#allocation10 + $0x18] sm:$0xff] }
 0xe2f   :  { %3600 = vmatprep.subr.mxu0 %v7550_v47  ;;  %3671 = vmatprep.subr.mxu1 %v7551_v17  ;;  %v3750_v47 = vld [vmem:[#allocation10 + $0x10] sm:$0xff]  ;;  %v3749_v17 = vld [vmem:[#allocation10 + $0x8] sm:$0xff] }
 0xe30   :  { %3601 = vmatpush1.msra.mxu0 %v7552_v56  ;;  %3672 = vmatpush1.msra.mxu1 %v7553_v10  ;;  %v3748_v56 = vld [vmem:[#allocation10] sm:$0xff]  ;;  %v3859_v10 = vld [vmem:[#allocation12 + $0x78] sm:$0xff] }
 0xe31   :  { %3602 = vmatprep.subr.mxu0 %v7554_v49  ;;  %3673 = vmatprep.subr.mxu1 %v7555_v60  ;;  %v3858_v49 = vld [vmem:[#allocation12 + $0x70] sm:$0xff]  ;;  %v3857_v60 = vld [vmem:[#allocation12 + $0x68] sm:$0xff] }
 0xe32   :  { %3603 = vmatpush1.msra.mxu0 %v7556_v59  ;;  %3674 = vmatpush1.msra.mxu1 %v7557_v58  ;;  %v3856_v59 = vld [vmem:[#allocation12 + $0x60] sm:$0xff]  ;;  %v3855_v58 = vld [vmem:[#allocation12 + $0x58] sm:$0xff] }
 0xe33   :  { %3604 = vmatprep.subr.mxu0 %v7558_v6  ;;  %3675 = vmatprep.subr.mxu1 %v7559_v5  ;;  %v3854_v6 = vld [vmem:[#allocation12 + $0x50] sm:$0xff]  ;;  %v3853_v5 = vld [vmem:[#allocation12 + $0x48] sm:$0xff] }
 0xe34   :  { %3605 = vmatpush1.msra.mxu0 %v7560_v63  ;;  %3638 = vmatprep.mubr.f32.mxu0 %v7561_v61  ;;  %v3852_v63 = vld [vmem:[#allocation12 + $0x40] sm:$0xff] }
 0xe35   :  { %3676 = vmatpush1.msra.mxu1 %v7562_v14  ;;  %3709 = vmatprep.mubr.f32.mxu1 %v7561_v61  ;;  %v3851_v14 = vld [vmem:[#allocation12 + $0x38] sm:$0xff] }
 0xe36   :  { %4097 = vmatprep.subr.mxu0 %v7561_v61  ;;  %4132 = vmatprep.subr.mxu1 %v7561_v61 }
 0xed5   :  { %v3466_v18 = vpop.f32.mrf.mxu0  ;;  %v3537_v27 = vpop.f32.mrf.mxu1 }
 0xed6   :  { %v3542_v21 = vadd.f32 %v3466_v18, %v2133_v54  ;;  %v3544_v28 = vadd.f32 %v3537_v27, %v2246_v2  ;;  %v3849_v54 = vld [vmem:[#allocation12 + $0x28] sm:$0xff]  ;;  %v3848_v18 = vld [vmem:[#allocation12 + $0x20] sm:$0xff] }
 0xed7   :  { %v3468_v22 = vpop.f32.mrf.mxu0  ;;  %v3539_v35 = vpop.f32.mrf.mxu1  ;;  %v7570_v2 = vld [vmem:[#allocation45_spill] sm:$0xff] }
 0xed8   :  { %v4055_v24 = vmul.f32 -1.442695, %v3542_v21  ;;  %v3543_v25 = vadd.f32 %v3468_v22, %v2135_v20  ;;  %v3545_v38 = vadd.f32 %v3539_v35, %v2248_v37  ;;  %v7568_v20 = vld [vmem:[#allocation71_spill] sm:$0xff] }
 0xed9   :  { %v2139_v21 = vadd.f32 %v7568_v20, %v7563_v30 }
 0xeda   :  { %4407 = vpow2.f32 %v4055_v24  ;;  %v4056_v4 = vmul.f32 -1.442695, %v3543_v25  ;;  %v4057_v51 = vmul.f32 -1.442695, %v3545_v38  ;;  %v7569_v24 = vld [vmem:[#allocation70_spill] sm:$0xff] }
 0xedb   :  { %v2141_v25 = vadd.f32 %v7569_v24, %v6241_v48 }
 0xedc   :  { %4409 = vpow2.f32 %v4056_v4 }
 0xedd   :  { %4411 = vtanh.f32 %v3544_v28  ;;  %v2254_v28 = vadd.f32 %v7570_v2, %v7438_v12 }
 0xede   :  { %4413 = vpow2.f32 %v4057_v51 }
 0xee7   :  { %v4408_v52 = vpop.eup %4407 }
 0xee8   :  { %v3549_v31 = vadd.f32 1.0, %v4408_v52  ;;  %v7571_v52 = vld [vmem:[#allocation72_spill] sm:$0xff] }
 0xee9   :  { %v4410_v46 = vpop.eup %4409  ;;  %v2252_v30 = vadd.f32 %v7571_v52, %v6258_v23 }
 0xeea   :  { %4415 = vrcp.f32 %v3549_v31  ;;  %v3555_v11 = vadd.f32 1.0, %v4410_v46  ;;  %v4412_v50 = vpop.eup %4411 }
 0xeeb   :  { %v4414_v7 = vpop.eup %4413 }
 0xeec   :  { %4417 = vrcp.f32 %v3555_v11  ;;  %v3562_v45 = vadd.f32 1.0, %v4414_v7 }
 0xeee   :  { %4419 = vrcp.f32 %v3562_v45 }
 0xef7   :  { %v4416_v41 = vpop.eup %4415 }
 0xef8   :  { %v3566_v62 = vmul.f32 %v4416_v41, %v4412_v50 }
 0xef9   :  { %v4418_v8 = vpop.eup %4417 }
 0xefa   :  { %v3565_v32 = vmul.f32 %v4418_v8, %v6779_v55  ;;  %v3760_v55 = vld [vmem:[#allocation10 + $0x60] sm:$0xff] }
 0xefb   :  { %v4420_v34 = vpop.eup %4419 }
 0xefc   :  { %v6857_v0 = vadd.f32 %v3566_v62, %v3565_v32 }
 0xefe   :  { %4421 = vtanh.f32 %v6857_v0 }
 0xf0b   :  { %v4422_v26 = vpop.eup %4421 }
 0xf0c   :  { %v3569_v1 = vmul.f32 %v4422_v26, %v4420_v34 }
 0xf0e   :  { %3639 = vmatmul.mubr.f32.vlgmr.msra.gmra.mxu0 %v3569_v1  ;;  %3710 = vmatmul.mubr.f32.vlgmr.msra.gmra.mxu1 %v3569_v1 }
 0xf0f   :  { %4098 = vmatpush3.msra.mxu0 %v3763_v16  ;;  %4129 = vmatprep.mubr.msk.f32.mxu0 %vm4747_vm2, %v7561_v61 }
 0xf10   :  { %4099 = vmatprep.subr.mxu0 %v7561_v61  ;;  %4164 = vmatprep.mubr.msk.f32.mxu1 %vm4747_vm2, %v7561_v61 }
 0xf11   :  { %4100 = vmatpush3.msra.mxu0 %v3762_v53  ;;  %4133 = vmatpush3.msra.mxu1 %v3859_v10  ;;  %v3846_v53 = vld [vmem:[#allocation12 + $0x10] sm:$0xff] }
 0xf12   :  { %4101 = vmatprep.subr.mxu0 %v7561_v61  ;;  %4134 = vmatprep.subr.mxu1 %v7561_v61 }
 0xf13   :  { %4102 = vmatpush3.msra.mxu0 %v3761_v57  ;;  %4135 = vmatpush3.msra.mxu1 %v3858_v49  ;;  %v3845_v57 = vld [vmem:[#allocation12 + $0x8] sm:$0xff] }
 0xf14   :  { %4103 = vmatprep.subr.mxu0 %v7561_v61  ;;  %4136 = vmatprep.subr.mxu1 %v7561_v61 }
 0xf15   :  { %4104 = vmatpush3.msra.mxu0 %v3760_v55  ;;  %4137 = vmatpush3.msra.mxu1 %v3857_v60  ;;  %v3844_v55 = vld [vmem:[#allocation12] sm:$0xff] }
 0xf16   :  { %4105 = vmatprep.subr.mxu0 %v7561_v61  ;;  %4138 = vmatprep.subr.mxu1 %v7561_v61 }
 0xf17   :  { %4106 = vmatpush3.msra.mxu0 %v3759_v42  ;;  %4139 = vmatpush3.msra.mxu1 %v3856_v59 }
 0xf18   :  { %4107 = vmatprep.subr.mxu0 %v7561_v61  ;;  %4140 = vmatprep.subr.mxu1 %v7561_v61 }
 0xf19   :  { %4108 = vmatpush3.msra.mxu0 %v3758_v13  ;;  %4141 = vmatpush3.msra.mxu1 %v3855_v58 }
 0xf1a   :  { %4109 = vmatprep.subr.mxu0 %v7561_v61  ;;  %4142 = vmatprep.subr.mxu1 %v7561_v61 }
 0xf1b   :  { %4110 = vmatpush3.msra.mxu0 %v3757_v29  ;;  %4143 = vmatpush3.msra.mxu1 %v3854_v6 }
 0xf1c   :  { %4111 = vmatprep.subr.mxu0 %v7561_v61  ;;  %4144 = vmatprep.subr.mxu1 %v7561_v61 }
 0xf1d   :  { %4112 = vmatpush3.msra.mxu0 %v3756_v15  ;;  %4145 = vmatpush3.msra.mxu1 %v3853_v5 }
 0xf1e   :  { %4113 = vmatprep.subr.mxu0 %v7561_v61  ;;  %4146 = vmatprep.subr.mxu1 %v7561_v61 }
 0xf1f   :  { %4114 = vmatpush3.msra.mxu0 %v3755_v43  ;;  %4147 = vmatpush3.msra.mxu1 %v3852_v63 }
 0xf20   :  { %4115 = vmatprep.subr.mxu0 %v7561_v61  ;;  %4148 = vmatprep.subr.mxu1 %v7561_v61 }
 0xf21   :  { %4116 = vmatpush3.msra.mxu0 %v3754_v33  ;;  %4149 = vmatpush3.msra.mxu1 %v3851_v14 }
 0xf22   :  { %4117 = vmatprep.subr.mxu0 %v7561_v61  ;;  %4150 = vmatprep.subr.mxu1 %v7561_v61 }
 0xf23   :  { %4118 = vmatpush3.msra.mxu0 %v3753_v40  ;;  %4151 = vmatpush3.msra.mxu1 %v3850_v3 }
 0xf24   :  { %4119 = vmatprep.subr.mxu0 %v7561_v61  ;;  %4152 = vmatprep.subr.mxu1 %v7561_v61 }
 0xf25   :  { %4120 = vmatpush3.msra.mxu0 %v3752_v9  ;;  %4153 = vmatpush3.msra.mxu1 %v3849_v54 }
 0xf26   :  { %4121 = vmatprep.subr.mxu0 %v7561_v61  ;;  %4154 = vmatprep.subr.mxu1 %v7561_v61 }
 0xf27   :  { %4122 = vmatpush3.msra.mxu0 %v3751_v44  ;;  %4155 = vmatpush3.msra.mxu1 %v3848_v18 }
 0xf28   :  { %4123 = vmatprep.subr.mxu0 %v7561_v61  ;;  %4156 = vmatprep.subr.mxu1 %v7561_v61 }
 0xf29   :  { %4124 = vmatpush3.msra.mxu0 %v3750_v47  ;;  %4157 = vmatpush3.msra.mxu1 %v3847_v19 }
 0xf2a   :  { %4125 = vmatprep.subr.mxu0 %v7561_v61  ;;  %4158 = vmatprep.subr.mxu1 %v7561_v61 }
 0xf2b   :  { %4126 = vmatpush3.msra.mxu0 %v3749_v17  ;;  %4159 = vmatpush3.msra.mxu1 %v3846_v53 }
 0xf2c   :  { %4127 = vmatprep.subr.mxu0 %v7561_v61  ;;  %4160 = vmatprep.subr.mxu1 %v7561_v61 }
 0xf2d   :  { %4128 = vmatpush3.msra.mxu0 %v3748_v56  ;;  %4161 = vmatpush3.msra.mxu1 %v3845_v57 }
 0xf2e   :  { %4162 = vmatprep.subr.mxu1 %v7561_v61 }
 0xf2f   :  { %4163 = vmatpush3.msra.mxu1 %v3844_v55 }
 0xfce   :  { %v3640_v22 = vpop.f32.mrf.mxu0  ;;  %v3711_v37 = vpop.f32.mrf.mxu1 }
 0xfcf   :  { %v3716_v27 = vadd.f32 %v3640_v22, %v2139_v21  ;;  %v3718_v31 = vadd.f32 %v3711_v37, %v2252_v30 }
 0xfd0   :  { %v3642_v4 = vpop.f32.mrf.mxu0  ;;  %v3713_v39 = vpop.f32.mrf.mxu1 }
 0xfd1   :  { %v4058_v35 = vmul.f32 -1.442695, %v3716_v27  ;;  %v3717_v36 = vadd.f32 %v3642_v4, %v2141_v25  ;;  %v3719_v51 = vadd.f32 %v3713_v39, %v2254_v28 }
 0xfd3   :  { %4423 = vpow2.f32 %v4058_v35  ;;  %v4059_v38 = vmul.f32 -1.442695, %v3717_v36  ;;  %v4060_v46 = vmul.f32 -1.442695, %v3719_v51 }
 0xfd5   :  { %4425 = vpow2.f32 %v4059_v38 }
 0xfd6   :  { %4427 = vtanh.f32 %v3718_v31 }
 0xfd7   :  { %4429 = vpow2.f32 %v4060_v46 }
 0xfe0   :  { %v4424_v11 = vpop.eup %4423 }
 0xfe1   :  { %v3723_v48 = vadd.f32 1.0, %v4424_v11 }
 0xfe2   :  { %v4426_v50 = vpop.eup %4425 }
 0xfe3   :  { %4431 = vrcp.f32 %v3723_v48  ;;  %v3729_v7 = vadd.f32 1.0, %v4426_v50  ;;  %v4428_v41 = vpop.eup %4427 }
 0xfe4   :  { %v4430_v62 = vpop.eup %4429 }
 0xfe5   :  { %4433 = vrcp.f32 %v3729_v7  ;;  %v3736_v12 = vadd.f32 1.0, %v4430_v62 }
 0xfe7   :  { %4435 = vrcp.f32 %v3736_v12 }
 0xff0   :  { %v4432_v8 = vpop.eup %4431 }
 0xff1   :  { %v3740_v45 = vmul.f32 %v4432_v8, %v4428_v41 }
 0xff2   :  { %v4434_v32 = vpop.eup %4433 }
 0xff3   :  { %v3739_v34 = vmul.f32 %v4434_v32, %v6857_v0  ;;  %v4061_v0 = vld [vmem:[%s6930_s8] ss:$0 sm:$0xff] }
 0xff4   :  { %v4436_v23 = vpop.eup %4435 }
 0xff5   :  { %v3741_v26 = vadd.f32 %v3740_v45, %v3739_v34 }
 0xff7   :  { %3747 = vst [vmem:[#allocation16 + $0x8] sm:$0xff] %v3741_v26  ;;  %4437 = vtanh.f32 %v3741_v26 }
0x1004   :  { %v4438_v1 = vpop.eup %4437 }
0x1005   :  { %v3743_v16 = vmul.f32 %v4438_v1, %v4436_v23 }
0x1007   :  { %4130 = vmatmul.mubr.f32.vlgmr.msra.gmra.mxu0 %v3743_v16  ;;  %3745 = vst [vmem:[#allocation14 + $0x8] sm:$0xff] %v3743_v16 }
0x10c7   :  { %v3837_v42 = vpop.f32.mrf.mxu0 }
0x10c8   :  { %v3838_v13 = vadd.f32 %v4061_v0, %v3837_v42 }
0x10c9   :  { %v4131_v29 = vpop.f32.mrf.mxu0 }
0x10ca   :  { %vm3841_vm3 = vcmp.gt.f32.partialorder %v3838_v13, 0.0  ;;  %v3842_v15 = vmul.f32 0.01, %v3838_v13 }
0x10cc   :  { %v3843_v43 = vsel %vm3841_vm3, %v3838_v13, %v3842_v15 }
0x10cd   :  { %4165 = vmatmul.mubr.f32.vlgmr.msra.gmra.mxu1 %v3843_v43 }
0x10ce   :  { %4678 = shalt.err (!%p4675_p1)
}
0x10cf   :  { %3959 = dma.vmem_to_hbm [thread:$0]  %s3954_s21, 256, %s6934_s12, [#allocation15], %s4741_s18, %s4741_s18, %s4742_s19  }
0x10d0   :  { %s4749_s1 = smov [#allocation16]  }
0x10d1   :  { %s3965_s23 = sshll.u32 %s4749_s1, 4  ;;  %s3966_s23 = int_to_ptr.vmem [resolvable:$true] %s3965_s23 }
0x10d2   :  { %s4687_s24 = scalar_lea.vmem %s3966_s23, 256  ;;  %p4692_p3 = scmp.lt.s32.totalorder %s3966_s23, %s3966_s23 }
0x10d3   :  { %p4688_p2 = scmp.ne.s32.totalorder %s3966_s23, %s4687_s24  ;;  %p4693_p4 = scmp.lt.s32.totalorder %s4687_s24, %s4687_s24 }
0x10d5   :  { %p4694_p5 = por %p4693_p4, %p4692_p3 }
0x10d7   :  { %p4695_p6 = pnand %p4694_p5, %p4688_p2 }
0x10d9   :  { %4698 = shalt.err (!%p4695_p6)
}
0x10da   :  { %3971 = dma.vmem_to_hbm [thread:$0]  %s3966_s23, 256, %s6935_s13, [#allocation15], %s4741_s18, %s4741_s18, %s4742_s19  }
0x10db   :  { %v4062_v61 = vld [vmem:[%s6932_s10] ss:$0 sm:$0xff]  ;;  %s4750_s12 = smov [#allocation13]  }
0x10dc   :  { %s3944_s7 = sshll.u32 %s4750_s12, 4  ;;  %s3945_s7 = int_to_ptr.vmem [resolvable:$true] %s3944_s7 }
0x10dd   :  { %s4707_s28 = scalar_lea.vmem %s3945_s7, 128  ;;  %p4712_p8 = scmp.lt.s32.totalorder %s3945_s7, %s3945_s7 }
0x10de   :  { %p4708_p7 = scmp.ne.s32.totalorder %s3945_s7, %s4707_s28  ;;  %p4713_p9 = scmp.lt.s32.totalorder %s4707_s28, %s4707_s28 }
0x10e0   :  { %p4714_p10 = por %p4713_p9, %p4712_p8 }
0x10e2   :  { %p4715_p11 = pnand %p4714_p10, %p4708_p7 }
0x118d   :  { %v3933_v33 = vpop.f32.mrf.mxu1 }
0x118e   :  { %v3934_v40 = vadd.f32 %v4062_v61, %v3933_v33 }
0x118f   :  { %v4166_v9 = vpop.f32.mrf.mxu1 }
0x1190   :  { %3937 = vst [vmem:[#allocation13] sm:$0xff] %v3934_v40 }
0x1191   :  { %4718 = shalt.err (!%p4715_p11)
}
0x1192   :  { %3947 = dma.vmem_to_hbm [thread:$0]  %s3945_s7, 128, %s6933_s11, [#allocation6]  }
0x1193   :  { %4733 = dma.done.wait [#allocation6], 128  }
0x1194   :  { %4734 = vsyncadd [#allocation6], 4294967168 }
0x1195   :  { %4735 = dma.done.wait [#allocation15], 512  }
0x1196   :  { %4736 = vsyncadd [#allocation15], 4294966784 }
0x1197   :  { %3981 = vsyncpa [#allocation5], 1 }
0x1198   :  { %3982 = vsyncpa [#allocation8], 1 }
0x1199   :  { %3983 = vsyncpa [#allocation11], 1 }
0x119a   :  { %3984 = vsyncpa [#allocation6], 1 }
0x119b   :  { %3985 = vsyncpa [#allocation15], 1 }

</bundles_post_ra>
